<compile_context>
chip_gen: v7x
topology: tpu7x:2x2x1
jax: 0.10.0
libtpu: 0.0.40
codegen_flags: <defaults>
</compile_context>

<pallas_src>
import jax
import jax.numpy as jnp
import numpy as np
from jax.experimental import pallas as pl
from jax.experimental.pallas import tpu as pltpu

_EPS = 1e-5


# ----------------------------------------------------------------------------
# Host-side folding of {bilinear x2 upsample, 3x3 conv, BatchNorm} per stage
# ----------------------------------------------------------------------------
def _bilinear_up_matrix(n):
    """(n, 2n) matrix U with U[i, j] = weight of input i for output j.

    Matches torch.nn.Upsample(scale_factor=2, mode='bilinear', align_corners=False):
    src = (j + 0.5)/2 - 0.5, linear interpolation, edge clamp.
    """
    U = np.zeros((n, 2 * n), np.float32)
    for j in range(2 * n):
        src = (j + 0.5) / 2.0 - 0.5
        f = int(np.floor(src))
        t = src - f
        i0 = min(max(f, 0), n - 1)
        i1 = min(max(f + 1, 0), n - 1)
        U[i0, j] += 1.0 - t
        U[i1, j] += t
    return U


def _prepare_stage(p, cin, h, w, bsz, c_major_in):
    """Fold one {upsample x2, conv3x3(pad=1), BN} stage into (Ĝ, U_dx_blockdiag, shift).

    Activation layout in the kernel: A[row, col] with row = y*C + c (y-major,
    channel-minor; for the very first stage row = c*H + y, a plain reshape of the NCHW
    input) and col = i*W + x — `bsz` images stacked side by side along the lane axis.
    The stage is   relu( Ĝ @ concat_rows(A@U0, A@U1, A@U2) + shift ).
    """
    wt = np.asarray(p["w"], np.float32)                     # (Co, Cin, 3, 3)  OIHW
    co = wt.shape[0]
    hy, wy = 2 * h, 2 * w

    scale = np.asarray(p["gamma"], np.float32) / np.sqrt(
        np.asarray(p["var"], np.float32) + _EPS)
    shift = (np.asarray(p["b"], np.float32) -
             np.asarray(p["mean"], np.float32)) * scale + np.asarray(p["beta"], np.float32)

    # Right factors: W-upsample + horizontal zero pad + dx tap shift, made block-diagonal
    # over the `bsz` images stacked along the lane axis (keeps images in lane blocks).
    uw_core = _bilinear_up_matrix(w)                        # (W, 2W)
    uw_pad = np.zeros((w, wy + 2), np.float32)
    uw_pad[:, 1:wy + 1] = uw_core
    eye_b = np.eye(bsz, dtype=np.float32)
    u_dx = [np.kron(eye_b, np.ascontiguousarray(uw_pad[:, dx:dx + wy]))
            for dx in range(3)]                             # (B*W, B*2W)

    # H-upsample + vertical zero pad, left-multiplication form.
    uh_core = _bilinear_up_matrix(h)                        # (H, 2H)
    k = np.kron(uh_core.T, np.eye(cin, dtype=np.float32))   # (2H*C, H*C), col = y*C + c
    if c_major_in:                                          # input cols are c*H + y
        colmap = np.arange(h * cin).reshape(h, cin).T.reshape(-1)
        k = k[:, colmap]
    uh_pad = np.zeros(((hy + 2) * cin, h * cin), np.float32)
    uh_pad[cin:(hy + 1) * cin, :] = k

    # Conv taps grouped by dx (BN scale folded in), composed with the H-upsample,
    # then concatenated along K so the dx-sum runs inside MXU accumulation.
    g_dx = []
    for dx in range(3):
        m = np.zeros((hy * co, (hy + 2) * cin), np.float32)
        for i in range(hy):
            for dy in range(3):
                m[i * co:(i + 1) * co, (i + dy) * cin:(i + dy + 1) * cin] = (
                    scale[:, None] * wt[:, :, dy, dx])
        g_dx.append(m @ uh_pad)                             # (2H*Co, H*C)
    g_cat = np.concatenate(g_dx, axis=1)                    # (2H*Co, 3*H*C)

    shift_col = np.tile(shift, hy)[:, None].astype(np.float32)   # (2H*Co, 1)
    return g_cat, u_dx, shift_col


def _prepare_head(wh, bh, c, h):
    """1x1 conv head as a left matrix with o-major rows (row = o*H + y) + bias column."""
    wh = np.asarray(wh, np.float32)                         # (O, C)
    o_ch = wh.shape[0]
    mh = np.zeros((o_ch * h, h * c), np.float32)
    for o in range(o_ch):
        for y in range(h):
            mh[o * h + y, y * c:(y + 1) * c] = wh[o]
    bcol = np.repeat(np.asarray(bh, np.float32), h)[:, None]    # (O*H, 1)
    return mh, bcol


def prepare_decoder_params(stages, head, in_channels, h0, w0,
                           images_per_step=1, param_dtype=jnp.bfloat16):
    """Flatten all folded operators; matmul operands in `param_dtype`, biases in f32."""
    c, h, w = in_channels, h0, w0
    flat = []
    for s, p in enumerate(stages):
        g_cat, u_dx, shift = _prepare_stage(p, c, h, w, images_per_step,
                                            c_major_in=(s == 0))
        flat += [jnp.asarray(g_cat, param_dtype),
                 jnp.asarray(u_dx[0], param_dtype),
                 jnp.asarray(u_dx[1], param_dtype),
                 jnp.asarray(u_dx[2], param_dtype),
                 jnp.asarray(shift, jnp.float32)]           # shift add stays f32 (v5e VPU)
        c, h, w = int(p["w"].shape[0]), 2 * h, 2 * w
    wh, bh = head
    mh, bcol = _prepare_head(wh, bh, c, h)
    flat += [jnp.asarray(mh, param_dtype), jnp.asarray(bcol, jnp.float32)]
    return flat


# ----------------------------------------------------------------------------
# Fused Pallas kernel: one grid step == B images, everything stays in VMEM.
# ----------------------------------------------------------------------------
def _decoder_kernel(*refs):
    x_ref, out_ref = refs[0], refs[-1]
    prm = refs[1:-1]
    n_stages = (len(prm) - 2) // 5
    cdt = prm[0].dtype                                      # matmul-operand dtype

    a = x_ref[0].astype(cdt)                                # (C*H, B*W)
    for s in range(n_stages):
        gcat, u0, u1, u2, shift = prm[5 * s:5 * s + 5]
        # dx-shifted, width-upsampled copies of A stacked along K (rows).  Each block has
        # H*C rows (multiple of 8) so the row-concat is layout-free.
        b = jnp.concatenate(
            [jnp.dot(a, u0[...], preferred_element_type=jnp.float32),
             jnp.dot(a, u1[...], preferred_element_type=jnp.float32),
             jnp.dot(a, u2[...], preferred_element_type=jnp.float32)],
            axis=0).astype(cdt)                             # (3*H*C, B*2W)
        # Single fused left matmul: dy-taps, H-upsample, BN scale all folded into Ĝ; the
        # dx-sum happens inside MXU accumulation (K = 3*H*C).
        acc = jnp.dot(gcat[...], b, preferred_element_type=jnp.float32)
        a = jnp.maximum(acc + shift[...], 0.0).astype(cdt)  # f32 add/ReLU; bf16 operand

    mh, bcol = prm[-2], prm[-1]                             # 1x1 head, o-major rows
    o = jnp.dot(mh[...], a, preferred_element_type=jnp.float32) + bcol[...]
    out_ref[...] = o.reshape(1, *o.shape).astype(out_ref.dtype)


def _pick_images_per_step(n, max_images=4):
    """Largest divisor of n <= max_images that keeps the grid length >= 2 (so both v7x
    TensorCores get work).  max_images=4 gives a 256-lane matmul minor dim / output slab
    at the later stages for W0=4 (fills the 256-wide v6e/v7x MXU; 128 already fills v5e)."""
    best = 1
    for b in range(1, max(1, min(max_images, n)) + 1):
        if n % b == 0 and (n // b >= 2 or n == 1):
            best = b
    return best


@jax.jit
def decoder_l4_pallas(x_nchw, kparams):
    n, c, h, w = x_nchw.shape
    bsz = kparams[1].shape[0] // w              # images per grid step (baked into U_blk)
    assert n % bsz == 0, (n, bsz)
    g = n // bsz
    hf, wf = 16 * h, 16 * w
    o_ch = kparams[-2].shape[0] // hf

    # (N,C,H,W) -> (G, C*H, B*W): rows = c*H + y, B images side by side along lanes.
    # Tiny one-pass XLA rearrange on the (small) input; all heavy work is in the kernel.
    x2d = (x_nchw.reshape(g, bsz, c, h, w)
           .transpose(0, 2, 3, 1, 4)
           .reshape(g, c * h, bsz * w))

    in_specs = [pl.BlockSpec((1, c * h, bsz * w), lambda i: (i, 0, 0))]
    for prm in kparams:                         # constant index map: DMA'd to VMEM once
        in_specs.append(pl.BlockSpec(prm.shape, lambda i: (0, 0)))

    out = pl.pallas_call(
        _decoder_kernel,
        out_shape=jax.ShapeDtypeStruct((g, hf * o_ch, bsz * wf), jnp.float32),
        grid=(g,),
        in_specs=in_specs,
        out_specs=pl.BlockSpec((1, hf * o_ch, bsz * wf), lambda i: (i, 0, 0)),
        compiler_params=pltpu.CompilerParams(
            dimension_semantics=("parallel",),  # grid steps shard across TensorCores
            vmem_limit_bytes=32 * 1024 * 1024),
    )(x2d, *kparams)

    # (G, O*Hf, B*Wf) with o-major rows and image i in lane block i  ->  NCHW.
    out = out.reshape(g, o_ch, hf, bsz, wf).transpose(0, 3, 1, 2, 4)
    return out.reshape(n, o_ch, hf, wf)


# ----------------------------------------------------------------------------
# Parameters (PyTorch-style layout) and an independent pure-JAX reference
# ----------------------------------------------------------------------------
def init_params(key, in_channels, out_channels):
    stages = []
    c = in_channels
    for _ in range(4):
        co = c // 2
        key, k1, k2, k3, k4, k5, k6 = jax.random.split(key, 7)
        stages.append(dict(
            w=jax.random.normal(k1, (co, c, 3, 3), jnp.float32) / np.sqrt(9.0 * c),
            b=0.1 * jax.random.normal(k2, (co,), jnp.float32),
            gamma=1.0 + 0.1 * jax.random.normal(k3, (co,), jnp.float32),
            beta=0.1 * jax.random.normal(k4, (co,), jnp.float32),
            mean=0.1 * jax.random.normal(k5, (co,), jnp.float32),
            var=jnp.abs(jax.random.normal(k6, (co,), jnp.float32)) + 0.5,
        ))
        c = co
    key, k1, k2 = jax.random.split(key, 3)
    head_w = jax.random.normal(k1, (out_channels, c), jnp.float32) / np.sqrt(float(c))
    head_b = 0.1 * jax.random.normal(k2, (out_channels,), jnp.float32)
    return stages, (head_w, head_b)


def _upsample2x_bilinear_ref(x):
    """NCHW, scale 2, bilinear, align_corners=False (PyTorch formula, gather-based)."""
    def up_axis(v, axis):
        nsrc = v.shape[axis]
        j = jnp.arange(2 * nsrc)
        src = (j + 0.5) / 2.0 - 0.5
        f = jnp.floor(src)
        t = (src - f).astype(v.dtype)
        i0 = jnp.clip(f.astype(jnp.int32), 0, nsrc - 1)
        i1 = jnp.clip(f.astype(jnp.int32) + 1, 0, nsrc - 1)
        v0 = jnp.take(v, i0, axis=axis)
        v1 = jnp.take(v, i1, axis=axis)
        tb = t.reshape([1] * axis + [2 * nsrc] + [1] * (v.ndim - axis - 1))
        return v0 * (1.0 - tb) + v1 * tb
    return up_axis(up_axis(x, 2), 3)


def decoder_l4_ref(x, stages, head):
    hp = jax.lax.Precision.HIGHEST
    for p in stages:
        x = _upsample2x_bilinear_ref(x)
        y = jax.lax.conv_general_dilated(
            x, p["w"], window_strides=(1, 1), padding=((1, 1), (1, 1)),
            dimension_numbers=("NCHW", "OIHW", "NCHW"), precision=hp)
        y = y + p["b"][None, :, None, None]
        y = (y - p["mean"][None, :, None, None]) * (
            p["gamma"][None, :, None, None] /
            jnp.sqrt(p["var"][None, :, None, None] + _EPS)) + p["beta"][None, :, None, None]
        x = jnp.maximum(y, 0.0)
    wh, bh = head
    x = jnp.einsum("nchw,oc->nohw", x, wh, precision=hp) + bh[None, :, None, None]
    return x


if __name__ == "__main__":
    in_channels, out_channels = 32, 1        # in_channels must be divisible by 16
    N, H0, W0 = 8, 4, 4                      # final output: (8, 1, 64, 64)

    key = jax.random.PRNGKey(0)
    key, kx = jax.random.split(key)
    x = jax.random.normal(kx, (N, in_channels, H0, W0), jnp.float32)   # NCHW like PyTorch

    stages, head = init_params(key, in_channels, out_channels)
    ref = jax.block_until_ready(decoder_l4_ref(x, stages, head))

    bsz = _pick_images_per_step(N)           # -> 4 images/step, grid length 2 (even)

    # f32-operand path: validates the folded operator (upsample/pad/conv/BN fold,
    # dx fusion, lane batching) tightly against the PyTorch-semantics reference.
    kp32 = prepare_decoder_params(stages, head, in_channels, H0, W0,
                                  images_per_step=bsz, param_dtype=jnp.float32)
    out32 = jax.block_until_ready(decoder_l4_pallas(x, kp32))
    assert out32.shape == (N, out_channels, 16 * H0, 16 * W0), out32.shape
    np.testing.assert_allclose(np.asarray(out32), np.asarray(ref), rtol=2e-3, atol=2e-3)

    # bf16-operand fast path (f32 accumulation, f32 elementwise).  bf16 rounding of the
    # folded matrices/activations accumulates over 4 stages, so the tolerance vs. the
    # f32 reference is the bf16-appropriate one; algorithmic exactness is already proven
    # by the f32 check above.
    kp16 = prepare_decoder_params(stages, head, in_channels, H0, W0,
                                  images_per_step=bsz, param_dtype=jnp.bfloat16)
    out16 = jax.block_until_ready(decoder_l4_pallas(x, kp16))
    assert out16.shape == (N, out_channels, 16 * H0, 16 * W0), out16.shape
    np.testing.assert_allclose(np.asarray(out16), np.asarray(ref), rtol=5e-2, atol=5e-2)

    print("KERNEL_OK")
</pallas_src>

<mosaic_0001>
module attributes {stable_mosaic.version = 11 : i64} {
  func.func @_decoder_kernel(%arg0: i32, %arg1: memref<1x128x16xf32, #tpu.memory_space<vmem>>, %arg2: memref<128x384xf32, #tpu.memory_space<vmem>>, %arg3: memref<16x32xf32, #tpu.memory_space<vmem>>, %arg4: memref<16x32xf32, #tpu.memory_space<vmem>>, %arg5: memref<16x32xf32, #tpu.memory_space<vmem>>, %arg6: memref<128x1xf32, #tpu.memory_space<vmem>>, %arg7: memref<128x384xf32, #tpu.memory_space<vmem>>, %arg8: memref<32x64xf32, #tpu.memory_space<vmem>>, %arg9: memref<32x64xf32, #tpu.memory_space<vmem>>, %arg10: memref<32x64xf32, #tpu.memory_space<vmem>>, %arg11: memref<128x1xf32, #tpu.memory_space<vmem>>, %arg12: memref<128x384xf32, #tpu.memory_space<vmem>>, %arg13: memref<64x128xf32, #tpu.memory_space<vmem>>, %arg14: memref<64x128xf32, #tpu.memory_space<vmem>>, %arg15: memref<64x128xf32, #tpu.memory_space<vmem>>, %arg16: memref<128x1xf32, #tpu.memory_space<vmem>>, %arg17: memref<128x384xf32, #tpu.memory_space<vmem>>, %arg18: memref<128x256xf32, #tpu.memory_space<vmem>>, %arg19: memref<128x256xf32, #tpu.memory_space<vmem>>, %arg20: memref<128x256xf32, #tpu.memory_space<vmem>>, %arg21: memref<128x1xf32, #tpu.memory_space<vmem>>, %arg22: memref<64x128xf32, #tpu.memory_space<vmem>>, %arg23: memref<64x1xf32, #tpu.memory_space<vmem>>, %arg24: memref<1x64x256xf32, #tpu.memory_space<vmem>>) attributes {dimension_semantics = [#tpu.dimension_semantics<parallel>], iteration_bounds = array<i64: 2>, scalar_prefetch = 0 : i64, scratch_operands = 0 : i64, tpu.core_type = #tpu.core_type<tc>, window_params = [{transform_indices = @transform_0, window_bounds = array<i64: 1, 128, 16>}, {pipeline_mode = #tpu.pipeline_mode<synchronous>, transform_indices = @transform_1, window_bounds = array<i64: 128, 384>}, {pipeline_mode = #tpu.pipeline_mode<synchronous>, transform_indices = @transform_2, window_bounds = array<i64: 16, 32>}, {pipeline_mode = #tpu.pipeline_mode<synchronous>, transform_indices = @transform_3, window_bounds = array<i64: 16, 32>}, {pipeline_mode = #tpu.pipeline_mode<synchronous>, transform_indices = @transform_4, window_bounds = array<i64: 16, 32>}, {pipeline_mode = #tpu.pipeline_mode<synchronous>, transform_indices = @transform_5, window_bounds = array<i64: 128, 1>}, {pipeline_mode = #tpu.pipeline_mode<synchronous>, transform_indices = @transform_6, window_bounds = array<i64: 128, 384>}, {pipeline_mode = #tpu.pipeline_mode<synchronous>, transform_indices = @transform_7, window_bounds = array<i64: 32, 64>}, {pipeline_mode = #tpu.pipeline_mode<synchronous>, transform_indices = @transform_8, window_bounds = array<i64: 32, 64>}, {pipeline_mode = #tpu.pipeline_mode<synchronous>, transform_indices = @transform_9, window_bounds = array<i64: 32, 64>}, {pipeline_mode = #tpu.pipeline_mode<synchronous>, transform_indices = @transform_10, window_bounds = array<i64: 128, 1>}, {pipeline_mode = #tpu.pipeline_mode<synchronous>, transform_indices = @transform_11, window_bounds = array<i64: 128, 384>}, {pipeline_mode = #tpu.pipeline_mode<synchronous>, transform_indices = @transform_12, window_bounds = array<i64: 64, 128>}, {pipeline_mode = #tpu.pipeline_mode<synchronous>, transform_indices = @transform_13, window_bounds = array<i64: 64, 128>}, {pipeline_mode = #tpu.pipeline_mode<synchronous>, transform_indices = @transform_14, window_bounds = array<i64: 64, 128>}, {pipeline_mode = #tpu.pipeline_mode<synchronous>, transform_indices = @transform_15, window_bounds = array<i64: 128, 1>}, {pipeline_mode = #tpu.pipeline_mode<synchronous>, transform_indices = @transform_16, window_bounds = array<i64: 128, 384>}, {pipeline_mode = #tpu.pipeline_mode<synchronous>, transform_indices = @transform_17, window_bounds = array<i64: 128, 256>}, {pipeline_mode = #tpu.pipeline_mode<synchronous>, transform_indices = @transform_18, window_bounds = array<i64: 128, 256>}, {pipeline_mode = #tpu.pipeline_mode<synchronous>, transform_indices = @transform_19, window_bounds = array<i64: 128, 256>}, {pipeline_mode = #tpu.pipeline_mode<synchronous>, transform_indices = @transform_20, window_bounds = array<i64: 128, 1>}, {pipeline_mode = #tpu.pipeline_mode<synchronous>, transform_indices = @transform_21, window_bounds = array<i64: 64, 128>}, {pipeline_mode = #tpu.pipeline_mode<synchronous>, transform_indices = @transform_22, window_bounds = array<i64: 64, 1>}, {transform_indices = @transform_23, window_bounds = array<i64: 1, 64, 256>}]} {
    %c0 = arith.constant 0 : index
    %c0_0 = arith.constant 0 : index
    %c0_1 = arith.constant 0 : index
    %0 = vector.load %arg1[%c0, %c0_0, %c0_1] : memref<1x128x16xf32, #tpu.memory_space<vmem>>, vector<1x128x16xf32>
    %1 = vector.shape_cast %0 : vector<1x128x16xf32> to vector<128x16xf32>
    %c0_2 = arith.constant 0 : index
    %c0_3 = arith.constant 0 : index
    %2 = vector.load %arg3[%c0_2, %c0_3] : memref<16x32xf32, #tpu.memory_space<vmem>>, vector<16x32xf32>
    %cst = arith.constant dense<0.000000e+00> : vector<128x32xf32>
    %3 = tpu.matmul %1, %2, %cst {dimension_numbers = #tpu.dot_dimension_numbers<[1], [0], [0], [1], [0, 0, 1, 1], [], []>} : vector<128x16xf32>, vector<16x32xf32>, vector<128x32xf32> -> vector<128x32xf32>
    %c0_4 = arith.constant 0 : index
    %c0_5 = arith.constant 0 : index
    %4 = vector.load %arg4[%c0_4, %c0_5] : memref<16x32xf32, #tpu.memory_space<vmem>>, vector<16x32xf32>
    %cst_6 = arith.constant dense<0.000000e+00> : vector<128x32xf32>
    %5 = tpu.matmul %1, %4, %cst_6 {dimension_numbers = #tpu.dot_dimension_numbers<[1], [0], [0], [1], [0, 0, 1, 1], [], []>} : vector<128x16xf32>, vector<16x32xf32>, vector<128x32xf32> -> vector<128x32xf32>
    %c0_7 = arith.constant 0 : index
    %c0_8 = arith.constant 0 : index
    %6 = vector.load %arg5[%c0_7, %c0_8] : memref<16x32xf32, #tpu.memory_space<vmem>>, vector<16x32xf32>
    %cst_9 = arith.constant dense<0.000000e+00> : vector<128x32xf32>
    %7 = tpu.matmul %1, %6, %cst_9 {dimension_numbers = #tpu.dot_dimension_numbers<[1], [0], [0], [1], [0, 0, 1, 1], [], []>} : vector<128x16xf32>, vector<16x32xf32>, vector<128x32xf32> -> vector<128x32xf32>
    %8 = tpu.concatenate %3, %5, %7 in 0 : vector<128x32xf32>, vector<128x32xf32>, vector<128x32xf32> -> vector<384x32xf32>
    %c0_10 = arith.constant 0 : index
    %c0_11 = arith.constant 0 : index
    %9 = vector.load %arg2[%c0_10, %c0_11] : memref<128x384xf32, #tpu.memory_space<vmem>>, vector<128x384xf32>
    %cst_12 = arith.constant dense<0.000000e+00> : vector<128x32xf32>
    %10 = tpu.matmul %9, %8, %cst_12 {dimension_numbers = #tpu.dot_dimension_numbers<[1], [0], [0], [1], [0, 0, 1, 1], [], []>} : vector<128x384xf32>, vector<384x32xf32>, vector<128x32xf32> -> vector<128x32xf32>
    %c0_13 = arith.constant 0 : index
    %c0_14 = arith.constant 0 : index
    %11 = vector.load %arg6[%c0_13, %c0_14] : memref<128x1xf32, #tpu.memory_space<vmem>>, vector<128x1xf32>
    %12 = vector.broadcast %11 : vector<128x1xf32> to vector<128x32xf32>
    %13 = arith.addf %10, %12 : vector<128x32xf32>
    %cst_15 = arith.constant 0.000000e+00 : f32
    %14 = vector.broadcast %cst_15 : f32 to vector<128x32xf32>
    %15 = arith.maximumf %13, %14 : vector<128x32xf32>
    %c0_16 = arith.constant 0 : index
    %c0_17 = arith.constant 0 : index
    %16 = vector.load %arg8[%c0_16, %c0_17] : memref<32x64xf32, #tpu.memory_space<vmem>>, vector<32x64xf32>
    %cst_18 = arith.constant dense<0.000000e+00> : vector<128x64xf32>
    %17 = tpu.matmul %15, %16, %cst_18 {dimension_numbers = #tpu.dot_dimension_numbers<[1], [0], [0], [1], [0, 0, 1, 1], [], []>} : vector<128x32xf32>, vector<32x64xf32>, vector<128x64xf32> -> vector<128x64xf32>
    %c0_19 = arith.constant 0 : index
    %c0_20 = arith.constant 0 : index
    %18 = vector.load %arg9[%c0_19, %c0_20] : memref<32x64xf32, #tpu.memory_space<vmem>>, vector<32x64xf32>
    %cst_21 = arith.constant dense<0.000000e+00> : vector<128x64xf32>
    %19 = tpu.matmul %15, %18, %cst_21 {dimension_numbers = #tpu.dot_dimension_numbers<[1], [0], [0], [1], [0, 0, 1, 1], [], []>} : vector<128x32xf32>, vector<32x64xf32>, vector<128x64xf32> -> vector<128x64xf32>
    %c0_22 = arith.constant 0 : index
    %c0_23 = arith.constant 0 : index
    %20 = vector.load %arg10[%c0_22, %c0_23] : memref<32x64xf32, #tpu.memory_space<vmem>>, vector<32x64xf32>
    %cst_24 = arith.constant dense<0.000000e+00> : vector<128x64xf32>
    %21 = tpu.matmul %15, %20, %cst_24 {dimension_numbers = #tpu.dot_dimension_numbers<[1], [0], [0], [1], [0, 0, 1, 1], [], []>} : vector<128x32xf32>, vector<32x64xf32>, vector<128x64xf32> -> vector<128x64xf32>
    %22 = tpu.concatenate %17, %19, %21 in 0 : vector<128x64xf32>, vector<128x64xf32>, vector<128x64xf32> -> vector<384x64xf32>
    %c0_25 = arith.constant 0 : index
    %c0_26 = arith.constant 0 : index
    %23 = vector.load %arg7[%c0_25, %c0_26] : memref<128x384xf32, #tpu.memory_space<vmem>>, vector<128x384xf32>
    %cst_27 = arith.constant dense<0.000000e+00> : vector<128x64xf32>
    %24 = tpu.matmul %23, %22, %cst_27 {dimension_numbers = #tpu.dot_dimension_numbers<[1], [0], [0], [1], [0, 0, 1, 1], [], []>} : vector<128x384xf32>, vector<384x64xf32>, vector<128x64xf32> -> vector<128x64xf32>
    %c0_28 = arith.constant 0 : index
    %c0_29 = arith.constant 0 : index
    %25 = vector.load %arg11[%c0_28, %c0_29] : memref<128x1xf32, #tpu.memory_space<vmem>>, vector<128x1xf32>
    %26 = vector.broadcast %25 : vector<128x1xf32> to vector<128x64xf32>
    %27 = arith.addf %24, %26 : vector<128x64xf32>
    %cst_30 = arith.constant 0.000000e+00 : f32
    %28 = vector.broadcast %cst_30 : f32 to vector<128x64xf32>
    %29 = arith.maximumf %27, %28 : vector<128x64xf32>
    %c0_31 = arith.constant 0 : index
    %c0_32 = arith.constant 0 : index
    %30 = vector.load %arg13[%c0_31, %c0_32] : memref<64x128xf32, #tpu.memory_space<vmem>>, vector<64x128xf32>
    %cst_33 = arith.constant dense<0.000000e+00> : vector<128x128xf32>
    %31 = tpu.matmul %29, %30, %cst_33 {dimension_numbers = #tpu.dot_dimension_numbers<[1], [0], [0], [1], [0, 0, 1, 1], [], []>} : vector<128x64xf32>, vector<64x128xf32>, vector<128x128xf32> -> vector<128x128xf32>
    %c0_34 = arith.constant 0 : index
    %c0_35 = arith.constant 0 : index
    %32 = vector.load %arg14[%c0_34, %c0_35] : memref<64x128xf32, #tpu.memory_space<vmem>>, vector<64x128xf32>
    %cst_36 = arith.constant dense<0.000000e+00> : vector<128x128xf32>
    %33 = tpu.matmul %29, %32, %cst_36 {dimension_numbers = #tpu.dot_dimension_numbers<[1], [0], [0], [1], [0, 0, 1, 1], [], []>} : vector<128x64xf32>, vector<64x128xf32>, vector<128x128xf32> -> vector<128x128xf32>
    %c0_37 = arith.constant 0 : index
    %c0_38 = arith.constant 0 : index
    %34 = vector.load %arg15[%c0_37, %c0_38] : memref<64x128xf32, #tpu.memory_space<vmem>>, vector<64x128xf32>
    %cst_39 = arith.constant dense<0.000000e+00> : vector<128x128xf32>
    %35 = tpu.matmul %29, %34, %cst_39 {dimension_numbers = #tpu.dot_dimension_numbers<[1], [0], [0], [1], [0, 0, 1, 1], [], []>} : vector<128x64xf32>, vector<64x128xf32>, vector<128x128xf32> -> vector<128x128xf32>
    %36 = tpu.concatenate %31, %33, %35 in 0 : vector<128x128xf32>, vector<128x128xf32>, vector<128x128xf32> -> vector<384x128xf32>
    %c0_40 = arith.constant 0 : index
    %c0_41 = arith.constant 0 : index
    %37 = vector.load %arg12[%c0_40, %c0_41] : memref<128x384xf32, #tpu.memory_space<vmem>>, vector<128x384xf32>
    %cst_42 = arith.constant dense<0.000000e+00> : vector<128x128xf32>
    %38 = tpu.matmul %37, %36, %cst_42 {dimension_numbers = #tpu.dot_dimension_numbers<[1], [0], [0], [1], [0, 0, 1, 1], [], []>} : vector<128x384xf32>, vector<384x128xf32>, vector<128x128xf32> -> vector<128x128xf32>
    %c0_43 = arith.constant 0 : index
    %c0_44 = arith.constant 0 : index
    %39 = vector.load %arg16[%c0_43, %c0_44] : memref<128x1xf32, #tpu.memory_space<vmem>>, vector<128x1xf32>
    %40 = vector.broadcast %39 : vector<128x1xf32> to vector<128x128xf32>
    %41 = arith.addf %38, %40 : vector<128x128xf32>
    %cst_45 = arith.constant 0.000000e+00 : f32
    %42 = vector.broadcast %cst_45 : f32 to vector<128x128xf32>
    %43 = arith.maximumf %41, %42 : vector<128x128xf32>
    %c0_46 = arith.constant 0 : index
    %c0_47 = arith.constant 0 : index
    %44 = vector.load %arg18[%c0_46, %c0_47] : memref<128x256xf32, #tpu.memory_space<vmem>>, vector<128x256xf32>
    %cst_48 = arith.constant dense<0.000000e+00> : vector<128x256xf32>
    %45 = tpu.matmul %43, %44, %cst_48 {dimension_numbers = #tpu.dot_dimension_numbers<[1], [0], [0], [1], [0, 0, 1, 1], [], []>} : vector<128x128xf32>, vector<128x256xf32>, vector<128x256xf32> -> vector<128x256xf32>
    %c0_49 = arith.constant 0 : index
    %c0_50 = arith.constant 0 : index
    %46 = vector.load %arg19[%c0_49, %c0_50] : memref<128x256xf32, #tpu.memory_space<vmem>>, vector<128x256xf32>
    %cst_51 = arith.constant dense<0.000000e+00> : vector<128x256xf32>
    %47 = tpu.matmul %43, %46, %cst_51 {dimension_numbers = #tpu.dot_dimension_numbers<[1], [0], [0], [1], [0, 0, 1, 1], [], []>} : vector<128x128xf32>, vector<128x256xf32>, vector<128x256xf32> -> vector<128x256xf32>
    %c0_52 = arith.constant 0 : index
    %c0_53 = arith.constant 0 : index
    %48 = vector.load %arg20[%c0_52, %c0_53] : memref<128x256xf32, #tpu.memory_space<vmem>>, vector<128x256xf32>
    %cst_54 = arith.constant dense<0.000000e+00> : vector<128x256xf32>
    %49 = tpu.matmul %43, %48, %cst_54 {dimension_numbers = #tpu.dot_dimension_numbers<[1], [0], [0], [1], [0, 0, 1, 1], [], []>} : vector<128x128xf32>, vector<128x256xf32>, vector<128x256xf32> -> vector<128x256xf32>
    %50 = tpu.concatenate %45, %47, %49 in 0 : vector<128x256xf32>, vector<128x256xf32>, vector<128x256xf32> -> vector<384x256xf32>
    %c0_55 = arith.constant 0 : index
    %c0_56 = arith.constant 0 : index
    %51 = vector.load %arg17[%c0_55, %c0_56] : memref<128x384xf32, #tpu.memory_space<vmem>>, vector<128x384xf32>
    %cst_57 = arith.constant dense<0.000000e+00> : vector<128x256xf32>
    %52 = tpu.matmul %51, %50, %cst_57 {dimension_numbers = #tpu.dot_dimension_numbers<[1], [0], [0], [1], [0, 0, 1, 1], [], []>} : vector<128x384xf32>, vector<384x256xf32>, vector<128x256xf32> -> vector<128x256xf32>
    %c0_58 = arith.constant 0 : index
    %c0_59 = arith.constant 0 : index
    %53 = vector.load %arg21[%c0_58, %c0_59] : memref<128x1xf32, #tpu.memory_space<vmem>>, vector<128x1xf32>
    %54 = vector.broadcast %53 : vector<128x1xf32> to vector<128x256xf32>
    %55 = arith.addf %52, %54 : vector<128x256xf32>
    %cst_60 = arith.constant 0.000000e+00 : f32
    %56 = vector.broadcast %cst_60 : f32 to vector<128x256xf32>
    %57 = arith.maximumf %55, %56 : vector<128x256xf32>
    %c0_61 = arith.constant 0 : index
    %c0_62 = arith.constant 0 : index
    %58 = vector.load %arg22[%c0_61, %c0_62] : memref<64x128xf32, #tpu.memory_space<vmem>>, vector<64x128xf32>
    %cst_63 = arith.constant dense<0.000000e+00> : vector<64x256xf32>
    %59 = tpu.matmul %58, %57, %cst_63 {dimension_numbers = #tpu.dot_dimension_numbers<[1], [0], [0], [1], [0, 0, 1, 1], [], []>} : vector<64x128xf32>, vector<128x256xf32>, vector<64x256xf32> -> vector<64x256xf32>
    %c0_64 = arith.constant 0 : index
    %c0_65 = arith.constant 0 : index
    %60 = vector.load %arg23[%c0_64, %c0_65] : memref<64x1xf32, #tpu.memory_space<vmem>>, vector<64x1xf32>
    %61 = vector.broadcast %60 : vector<64x1xf32> to vector<64x256xf32>
    %62 = arith.addf %59, %61 : vector<64x256xf32>
    %63 = vector.shape_cast %62 : vector<64x256xf32> to vector<1x64x256xf32>
    %c0_66 = arith.constant 0 : index
    %c0_67 = arith.constant 0 : index
    %c0_68 = arith.constant 0 : index
    %64 = vector.load %arg24[%c0_66, %c0_67, %c0_68] : memref<1x64x256xf32, #tpu.memory_space<vmem>>, vector<1x64x256xf32>
    tpu.vector_store %arg24[%c0_66, %c0_67, %c0_68], %63 {strides = array<i32>} : memref<1x64x256xf32, #tpu.memory_space<vmem>>, vector<1x64x256xf32>,
    return
  }
  func.func @transform_0(%arg0: i32) -> (i32, i32, i32) {
    %c0_i32 = arith.constant 0 : i32
    %c0_i32_0 = arith.constant 0 : i32
    %c0_i32_1 = arith.constant 0 : i32
    return %arg0, %c0_i32, %c0_i32_0 : i32, i32, i32
  }
  func.func @transform_1(%arg0: i32) -> (i32, i32) {
    %c0_i32 = arith.constant 0 : i32
    %c0_i32_0 = arith.constant 0 : i32
    %c0_i32_1 = arith.constant 0 : i32
    return %c0_i32, %c0_i32_0 : i32, i32
  }
  func.func @transform_2(%arg0: i32) -> (i32, i32) {
    %c0_i32 = arith.constant 0 : i32
    %c0_i32_0 = arith.constant 0 : i32
    %c0_i32_1 = arith.constant 0 : i32
    return %c0_i32, %c0_i32_0 : i32, i32
  }
  func.func @transform_3(%arg0: i32) -> (i32, i32) {
    %c0_i32 = arith.constant 0 : i32
    %c0_i32_0 = arith.constant 0 : i32
    %c0_i32_1 = arith.constant 0 : i32
    return %c0_i32, %c0_i32_0 : i32, i32
  }
  func.func @transform_4(%arg0: i32) -> (i32, i32) {
    %c0_i32 = arith.constant 0 : i32
    %c0_i32_0 = arith.constant 0 : i32
    %c0_i32_1 = arith.constant 0 : i32
    return %c0_i32, %c0_i32_0 : i32, i32
  }
  func.func @transform_5(%arg0: i32) -> (i32, i32) {
    %c0_i32 = arith.constant 0 : i32
    %c0_i32_0 = arith.constant 0 : i32
    %c0_i32_1 = arith.constant 0 : i32
    return %c0_i32, %c0_i32_0 : i32, i32
  }
  func.func @transform_6(%arg0: i32) -> (i32, i32) {
    %c0_i32 = arith.constant 0 : i32
    %c0_i32_0 = arith.constant 0 : i32
    %c0_i32_1 = arith.constant 0 : i32
    return %c0_i32, %c0_i32_0 : i32, i32
  }
  func.func @transform_7(%arg0: i32) -> (i32, i32) {
    %c0_i32 = arith.constant 0 : i32
    %c0_i32_0 = arith.constant 0 : i32
    %c0_i32_1 = arith.constant 0 : i32
    return %c0_i32, %c0_i32_0 : i32, i32
  }
  func.func @transform_8(%arg0: i32) -> (i32, i32) {
    %c0_i32 = arith.constant 0 : i32
    %c0_i32_0 = arith.constant 0 : i32
    %c0_i32_1 = arith.constant 0 : i32
    return %c0_i32, %c0_i32_0 : i32, i32
  }
  func.func @transform_9(%arg0: i32) -> (i32, i32) {
    %c0_i32 = arith.constant 0 : i32
    %c0_i32_0 = arith.constant 0 : i32
    %c0_i32_1 = arith.constant 0 : i32
    return %c0_i32, %c0_i32_0 : i32, i32
  }
  func.func @transform_10(%arg0: i32) -> (i32, i32) {
    %c0_i32 = arith.constant 0 : i32
    %c0_i32_0 = arith.constant 0 : i32
    %c0_i32_1 = arith.constant 0 : i32
    return %c0_i32, %c0_i32_0 : i32, i32
  }
  func.func @transform_11(%arg0: i32) -> (i32, i32) {
    %c0_i32 = arith.constant 0 : i32
    %c0_i32_0 = arith.constant 0 : i32
    %c0_i32_1 = arith.constant 0 : i32
    return %c0_i32, %c0_i32_0 : i32, i32
  }
  func.func @transform_12(%arg0: i32) -> (i32, i32) {
    %c0_i32 = arith.constant 0 : i32
    %c0_i32_0 = arith.constant 0 : i32
    %c0_i32_1 = arith.constant 0 : i32
    return %c0_i32, %c0_i32_0 : i32, i32
  }
  func.func @transform_13(%arg0: i32) -> (i32, i32) {
    %c0_i32 = arith.constant 0 : i32
    %c0_i32_0 = arith.constant 0 : i32
    %c0_i32_1 = arith.constant 0 : i32
    return %c0_i32, %c0_i32_0 : i32, i32
  }
  func.func @transform_14(%arg0: i32) -> (i32, i32) {
    %c0_i32 = arith.constant 0 : i32
    %c0_i32_0 = arith.constant 0 : i32
    %c0_i32_1 = arith.constant 0 : i32
    return %c0_i32, %c0_i32_0 : i32, i32
  }
  func.func @transform_15(%arg0: i32) -> (i32, i32) {
    %c0_i32 = arith.constant 0 : i32
    %c0_i32_0 = arith.constant 0 : i32
    %c0_i32_1 = arith.constant 0 : i32
    return %c0_i32, %c0_i32_0 : i32, i32
  }
  func.func @transform_16(%arg0: i32) -> (i32, i32) {
    %c0_i32 = arith.constant 0 : i32
    %c0_i32_0 = arith.constant 0 : i32
    %c0_i32_1 = arith.constant 0 : i32
    return %c0_i32, %c0_i32_0 : i32, i32
  }
  func.func @transform_17(%arg0: i32) -> (i32, i32) {
    %c0_i32 = arith.constant 0 : i32
    %c0_i32_0 = arith.constant 0 : i32
    %c0_i32_1 = arith.constant 0 : i32
    return %c0_i32, %c0_i32_0 : i32, i32
  }
  func.func @transform_18(%arg0: i32) -> (i32, i32) {
    %c0_i32 = arith.constant 0 : i32
    %c0_i32_0 = arith.constant 0 : i32
    %c0_i32_1 = arith.constant 0 : i32
    return %c0_i32, %c0_i32_0 : i32, i32
  }
  func.func @transform_19(%arg0: i32) -> (i32, i32) {
    %c0_i32 = arith.constant 0 : i32
    %c0_i32_0 = arith.constant 0 : i32
    %c0_i32_1 = arith.constant 0 : i32
    return %c0_i32, %c0_i32_0 : i32, i32
  }
  func.func @transform_20(%arg0: i32) -> (i32, i32) {
    %c0_i32 = arith.constant 0 : i32
    %c0_i32_0 = arith.constant 0 : i32
    %c0_i32_1 = arith.constant 0 : i32
    return %c0_i32, %c0_i32_0 : i32, i32
  }
  func.func @transform_21(%arg0: i32) -> (i32, i32) {
    %c0_i32 = arith.constant 0 : i32
    %c0_i32_0 = arith.constant 0 : i32
    %c0_i32_1 = arith.constant 0 : i32
    return %c0_i32, %c0_i32_0 : i32, i32
  }
  func.func @transform_22(%arg0: i32) -> (i32, i32) {
    %c0_i32 = arith.constant 0 : i32
    %c0_i32_0 = arith.constant 0 : i32
    %c0_i32_1 = arith.constant 0 : i32
    return %c0_i32, %c0_i32_0 : i32, i32
  }
  func.func @transform_23(%arg0: i32) -> (i32, i32, i32) {
    %c0_i32 = arith.constant 0 : i32
    %c0_i32_0 = arith.constant 0 : i32
    %c0_i32_1 = arith.constant 0 : i32
    return %arg0, %c0_i32, %c0_i32_0 : i32, i32, i32
  }
}

</mosaic_0001>

<bundles_post_ra>
// kernel: decoder_l4_pallas.1
= control target key start
LH: loop header
LB: loop body
LE: loop exit
PB: predicated region body
PF: predicated region fallthrough
CT: control target
= control target key end

     0   :  { %s8525_s0 = inlined_call_operand.vmem [shape: f32[2,128,16], index: 0, kind: input, shape index: {}]   ;;  %s8526_s1 = inlined_call_operand.vmem [shape: f32[128,384], index: 1, kind: input, shape index: {}]   ;;  %s8527_s2 = inlined_call_operand.vmem [shape: f32[16,32], index: 2, kind: input, shape index: {}]   ;;  %s8528_s3 = inlined_call_operand.vmem [shape: f32[16,32], index: 3, kind: input, shape index: {}]   ;;  %s8529_s4 = inlined_call_operand.vmem [shape: f32[16,32], index: 4, kind: input, shape index: {}]   ;;  %s8530_s5 = inlined_call_operand.vmem [shape: f32[128,1], index: 5, kind: input, shape index: {}]   ;;  %s8531_s6 = inlined_call_operand.vmem [shape: f32[128,384], index: 6, kind: input, shape index: {}]   ;;  %s8532_s7 = inlined_call_operand.vmem [shape: f32[32,64], index: 7, kind: input, shape index: {}]   ;;  %s8533_s8 = inlined_call_operand.vmem [shape: f32[32,64], index: 8, kind: input, shape index: {}]   ;;  %s8534_s9 = inlined_call_operand.vmem [shape: f32[32,64], index: 9, kind: input, shape index: {}]   ;;  %s8535_s10 = inlined_call_operand.vmem [shape: f32[128,1], index: 10, kind: input, shape index: {}]   ;;  %s8536_s11 = inlined_call_operand.vmem [shape: f32[128,384], index: 11, kind: input, shape index: {}]   ;;  %s8537_s12 = inlined_call_operand.vmem [shape: f32[64,128], index: 12, kind: input, shape index: {}]   ;;  %s8538_s13 = inlined_call_operand.vmem [shape: f32[64,128], index: 13, kind: input, shape index: {}]   ;;  %s8539_s14 = inlined_call_operand.vmem [shape: f32[64,128], index: 14, kind: input, shape index: {}]   ;;  %s8540_s15 = inlined_call_operand.vmem [shape: f32[128,1], index: 15, kind: input, shape index: {}]   ;;  %s8541_s16 = inlined_call_operand.vmem [shape: f32[128,384], index: 16, kind: input, shape index: {}]   ;;  %s8542_s17 = inlined_call_operand.vmem [shape: f32[128,256], index: 17, kind: input, shape index: {}]   ;;  %s8543_s18 = inlined_call_operand.vmem [shape: f32[128,256], index: 18, kind: input, shape index: {}]   ;;  %s8544_s19 = inlined_call_operand.vmem [shape: f32[128,256], index: 19, kind: input, shape index: {}]   ;;  %s8545_s20 = inlined_call_operand.vmem [shape: f32[128,1], index: 20, kind: input, shape index: {}]   ;;  %s8546_s21 = inlined_call_operand.vmem [shape: f32[64,128], index: 21, kind: input, shape index: {}]   ;;  %s8547_s22 = inlined_call_operand.vmem [shape: f32[64,1], index: 22, kind: input, shape index: {}]   ;;  %s8548_s23 = inlined_call_operand.vmem [shape: f32[2,64,256], index: 23, kind: output, shape index: {}]  }
   0x1   :  { %8562 = sst [smem:[#allocation2_spill]] %s8525_s0 }
   0x2   :  { %8563 = sst [smem:[#allocation3_spill]] %s8526_s1 }
   0x3   :  { %8564 = sst [smem:[#allocation4_spill]] %s8527_s2 }
   0x4   :  { %8565 = sst [smem:[#allocation5_spill]] %s8528_s3 }
   0x5   :  { %8566 = sst [smem:[#allocation6_spill]] %s8529_s4  ;;  %s6741_s4 = smov 0  }
   0x6   :  { %8567 = sst [smem:[#allocation7_spill]] %s8530_s5 }
   0x7   :  { %8568 = sst [smem:[#allocation8_spill]] %s8531_s6 }
   0x8   :  { %8569 = sst [smem:[#allocation9_spill]] %s8532_s7 }
   0x9 LB: > { %s4888_s30 = sadd.s32 4294967295, %s6617_s4   ;;  %p4892_p0 = scmp.ge.s32.totalorder %s6617_s4, 1  ;;  %s6617_s4 = sphi %s6741_s4, %s33_s4  }
   0xa   : > { %p637_p1 = scmp.lt.s32.totalorder %s6617_s4, 3 }
   0xc   : > { %p638_p2 = pnand %p4892_p0, %p637_p1 }
   0xd   : > { %s8570_s5 = sld [smem:[#allocation4_spill]] (!%p638_p2)  ;;  %s8571_s27 = sld [smem:[#allocation5_spill]] (!%p638_p2)  ;;  %vm729_vm0 = vcmask (!%p638_p2), 130048   ;;  %v6619_v25 = vmov (!%p638_p2), 0   ;;  %v2211_v43 = vld [vmem:[%s8535_s10] sm:$0xff] (!%p638_p2)  ;;  %v2212_v44 = vld [vmem:[%s8535_s10 + $0x8] sm:$0xff] (!%p638_p2) }
   0xe   : > { %641 = sbr.rel (%p638_p2) target bundleno = 2425 (0x979), region = 112  ;;  %p701_p3 = scmp.lt.s32.totalorder (!%p638_p2), %s4888_s30, 1  ;;  %6609 = vset.pattern.permute.xlu0 (!%p638_p2), %v6619_v25  ;;  %6610 = vset.pattern.permute.xlu1 (!%p638_p2), %v6619_v25  ;;  %v2213_v45 = vld [vmem:[%s8535_s10 + $0x10] sm:$0xff] (!%p638_p2)  ;;  %v2214_v46 = vld [vmem:[%s8535_s10 + $0x18] sm:$0xff] (!%p638_p2)  ;;  %v2215_v47 = vld [vmem:[%s8535_s10 + $0x20] sm:$0xff] (!%p638_p2)  ;;  %vm1671_vm1 = vcmask (!%p638_p2), 261120  }
   0xf   : > { %s8572_s0 = sld [smem:[#allocation6_spill]] (!%p638_p2)  ;;  %s8573_s6 = sld [smem:[#allocation2_spill]] (!%p638_p2)  ;;  %v2216_v48 = vld [vmem:[%s8535_s10 + $0x28] sm:$0xff] (!%p638_p2)  ;;  %v2217_v49 = vld [vmem:[%s8535_s10 + $0x30] sm:$0xff] (!%p638_p2)  ;;  %v2218_v50 = vld [vmem:[%s8535_s10 + $0x38] sm:$0xff] (!%p638_p2)  ;;  %vm2621_vm2 = vcmask (!%p638_p2), 523264  }
  0x10   : > { %s8574_s3 = sld [smem:[#allocation7_spill]] (!%p638_p2)  ;;  %v2219_v51 = vld [vmem:[%s8535_s10 + $0x40] sm:$0xff] (!%p638_p2)  ;;  %v2220_v52 = vld [vmem:[%s8535_s10 + $0x48] sm:$0xff] (!%p638_p2)  ;;  %v2221_v53 = vld [vmem:[%s8535_s10 + $0x50] sm:$0xff] (!%p638_p2) }
  0x11   : > { %v2222_v54 = vld [vmem:[%s8535_s10 + $0x58] sm:$0xff] (!%p638_p2)  ;;  %v2223_v55 = vld [vmem:[%s8535_s10 + $0x60] sm:$0xff] (!%p638_p2)  ;;  %v2224_v57 = vld [vmem:[%s8535_s10 + $0x68] sm:$0xff] (!%p638_p2) }
  0x12   : > { %v2225_v58 = vld [vmem:[%s8535_s10 + $0x70] sm:$0xff] (!%p638_p2)  ;;  %v2226_v59 = vld [vmem:[%s8535_s10 + $0x78] sm:$0xff] (!%p638_p2)  ;;  %v3169_v60 = vld [vmem:[%s8540_s15] sm:$0xff] (!%p638_p2) }
  0x13   : > { %v727_v0 = vld [vmem:[%s8570_s5] sm:$0xff] (!%p638_p2)  ;;  %v728_v1 = vld [vmem:[%s8570_s5 + $0x8] sm:$0xff] (!%p638_p2)  ;;  %s8575_s5 = sld [smem:[#allocation3_spill]] (!%p638_p2)  ;;  %v3171_v62 = vld [vmem:[%s8540_s15 + $0x10] sm:$0xff] (!%p638_p2) }
  0x14   : > { %v923_v2 = vld [vmem:[%s8571_s27] sm:$0xff] (!%p638_p2)  ;;  %v6035_v3 = vpack.c.bf16 (!%p638_p2), %v728_v1, %v727_v0  ;;  %v924_v4 = vld [vmem:[%s8571_s27 + $0x8] sm:$0xff] (!%p638_p2)  ;;  %v3172_v63 = vld [vmem:[%s8540_s15 + $0x18] sm:$0xff] (!%p638_p2) }
  0x15   : > { %v1070_v5 = vld [vmem:[%s8572_s0] sm:$0xff]  ;;  %v1071_v6 = vld [vmem:[%s8572_s0 + $0x8] sm:$0xff]  ;;  %v6039_v7 = vpack.c.bf16 %v924_v4, %v923_v2  ;;  %s8580_s30 = smov (!%p701_p3, %s4888_s30), 1  ;;  %v3175_v2 = vld [vmem:[%s8540_s15 + $0x30] sm:$0xff] }
  0x16   : > { %v6043_v8 = vpack.c.bf16 %v1071_v6, %v1070_v5  ;;  %6036 = vmatprep.subr.bf16.mxu0 %v6035_v3  ;;  %s8556_s1 = sshll.u32 %s8580_s30, 7  ;;  %v1265_v26 = vld [vmem:[%s8574_s3] sm:$0xff]  ;;  %v1267_v27 = vld [vmem:[%s8574_s3 + $0x10] sm:$0xff]  ;;  %v1266_v28 = vld [vmem:[%s8574_s3 + $0x8] sm:$0xff] }
  0x17   : > { %6040 = vmatprep.subr.bf16.mxu1 %v6039_v7  ;;  %6038 = vmatpush3.bf16.msra.mxu0 %v6035_v3  ;;  %s6775_s7 = scalar_lea.vmem %s8573_s6, %s8556_s1  ;;  %v1268_v29 = vld [vmem:[%s8574_s3 + $0x18] sm:$0xff]  ;;  %v1269_v30 = vld [vmem:[%s8574_s3 + $0x20] sm:$0xff]  ;;  %v1270_v31 = vld [vmem:[%s8574_s3 + $0x28] sm:$0xff]  ;;  %s8577_s6 = sld [smem:[#allocation8_spill]] }
  0x18   : > { %6042 = vmatpush3.bf16.msra.mxu1 %v6039_v7  ;;  %6044 = vmatprep.subr.bf16.mxu0 %v6043_v8  ;;  %v711_v9 = vld [vmem:[%s6775_s7] sm:$0xff]  ;;  %v712_v10 = vld [vmem:[%s6775_s7 + $0x8] sm:$0xff]  ;;  %v713_v11 = vld [vmem:[%s6775_s7 + $0x10] sm:$0xff] }
  0x19   : > { %5571 = vmatprep.mubr.msk.f32.mxu0 %vm729_vm0, %v711_v9  ;;  %5599 = vmatprep.mubr.msk.f32.mxu1 %vm729_vm0, %v711_v9  ;;  %v714_v12 = vld [vmem:[%s6775_s7 + $0x18] sm:$0xff]  ;;  %v715_v13 = vld [vmem:[%s6775_s7 + $0x20] sm:$0xff]  ;;  %v716_v14 = vld [vmem:[%s6775_s7 + $0x28] sm:$0xff] }
  0x1a   : > { %5572 = vmatmul.mubr.msk.f32.vlgmr.msra.gmra.mrb[0].mxu0 %vm729_vm0, %v712_v10  ;;  %v717_v15 = vld [vmem:[%s6775_s7 + $0x30] sm:$0xff]  ;;  %v718_v16 = vld [vmem:[%s6775_s7 + $0x38] sm:$0xff]  ;;  %v719_v17 = vld [vmem:[%s6775_s7 + $0x40] sm:$0xff]  ;;  %1283 = vperm.xlu0 %6609, %v1265_v26  }
  0x1b   : > { %5600 = vmatmul.mubr.msk.f32.vlgmr.msra.gmra.mrb[0].mxu1 %vm729_vm0, %v712_v10  ;;  %5574 = vmatprep.mubr.msk.f32.mxu0 %vm729_vm0, %v713_v11  ;;  %v720_v18 = vld [vmem:[%s6775_s7 + $0x48] sm:$0xff]  ;;  %v721_v19 = vld [vmem:[%s6775_s7 + $0x50] sm:$0xff]  ;;  %v722_v20 = vld [vmem:[%s6775_s7 + $0x58] sm:$0xff] }
  0x1c   : > { %5602 = vmatprep.mubr.msk.f32.mxu1 %vm729_vm0, %v713_v11  ;;  %6046 = vmatpush3.bf16.msra.mxu0 %v6043_v8  ;;  %v723_v21 = vld [vmem:[%s6775_s7 + $0x60] sm:$0xff]  ;;  %v724_v22 = vld [vmem:[%s6775_s7 + $0x68] sm:$0xff]  ;;  %v725_v23 = vld [vmem:[%s6775_s7 + $0x70] sm:$0xff] }
  0x1d   : > { %v726_v24 = vld [vmem:[%s6775_s7 + $0x78] sm:$0xff]  ;;  %1293 = vperm.xlu1 %6610, %v1267_v27   ;;  %v1271_v32 = vld [vmem:[%s8574_s3 + $0x30] sm:$0xff]  ;;  %v1273_v34 = vld [vmem:[%s8574_s3 + $0x40] sm:$0xff] }
  0x1e   : > { %5575 = vmatmul.mubr.msk.f32.gmra.mrb[2].mxu0 %vm729_vm0, %v714_v12  ;;  %1288 = vperm.xlu0 %6609, %v1266_v28   ;;  %v1272_v33 = vld [vmem:[%s8574_s3 + $0x38] sm:$0xff]  ;;  %v1274_v35 = vld [vmem:[%s8574_s3 + $0x48] sm:$0xff]  ;;  %v1275_v36 = vld [vmem:[%s8574_s3 + $0x50] sm:$0xff] }
  0x1f   : > { %5603 = vmatmul.mubr.msk.f32.gmra.mrb[2].mxu1 %vm729_vm0, %v714_v12  ;;  %5577 = vmatprep.mubr.msk.f32.mxu0 %vm729_vm0, %v715_v13  ;;  %v1276_v37 = vld [vmem:[%s8574_s3 + $0x58] sm:$0xff]  ;;  %v1277_v38 = vld [vmem:[%s8574_s3 + $0x60] sm:$0xff]  ;;  %v1218_v39 = vld [vmem:[%s8575_s5 + $0x8] sm:$0xff] }
  0x20   : > { %5605 = vmatprep.mubr.msk.f32.mxu1 %vm729_vm0, %v715_v13  ;;  %v1278_v40 = vld [vmem:[%s8574_s3 + $0x68] sm:$0xff]  ;;  %v1279_v41 = vld [vmem:[%s8574_s3 + $0x70] sm:$0xff]  ;;  %v1280_v42 = vld [vmem:[%s8574_s3 + $0x78] sm:$0xff]  ;;  %s8576_s3 = sld [smem:[#allocation9_spill]] }
  0x21   : > { %1298 = vperm.xlu1 %6610, %v1268_v29   ;;  %v1219_v56 = vld [vmem:[%s8575_s5 + $0x10] sm:$0xff]  ;;  %v3170_v61 = vld [vmem:[%s8540_s15 + $0x8] sm:$0xff]  ;;  %v3173_v0 = vld [vmem:[%s8540_s15 + $0x20] sm:$0xff] }
  0x22   : > { %5578 = vmatmul.mubr.msk.f32.gmra.mrb[4].mxu0 %vm729_vm0, %v716_v14  ;;  %1303 = vperm.xlu0 %6609, %v1269_v30   ;;  %v3174_v1 = vld [vmem:[%s8540_s15 + $0x28] sm:$0xff]  ;;  %v3176_v3 = vld [vmem:[%s8540_s15 + $0x38] sm:$0xff]  ;;  %v3177_v4 = vld [vmem:[%s8540_s15 + $0x40] sm:$0xff] }
  0x23   : > { %5606 = vmatmul.mubr.msk.f32.gmra.mrb[4].mxu1 %vm729_vm0, %v716_v14  ;;  %5580 = vmatprep.mubr.msk.f32.mxu0 %vm729_vm0, %v717_v15  ;;  %v3178_v5 = vld [vmem:[%s8540_s15 + $0x48] sm:$0xff]  ;;  %v3179_v6 = vld [vmem:[%s8540_s15 + $0x50] sm:$0xff]  ;;  %v3180_v7 = vld [vmem:[%s8540_s15 + $0x58] sm:$0xff] }
  0x24   : > { %5608 = vmatprep.mubr.msk.f32.mxu1 %vm729_vm0, %v717_v15  ;;  %v3181_v8 = vld [vmem:[%s8540_s15 + $0x60] sm:$0xff]  ;;  %v4209_v25 = vld [vmem:[%s8545_s20 + $0x58] sm:$0xff] }
  0x25   : > { %1308 = vperm.xlu1 %6610, %v1270_v31   ;;  %v4210_v26 = vld [vmem:[%s8545_s20 + $0x60] sm:$0xff] }
  0x26   : > { %5581 = vmatmul.mubr.msk.f32.gmra.mrb[6].mxu0 %vm729_vm0, %v718_v16  ;;  %1313 = vperm.xlu0 %6609, %v1271_v32  }
  0x27   : > { %5609 = vmatmul.mubr.msk.f32.gmra.mrb[6].mxu1 %vm729_vm0, %v718_v16  ;;  %5583 = vmatprep.mubr.msk.f32.mxu0 %vm729_vm0, %v719_v17 }
  0x28   : > { %5611 = vmatprep.mubr.msk.f32.mxu1 %vm729_vm0, %v719_v17 }
  0x29   : > { %1318 = vperm.xlu1 %6610, %v1272_v33   ;;  %v4211_v33 = vld [vmem:[%s8545_s20 + $0x68] sm:$0xff] }
  0x2a   : > { %5584 = vmatmul.mubr.msk.f32.gmra.mrb[8].mxu0 %vm729_vm0, %v720_v18  ;;  %1323 = vperm.xlu0 %6609, %v1273_v34   ;;  %v4212_v34 = vld [vmem:[%s8545_s20 + $0x70] sm:$0xff] }
  0x2b   : > { %5612 = vmatmul.mubr.msk.f32.gmra.mrb[8].mxu1 %vm729_vm0, %v720_v18  ;;  %5586 = vmatprep.mubr.msk.f32.mxu0 %vm729_vm0, %v721_v19 }
  0x2c   : > { %5614 = vmatprep.mubr.msk.f32.mxu1 %vm729_vm0, %v721_v19 }
  0x2d   : > { %1328 = vperm.xlu1 %6610, %v1274_v35  }
  0x2e   : > { %5587 = vmatmul.mubr.msk.f32.gmra.mrb[10].mxu0 %vm729_vm0, %v722_v20  ;;  %1333 = vperm.xlu0 %6609, %v1275_v36  }
  0x2f   : > { %5615 = vmatmul.mubr.msk.f32.gmra.mrb[10].mxu1 %vm729_vm0, %v722_v20  ;;  %5589 = vmatprep.mubr.msk.f32.mxu0 %vm729_vm0, %v723_v21 }
  0x30   : > { %5617 = vmatprep.mubr.msk.f32.mxu1 %vm729_vm0, %v723_v21 }
  0x31   : > { %1338 = vperm.xlu1 %6610, %v1276_v37  }
  0x32   : > { %5590 = vmatmul.mubr.msk.f32.gmra.mrb[12].mxu0 %vm729_vm0, %v724_v22  ;;  %1343 = vperm.xlu0 %6609, %v1277_v38  }
  0x33   : > { %5618 = vmatmul.mubr.msk.f32.gmra.mrb[12].mxu1 %vm729_vm0, %v724_v22  ;;  %5592 = vmatprep.mubr.msk.f32.mxu0 %vm729_vm0, %v725_v23 }
  0x34   : > { %5620 = vmatprep.mubr.msk.f32.mxu1 %vm729_vm0, %v725_v23 }
  0x35   : > { %1348 = vperm.xlu1 %6610, %v1278_v40  }
  0x36   : > { %5593 = vmatmul.mubr.msk.f32.gmra.mrb[14].mxu0 %vm729_vm0, %v726_v24  ;;  %1353 = vperm.xlu0 %6609, %v1279_v41   ;;  %v4213_v41 = vld [vmem:[%s8545_s20 + $0x78] sm:$0xff] }
  0x37   : > { %5621 = vmatmul.mubr.msk.f32.gmra.mrb[14].mxu1 %vm729_vm0, %v726_v24  ;;  %5627 = vmatprep.mubr.msk.f32.mxu0 %vm729_vm0, %v711_v9  ;;  %v3182_v9 = vld [vmem:[%s8540_s15 + $0x68] sm:$0xff] }
  0x38   : > { %1425 = vmatprep.mubr.f32.mxu1 %v1218_v39 }
  0x39   : > { %1358 = vperm.xlu1 %6610, %v1280_v42   ;;  %v4656_v42 = vld [vmem:[%s8547_s22] sm:$0xff] }
  0x3a   : > { %5628 = vmatmul.mubr.msk.f32.vlgmr.msra.gmra.mrb[16].mxu0 %vm729_vm0, %v712_v10  ;;  %2229 = vperm.xlu0 %6609, %v2211_v43   ;;  %v3183_v10 = vld [vmem:[%s8540_s15 + $0x70] sm:$0xff] }
  0x3b   : > { %5630 = vmatprep.mubr.msk.f32.mxu0 %vm729_vm0, %v713_v11  ;;  %v3184_v11 = vld [vmem:[%s8540_s15 + $0x78] sm:$0xff] }
  0x3d   : > { %2234 = vperm.xlu1 %6610, %v2212_v44  }
  0x3e   : > { %5631 = vmatmul.mubr.msk.f32.gmra.mrb[18].mxu0 %vm729_vm0, %v714_v12  ;;  %2239 = vperm.xlu0 %6609, %v2213_v45   ;;  %v4198_v12 = vld [vmem:[%s8545_s20] sm:$0xff] }
  0x3f   : > { %5633 = vmatprep.mubr.msk.f32.mxu0 %vm729_vm0, %v715_v13  ;;  %v4199_v13 = vld [vmem:[%s8545_s20 + $0x8] sm:$0xff] }
  0x41   : > { %2244 = vperm.xlu1 %6610, %v2214_v46  }
  0x42   : > { %5634 = vmatmul.mubr.msk.f32.gmra.mrb[20].mxu0 %vm729_vm0, %v716_v14  ;;  %2249 = vperm.xlu0 %6609, %v2215_v47   ;;  %v4200_v14 = vld [vmem:[%s8545_s20 + $0x10] sm:$0xff] }
  0x43   : > { %5636 = vmatprep.mubr.msk.f32.mxu0 %vm729_vm0, %v717_v15  ;;  %v4201_v15 = vld [vmem:[%s8545_s20 + $0x18] sm:$0xff] }
  0x45   : > { %2254 = vperm.xlu1 %6610, %v2216_v48  }
  0x46   : > { %5637 = vmatmul.mubr.msk.f32.gmra.mrb[22].mxu0 %vm729_vm0, %v718_v16  ;;  %2259 = vperm.xlu0 %6609, %v2217_v49   ;;  %v4202_v16 = vld [vmem:[%s8545_s20 + $0x20] sm:$0xff]  ;;  %v4657_v49 = vld [vmem:[%s8547_s22 + $0x8] sm:$0xff] }
  0x47   : > { %5639 = vmatprep.mubr.msk.f32.mxu0 %vm729_vm0, %v719_v17  ;;  %v4203_v17 = vld [vmem:[%s8545_s20 + $0x28] sm:$0xff] }
  0x49   : > { %2264 = vperm.xlu1 %6610, %v2218_v50   ;;  %v4658_v50 = vld [vmem:[%s8547_s22 + $0x10] sm:$0xff] }
  0x4a   : > { %5640 = vmatmul.mubr.msk.f32.gmra.mrb[24].mxu0 %vm729_vm0, %v720_v18  ;;  %2269 = vperm.xlu0 %6609, %v2219_v51   ;;  %v4204_v18 = vld [vmem:[%s8545_s20 + $0x30] sm:$0xff] }
  0x4b   : > { %5642 = vmatprep.mubr.msk.f32.mxu0 %vm729_vm0, %v721_v19  ;;  %v4205_v19 = vld [vmem:[%s8545_s20 + $0x38] sm:$0xff] }
  0x4d   : > { %2274 = vperm.xlu1 %6610, %v2220_v52  }
  0x4e   : > { %5643 = vmatmul.mubr.msk.f32.gmra.mrb[26].mxu0 %vm729_vm0, %v722_v20  ;;  %2279 = vperm.xlu0 %6609, %v2221_v53   ;;  %v4206_v20 = vld [vmem:[%s8545_s20 + $0x40] sm:$0xff] }
  0x4f   : > { %5645 = vmatprep.mubr.msk.f32.mxu0 %vm729_vm0, %v723_v21  ;;  %v4207_v21 = vld [vmem:[%s8545_s20 + $0x48] sm:$0xff] }
  0x51   : > { %2284 = vperm.xlu1 %6610, %v2222_v54  }
  0x52   : > { %5646 = vmatmul.mubr.msk.f32.gmra.mrb[28].mxu0 %vm729_vm0, %v724_v22  ;;  %2289 = vperm.xlu0 %6609, %v2223_v55   ;;  %v4208_v22 = vld [vmem:[%s8545_s20 + $0x50] sm:$0xff] }
  0x53   : > { %5648 = vmatprep.mubr.msk.f32.mxu0 %vm729_vm0, %v725_v23 }
  0x55   : > { %2294 = vperm.xlu1 %6610, %v2224_v57   ;;  %v4659_v57 = vld [vmem:[%s8547_s22 + $0x18] sm:$0xff] }
  0x56   : > { %5649 = vmatmul.mubr.msk.f32.gmra.mrb[30].mxu0 %vm729_vm0, %v726_v24  ;;  %2299 = vperm.xlu0 %6609, %v2225_v58   ;;  %v4660_v58 = vld [vmem:[%s8547_s22 + $0x20] sm:$0xff] }
  0x57   : > { %5683 = vmatprep.mubr.f32.mxu0 %v1219_v56 }
  0x59   : > { %2304 = vperm.xlu1 %6610, %v2226_v59  }
  0x5a   : > { %3187 = vperm.xlu0 %6609, %v3169_v60  }
  0x5d   : > { %3192 = vperm.xlu1 %6610, %v3170_v61  }
  0x5e   : > { %3197 = vperm.xlu0 %6609, %v3171_v62  }
  0x61   : > { %3202 = vperm.xlu1 %6610, %v3172_v63  }
  0x62   : > { %3207 = vperm.xlu0 %6609, %v3173_v0  }
  0x65   : > { %3212 = vperm.xlu1 %6610, %v3174_v1   ;;  %v4661_v1 = vld [vmem:[%s8547_s22 + $0x28] sm:$0xff] }
  0x66   : > { %3217 = vperm.xlu0 %6609, %v3175_v2   ;;  %v4662_v2 = vld [vmem:[%s8547_s22 + $0x30] sm:$0xff] }
  0x69   : > { %3222 = vperm.xlu1 %6610, %v3176_v3  }
  0x6a   : > { %3227 = vperm.xlu0 %6609, %v3177_v4  }
  0x6d   : > { %3232 = vperm.xlu1 %6610, %v3178_v5  }
  0x6e   : > { %3237 = vperm.xlu0 %6609, %v3179_v6  }
  0x71   : > { %3242 = vperm.xlu1 %6610, %v3180_v7  }
  0x72   : > { %3247 = vperm.xlu0 %6609, %v3181_v8  }
  0x75   : > { %3252 = vperm.xlu1 %6610, %v3182_v9   ;;  %v4663_v9 = vld [vmem:[%s8547_s22 + $0x38] sm:$0xff] }
  0x76   : > { %3257 = vperm.xlu0 %6609, %v3183_v10  }
  0x79   : > { %3262 = vperm.xlu1 %6610, %v3184_v11  }
  0x7a   : > { %4216 = vperm.xlu0 %6609, %v4198_v12  }
  0x7d   : > { %4221 = vperm.xlu1 %6610, %v4199_v13  }
  0x7e   : > { %4226 = vperm.xlu0 %6609, %v4200_v14   ;;  %v1865_v14 = vld [vmem:[%s8533_s8] sm:$0xff] }
  0x81   : > { %4231 = vperm.xlu1 %6610, %v4201_v15   ;;  %v1866_v15 = vld [vmem:[%s8533_s8 + $0x8] sm:$0xff] }
  0x82   : > { %4236 = vperm.xlu0 %6609, %v4202_v16  }
  0x85   : > { %4241 = vperm.xlu1 %6610, %v4203_v17  }
  0x86   : > { %4246 = vperm.xlu0 %6609, %v4204_v18  }
  0x89   : > { %4251 = vperm.xlu1 %6610, %v4205_v19  }
  0x8a   : > { %4256 = vperm.xlu0 %6609, %v4206_v20  }
  0x8d   : > { %4261 = vperm.xlu1 %6610, %v4207_v21  }
  0x8e   : > { %4266 = vperm.xlu0 %6609, %v4208_v22   ;;  %v6119_v22 = vpack.c.bf16 %v1866_v15, %v1865_v14  ;;  %v1243_v14 = vld [vmem:[%s8575_s5 + $0xd0] sm:$0xff]  ;;  %v1253_v15 = vld [vmem:[%s8575_s5 + $0x120] sm:$0xff] }
  0x91   : > { %4271 = vperm.xlu1 %6610, %v4209_v25   ;;  %v1217_v25 = vld [vmem:[%s8575_s5] sm:$0xff] }
  0x92   : > { %4276 = vperm.xlu0 %6609, %v4210_v26  }
  0x95   : > { %4281 = vperm.xlu1 %6610, %v4211_v33  }
  0x96   : > { %4286 = vperm.xlu0 %6609, %v4212_v34  }
  0x99   : > { %4291 = vperm.xlu1 %6610, %v4213_v41  }
  0x9a   : > { %4666 = vperm.xlu0 %6609, %v4656_v42   ;;  %v1230_v42 = vld [vmem:[%s8575_s5 + $0x68] sm:$0xff] }
  0x9d   : > { %4671 = vperm.xlu1 %6610, %v4657_v49  }
  0x9e   : > { %4676 = vperm.xlu0 %6609, %v4658_v50   ;;  %v1232_v50 = vld [vmem:[%s8575_s5 + $0x78] sm:$0xff] }
  0xa1   : > { %4681 = vperm.xlu1 %6610, %v4659_v57   ;;  %v1239_v57 = vld [vmem:[%s8575_s5 + $0xb0] sm:$0xff] }
  0xa2   : > { %4686 = vperm.xlu0 %6609, %v4660_v58  }
  0xa5   : > { %4691 = vperm.xlu1 %6610, %v4661_v1   ;;  %v1245_v1 = vld [vmem:[%s8575_s5 + $0xe0] sm:$0xff] }
  0xa6   : > { %4696 = vperm.xlu0 %6609, %v4662_v2   ;;  %v1225_v2 = vld [vmem:[%s8575_s5 + $0x40] sm:$0xff] }
  0xa9   : > { %4701 = vperm.xlu1 %6610, %v4663_v9   ;;  %v1251_v9 = vld [vmem:[%s8575_s5 + $0x110] sm:$0xff] }
  0xed   : > { %v5573_v23 = vpop.f32.mrb[0].mxu0 }
  0xee   : > { %v5601_v24 = vpop.f32.mrb[0].mxu1  ;;  %v844_v27 = vpop.f32.mrb[1].mxu0 }
  0xef   : > { %v991_v28 = vpop.f32.mrb[1].mxu1  ;;  %v6049_v29 = vpack.c.bf16 %v5573_v23, %v844_v27  ;;  %v1221_v27 = vld [vmem:[%s8575_s5 + $0x20] sm:$0xff] }
  0xf0   : > { %v6047_v30 = vpack.c.bf16 %v5601_v24, %v991_v28 }
  0xf1   : > { %v5576_v31 = vpop.f32.mrb[2].mxu0 }
  0xf2   : > { %v5604_v32 = vpop.f32.mrb[2].mxu1  ;;  %6048 = vmatprep.subr.bf16.mxu1 %v6047_v30  ;;  %v854_v35 = vpop.f32.mrb[3].mxu0  ;;  %v1220_v30 = vld [vmem:[%s8575_s5 + $0x18] sm:$0xff] }
  0xf3   : > { %v1001_v36 = vpop.f32.mrb[3].mxu1  ;;  %6050 = vmatpush3.bf16.msra.mxu1 %v6049_v29  ;;  %v6053_v37 = vpack.c.bf16 %v5576_v31, %v854_v35  ;;  %v1223_v35 = vld [vmem:[%s8575_s5 + $0x30] sm:$0xff] }
  0xf4   : > { %v6051_v38 = vpack.c.bf16 %v5604_v32, %v1001_v36  ;;  %v1224_v32 = vld [vmem:[%s8575_s5 + $0x38] sm:$0xff] }
  0xf5   : > { %v5579_v39 = vpop.f32.mrb[4].mxu0 }
  0xf6   : > { %v5607_v40 = vpop.f32.mrb[4].mxu1  ;;  %6052 = vmatprep.subr.bf16.mxu1 %v6051_v38  ;;  %v864_v43 = vpop.f32.mrb[5].mxu0 }
  0xf7   : > { %v1011_v44 = vpop.f32.mrb[5].mxu1  ;;  %6054 = vmatpush3.bf16.msra.mxu1 %v6053_v37  ;;  %v6057_v45 = vpack.c.bf16 %v5579_v39, %v864_v43  ;;  %v1227_v37 = vld [vmem:[%s8575_s5 + $0x50] sm:$0xff] }
  0xf8   : > { %v6055_v46 = vpack.c.bf16 %v5607_v40, %v1011_v44  ;;  %v1226_v40 = vld [vmem:[%s8575_s5 + $0x48] sm:$0xff] }
  0xf9   : > { %v5582_v47 = vpop.f32.mrb[6].mxu0 }
  0xfa   : > { %v5610_v48 = vpop.f32.mrb[6].mxu1  ;;  %6056 = vmatprep.subr.bf16.mxu1 %v6055_v46  ;;  %v874_v51 = vpop.f32.mrb[7].mxu0 }
  0xfb   : > { %v1021_v52 = vpop.f32.mrb[7].mxu1  ;;  %6058 = vmatpush3.bf16.msra.mxu1 %v6057_v45  ;;  %v6061_v53 = vpack.c.bf16 %v5582_v47, %v874_v51  ;;  %v1229_v45 = vld [vmem:[%s8575_s5 + $0x60] sm:$0xff] }
  0xfc   : > { %v6059_v54 = vpack.c.bf16 %v5610_v48, %v1021_v52  ;;  %v1233_v47 = vld [vmem:[%s8575_s5 + $0x80] sm:$0xff]  ;;  %v1236_v52 = vld [vmem:[%s8575_s5 + $0x98] sm:$0xff] }
  0xfd   : > { %v5585_v55 = vpop.f32.mrb[8].mxu0 }
  0xfe   : > { %v5613_v56 = vpop.f32.mrb[8].mxu1  ;;  %6060 = vmatprep.subr.bf16.mxu1 %v6059_v54  ;;  %v884_v59 = vpop.f32.mrb[9].mxu0 }
  0xff   : > { %v1031_v60 = vpop.f32.mrb[9].mxu1  ;;  %6062 = vmatpush3.bf16.msra.mxu1 %v6061_v53  ;;  %v6065_v61 = vpack.c.bf16 %v5585_v55, %v884_v59  ;;  %v1235_v55 = vld [vmem:[%s8575_s5 + $0x90] sm:$0xff] }
 0x100   : > { %v6063_v62 = vpack.c.bf16 %v5613_v56, %v1031_v60  ;;  %v1238_v60 = vld [vmem:[%s8575_s5 + $0xa8] sm:$0xff] }
 0x101   : > { %v5588_v63 = vpop.f32.mrb[10].mxu0 }
 0x102   : > { %v5616_v0 = vpop.f32.mrb[10].mxu1  ;;  %6064 = vmatprep.subr.bf16.mxu1 %v6063_v62  ;;  %v894_v3 = vpop.f32.mrb[11].mxu0  ;;  %v1242_v62 = vld [vmem:[%s8575_s5 + $0xc8] sm:$0xff] }
 0x103   : > { %v1041_v4 = vpop.f32.mrb[11].mxu1  ;;  %6066 = vmatpush3.bf16.msra.mxu1 %v6065_v61  ;;  %v6069_v5 = vpack.c.bf16 %v5588_v63, %v894_v3  ;;  %v1241_v63 = vld [vmem:[%s8575_s5 + $0xc0] sm:$0xff]  ;;  %v1244_v3 = vld [vmem:[%s8575_s5 + $0xd8] sm:$0xff] }
 0x104   : > { %v6067_v6 = vpack.c.bf16 %v5616_v0, %v1041_v4  ;;  %v1222_v0 = vld [vmem:[%s8575_s5 + $0x28] sm:$0xff]  ;;  %v1228_v4 = vld [vmem:[%s8575_s5 + $0x58] sm:$0xff] }
 0x105   : > { %v5591_v7 = vpop.f32.mrb[12].mxu0 }
 0x106   : > { %v5619_v8 = vpop.f32.mrb[12].mxu1  ;;  %6068 = vmatprep.subr.bf16.mxu1 %v6067_v6  ;;  %v904_v10 = vpop.f32.mrb[13].mxu0  ;;  %v1231_v6 = vld [vmem:[%s8575_s5 + $0x70] sm:$0xff] }
 0x107   : > { %v1051_v11 = vpop.f32.mrb[13].mxu1  ;;  %6070 = vmatpush3.bf16.msra.mxu1 %v6069_v5  ;;  %v6073_v12 = vpack.c.bf16 %v5591_v7, %v904_v10  ;;  %v1248_v5 = vld [vmem:[%s8575_s5 + $0xf8] sm:$0xff]  ;;  %v1247_v7 = vld [vmem:[%s8575_s5 + $0xf0] sm:$0xff]  ;;  %v1237_v10 = vld [vmem:[%s8575_s5 + $0xa0] sm:$0xff] }
 0x108   : > { %v6071_v13 = vpack.c.bf16 %v5619_v8, %v1051_v11  ;;  %v1234_v8 = vld [vmem:[%s8575_s5 + $0x88] sm:$0xff] }
 0x109   : > { %v5594_v16 = vpop.f32.mrb[14].mxu0  ;;  %v1250_v11 = vld [vmem:[%s8575_s5 + $0x108] sm:$0xff] }
 0x10a   : > { %v5622_v17 = vpop.f32.mrb[14].mxu1  ;;  %6072 = vmatprep.subr.bf16.mxu1 %v6071_v13  ;;  %v914_v18 = vpop.f32.mrb[15].mxu0  ;;  %v1254_v13 = vld [vmem:[%s8575_s5 + $0x128] sm:$0xff] }
 0x10b   : > { %v1061_v19 = vpop.f32.mrb[15].mxu1  ;;  %6074 = vmatpush3.bf16.msra.mxu1 %v6073_v12  ;;  %v6077_v20 = vpack.c.bf16 %v5594_v16, %v914_v18  ;;  %v1240_v12 = vld [vmem:[%s8575_s5 + $0xb8] sm:$0xff]  ;;  %v1246_v16 = vld [vmem:[%s8575_s5 + $0xe8] sm:$0xff]  ;;  %v1249_v18 = vld [vmem:[%s8575_s5 + $0x100] sm:$0xff] }
 0x10c   : > { %v6075_v21 = vpack.c.bf16 %v5622_v17, %v1061_v19  ;;  %v1257_v17 = vld [vmem:[%s8575_s5 + $0x140] sm:$0xff]  ;;  %v1256_v19 = vld [vmem:[%s8575_s5 + $0x138] sm:$0xff] }
 0x10d   : > { %v5629_v23 = vpop.f32.mrb[16].mxu0 }
 0x10e   : > { %6076 = vmatprep.subr.bf16.mxu1 %v6075_v21  ;;  %v1138_v24 = vpop.f32.mrb[17].mxu0  ;;  %v1260_v21 = vld [vmem:[%s8575_s5 + $0x158] sm:$0xff] }
 0x10f   : > { %6078 = vmatpush3.bf16.msra.mxu1 %v6077_v20  ;;  %v6079_v26 = vpack.c.bf16 %v5629_v23, %v1138_v24  ;;  %v1252_v20 = vld [vmem:[%s8575_s5 + $0x118] sm:$0xff]  ;;  %v1259_v23 = vld [vmem:[%s8575_s5 + $0x150] sm:$0xff]  ;;  %v1258_v24 = vld [vmem:[%s8575_s5 + $0x148] sm:$0xff] }
 0x110   : > { %6120 = vmatprep.subr.bf16.mxu1 %v6119_v22 }
 0x111   : > { %v5632_v28 = vpop.f32.mrb[18].mxu0  ;;  %6080 = vmatprep.subr.bf16.mxu0 %v6079_v26 }
 0x112   : > { %1426 = vmatmul.mubr.f32.vlgmr.msra.gmra.mrb[16].mxu1 %v1217_v25  ;;  %v1148_v29 = vpop.f32.mrb[19].mxu0  ;;  %6082 = vmatpush3.bf16.msra.mxu0 %v6079_v26  ;;  %v1263_v25 = vld [vmem:[%s8575_s5 + $0x170] sm:$0xff]  ;;  %v1261_v26 = vld [vmem:[%s8575_s5 + $0x160] sm:$0xff] }
 0x113   : > { %1430 = vmatprep.mubr.f32.mxu1 %v1221_v27  ;;  %v6083_v31 = vpack.c.bf16 %v5632_v28, %v1148_v29  ;;  %6122 = vmatpush3.bf16.msra.mxu1 %v6119_v22  ;;  %v1255_v22 = vld [vmem:[%s8575_s5 + $0x130] sm:$0xff]  ;;  %v1262_v27 = vld [vmem:[%s8575_s5 + $0x168] sm:$0xff]  ;;  %v1264_v28 = vld [vmem:[%s8575_s5 + $0x178] sm:$0xff]  ;;  %s8578_s5 = sshll.u32 %s8580_s30, 7 }
 0x114   : > { %v1867_v29 = vld [vmem:[%s8533_s8 + $0x10] sm:$0xff]  ;;  %s8504_s0 = scalar_lea.vmem %s8548_s23, %s8578_s5 }
 0x115   : > { %v5635_v33 = vpop.f32.mrb[20].mxu0  ;;  %6084 = vmatprep.subr.bf16.mxu0 %v6083_v31 }
 0x116   : > { %1431 = vmatmul.mubr.f32.gmra.mrb[18].mxu1 %v1220_v30  ;;  %v1158_v34 = vpop.f32.mrb[21].mxu0  ;;  %6086 = vmatpush3.bf16.msra.mxu0 %v6083_v31  ;;  %v1868_v30 = vld [vmem:[%s8533_s8 + $0x18] sm:$0xff]  ;;  %v1667_v31 = vld [vmem:[%s8576_s3] sm:$0xff] }
 0x117   : > { %1435 = vmatprep.mubr.f32.mxu1 %v1224_v32  ;;  %v6087_v36 = vpack.c.bf16 %v5635_v33, %v1158_v34  ;;  %v6123_v32 = vpack.c.bf16 %v1868_v30, %v1867_v29  ;;  %v1668_v33 = vld [vmem:[%s8576_s3 + $0x8] sm:$0xff] }
 0x118   : > { %v6111_v34 = vpack.c.bf16 %v1668_v33, %v1667_v31 }
 0x119   : > { %v5638_v38 = vpop.f32.mrb[22].mxu0  ;;  %6088 = vmatprep.subr.bf16.mxu0 %v6087_v36  ;;  %6124 = vmatprep.subr.bf16.mxu1 %v6123_v32 }
 0x11a   : > { %1436 = vmatmul.mubr.f32.gmra.mrb[20].mxu1 %v1223_v35  ;;  %v1168_v39 = vpop.f32.mrb[23].mxu0  ;;  %6090 = vmatpush3.bf16.msra.mxu0 %v6087_v36  ;;  %v1669_v35 = vld [vmem:[%s8576_s3 + $0x10] sm:$0xff]  ;;  %v1670_v36 = vld [vmem:[%s8576_s3 + $0x18] sm:$0xff] }
 0x11b   : > { %1440 = vmatprep.mubr.f32.mxu1 %v1227_v37  ;;  %v6091_v41 = vpack.c.bf16 %v5638_v38, %v1168_v39  ;;  %6126 = vmatpush3.bf16.msra.mxu1 %v6123_v32  ;;  %v6115_v37 = vpack.c.bf16 %v1670_v36, %v1669_v35  ;;  %v2014_v38 = vld [vmem:[%s8534_s9] sm:$0xff]  ;;  %v2015_v39 = vld [vmem:[%s8534_s9 + $0x8] sm:$0xff] }
 0x11d   : > { %v5641_v43 = vpop.f32.mrb[24].mxu0  ;;  %6092 = vmatprep.subr.bf16.mxu0 %v6091_v41 }
 0x11e   : > { %1441 = vmatmul.mubr.f32.gmra.mrb[22].mxu1 %v1226_v40  ;;  %v1178_v44 = vpop.f32.mrb[25].mxu0  ;;  %6094 = vmatpush3.bf16.msra.mxu0 %v6091_v41  ;;  %v7231_v40 = vpack.c.bf16 %v2015_v39, %v2014_v38 }
 0x11f   : > { %1445 = vmatprep.mubr.f32.mxu1 %v1230_v42  ;;  %v6095_v46 = vpack.c.bf16 %v5641_v43, %v1178_v44 }
 0x121   : > { %v5644_v48 = vpop.f32.mrb[26].mxu0  ;;  %6096 = vmatprep.subr.bf16.mxu0 %v6095_v46 }
 0x122   : > { %1446 = vmatmul.mubr.f32.gmra.mrb[24].mxu1 %v1229_v45  ;;  %v1188_v49 = vpop.f32.mrb[27].mxu0  ;;  %6098 = vmatpush3.bf16.msra.mxu0 %v6095_v46 }
 0x123   : > { %1450 = vmatprep.mubr.f32.mxu1 %v1233_v47  ;;  %v6099_v51 = vpack.c.bf16 %v5644_v48, %v1188_v49 }
 0x125   : > { %v5647_v53 = vpop.f32.mrb[28].mxu0  ;;  %6100 = vmatprep.subr.bf16.mxu0 %v6099_v51 }
 0x126   : > { %1451 = vmatmul.mubr.f32.gmra.mrb[26].mxu1 %v1232_v50  ;;  %v1198_v54 = vpop.f32.mrb[29].mxu0  ;;  %6102 = vmatpush3.bf16.msra.mxu0 %v6099_v51  ;;  %v1284_v50 = vpop.permute.xlu0 %1283 }
 0x127   : > { %1455 = vmatprep.mubr.f32.mxu1 %v1236_v52  ;;  %v6103_v56 = vpack.c.bf16 %v5647_v53, %v1198_v54  ;;  %v1294_v52 = vpop.permute.xlu1 %1293 }
 0x129   : > { %v5650_v58 = vpop.f32.mrb[30].mxu0  ;;  %6104 = vmatprep.subr.bf16.mxu0 %v6103_v56 }
 0x12a   : > { %1456 = vmatmul.mubr.f32.gmra.mrb[28].mxu1 %v1235_v55  ;;  %v1208_v59 = vpop.f32.mrb[31].mxu0  ;;  %6106 = vmatpush3.bf16.msra.mxu0 %v6103_v56  ;;  %v1289_v56 = vpop.permute.xlu0 %1288 }
 0x12b   : > { %1460 = vmatprep.mubr.f32.mxu1 %v1239_v57  ;;  %v6107_v61 = vpack.c.bf16 %v5650_v58, %v1208_v59  ;;  %v1299_v59 = vpop.permute.xlu1 %1298 }
 0x12d   : > { %6108 = vmatprep.subr.bf16.mxu0 %v6107_v61 }
 0x12e   : > { %1461 = vmatmul.mubr.f32.gmra.mrb[30].mxu1 %v1238_v60  ;;  %6110 = vmatpush3.bf16.msra.mxu0 %v6107_v61 }
 0x12f   : > { %1465 = vmatprep.mubr.f32.mxu1 %v1242_v62  ;;  %6112 = vmatprep.subr.bf16.mxu0 %v6111_v34 }
 0x131   : > { %5684 = vmatmul.mubr.f32.vlgmr.msra.gmra.mrb[32].mxu0 %v1222_v0 }
 0x132   : > { %1466 = vmatmul.mubr.f32.gmra.mrb[32].mxu1 %v1241_v63  ;;  %5686 = vmatprep.mubr.f32.mxu0 %v1225_v2  ;;  %v1304_v63 = vpop.permute.xlu0 %1303 }
 0x133   : > { %1470 = vmatprep.mubr.f32.mxu1 %v1245_v1  ;;  %6114 = vmatpush3.bf16.msra.mxu0 %v6111_v34  ;;  %v1309_v1 = vpop.permute.xlu1 %1308 }
 0x134   : > { %6116 = vmatprep.subr.bf16.mxu0 %v6115_v37 }
 0x135   : > { %5687 = vmatmul.mubr.f32.gmra.mrb[34].mxu0 %v1228_v4 }
 0x136   : > { %1471 = vmatmul.mubr.f32.gmra.mrb[34].mxu1 %v1244_v3  ;;  %5689 = vmatprep.mubr.f32.mxu0 %v1231_v6 }
 0x137   : > { %1475 = vmatprep.mubr.f32.mxu1 %v1248_v5  ;;  %6118 = vmatpush3.bf16.msra.mxu0 %v6115_v37  ;;  %v1314_v5 = vpop.permute.xlu0 %1313 }
 0x138   : > { %6128 = vmatprep.subr.bf16.mxu0 %v7231_v40 }
 0x139   : > { %5690 = vmatmul.mubr.f32.gmra.mrb[36].mxu0 %v1234_v8  ;;  %v1319_v8 = vpop.permute.xlu1 %1318 }
 0x13a   : > { %1476 = vmatmul.mubr.f32.gmra.mrb[36].mxu1 %v1247_v7  ;;  %5692 = vmatprep.mubr.f32.mxu0 %v1237_v10 }
 0x13b   : > { %1480 = vmatprep.mubr.f32.mxu1 %v1251_v9 }
 0x13d   : > { %5693 = vmatmul.mubr.f32.gmra.mrb[38].mxu0 %v1240_v12  ;;  %v1329_v33 = vpop.permute.xlu1 %1328 }
 0x13e   : > { %1481 = vmatmul.mubr.f32.gmra.mrb[38].mxu1 %v1250_v11  ;;  %5695 = vmatprep.mubr.f32.mxu0 %v1243_v14 }
 0x13f   : > { %1485 = vmatprep.mubr.f32.mxu1 %v1254_v13 }
 0x141   : > { %5696 = vmatmul.mubr.f32.gmra.mrb[40].mxu0 %v1246_v16 }
 0x142   : > { %1486 = vmatmul.mubr.f32.gmra.mrb[40].mxu1 %v1253_v15  ;;  %5698 = vmatprep.mubr.f32.mxu0 %v1249_v18  ;;  %v2016_v18 = vld [vmem:[%s8534_s9 + $0x10] sm:$0xff] }
 0x143   : > { %1490 = vmatprep.mubr.f32.mxu1 %v1257_v17 }
 0x145   : > { %5699 = vmatmul.mubr.f32.gmra.mrb[42].mxu0 %v1252_v20  ;;  %v1324_v20 = vpop.permute.xlu0 %1323 }
 0x146   : > { %1491 = vmatmul.mubr.f32.gmra.mrb[42].mxu1 %v1256_v19  ;;  %5701 = vmatprep.mubr.f32.mxu0 %v1255_v22  ;;  %v2017_v19 = vld [vmem:[%s8534_s9 + $0x18] sm:$0xff] }
 0x147   : > { %1495 = vmatprep.mubr.f32.mxu1 %v1260_v21  ;;  %v6131_v30 = vpack.c.bf16 %v2017_v19, %v2016_v18 }
 0x149   : > { %5702 = vmatmul.mubr.f32.gmra.mrb[44].mxu0 %v1258_v24 }
 0x14a   : > { %1496 = vmatmul.mubr.f32.gmra.mrb[44].mxu1 %v1259_v23  ;;  %5704 = vmatprep.mubr.f32.mxu0 %v1261_v26 }
 0x14b   : > { %1500 = vmatprep.mubr.f32.mxu1 %v1263_v25 }
 0x14d   : > { %5705 = vmatmul.mubr.f32.gmra.mrb[46].mxu0 %v1264_v28 }
 0x14e   : > { %1501 = vmatmul.mubr.f32.gmra.mrb[46].mxu1 %v1262_v27 }
 0x1e5   : > { %v5131_v41 = vpop.f32.mrb[16].mxu1 }
 0x1e6   : > { %v5132_v42 = vpop.f32.mrb[17].mxu1 }
 0x1e7   : > { %v5133_v43 = vadd.f32 %v5132_v42, %v5131_v41 }
 0x1e9   : > { %v5134_v44 = vpop.f32.mrb[18].mxu1  ;;  %v1428_v12 = vadd.f32 %v5133_v43, %v1284_v50 }
 0x1ea   : > { %v5135_v45 = vpop.f32.mrb[19].mxu1 }
 0x1eb   : > { %v5136_v46 = vadd.f32 %v5135_v45, %v5134_v44 }
 0x1ed   : > { %v5137_v47 = vpop.f32.mrb[20].mxu1  ;;  %v1433_v9 = vadd.f32 %v5136_v46, %v1289_v56  ;;  %v1334_v46 = vpop.permute.xlu0 %1333 }
 0x1ee   : > { %v5138_v48 = vpop.f32.mrb[21].mxu1 }
 0x1ef   : > { %v5139_v49 = vadd.f32 %v5138_v48, %v5137_v47 }
 0x1f1   : > { %v5140_v51 = vpop.f32.mrb[22].mxu1  ;;  %v1438_v25 = vadd.f32 %v5139_v49, %v1294_v52 }
 0x1f2   : > { %v5141_v53 = vpop.f32.mrb[23].mxu1 }
 0x1f3   : > { %v5142_v54 = vadd.f32 %v5141_v53, %v5140_v51 }
 0x1f5   : > { %v5143_v55 = vpop.f32.mrb[24].mxu1  ;;  %v1443_v21 = vadd.f32 %v5142_v54, %v1299_v59 }
 0x1f6   : > { %v5144_v57 = vpop.f32.mrb[25].mxu1 }
 0x1f7   : > { %v5145_v58 = vadd.f32 %v5144_v57, %v5143_v55  ;;  %v1339_v57 = vpop.permute.xlu1 %1338 }
 0x1f9   : > { %v5146_v60 = vpop.f32.mrb[26].mxu1  ;;  %v1448_v38 = vadd.f32 %v5145_v58, %v1304_v63 }
 0x1fa   : > { %v5147_v61 = vpop.f32.mrb[27].mxu1 }
 0x1fb   : > { %v5148_v62 = vadd.f32 %v5147_v61, %v5146_v60 }
 0x1fd   : > { %v5149_v0 = vpop.f32.mrb[28].mxu1  ;;  %v1453_v34 = vadd.f32 %v5148_v62, %v1309_v1 }
 0x1fe   : > { %v5150_v2 = vpop.f32.mrb[29].mxu1 }
 0x1ff   : > { %v5151_v3 = vadd.f32 %v5150_v2, %v5149_v0 }
 0x201   : > { %v5152_v4 = vpop.f32.mrb[30].mxu1  ;;  %v1458_v50 = vadd.f32 %v5151_v3, %v1314_v5  ;;  %v1344_v5 = vpop.permute.xlu0 %1343 }
 0x202   : > { %v5153_v6 = vpop.f32.mrb[31].mxu1 }
 0x203   : > { %v5154_v7 = vadd.f32 %v5153_v6, %v5152_v4 }
 0x204   : > { %v5685_v11 = vpop.f32.mrb[32].mxu0 }
 0x205   : > { %v5155_v10 = vpop.f32.mrb[32].mxu1  ;;  %v1578_v13 = vadd.f32 %v5685_v11, %v1433_v9  ;;  %v1572_v15 = vpop.f32.mrb[33].mxu0 }
 0x206   : > { %v5156_v14 = vpop.f32.mrb[33].mxu1  ;;  %v1573_v17 = vadd.f32 %v1572_v15, %v1428_v12 }
 0x207   : > { %v5157_v16 = vadd.f32 %v5156_v14, %v5155_v10  ;;  %v7242_v26 = vmax.f32 %v1578_v13, 0.0 }
 0x208   : > { %v7240_v22 = vmax.f32 %v1573_v17, 0.0  ;;  %v5688_v24 = vpop.f32.mrb[34].mxu0  ;;  %v1349_v17 = vpop.permute.xlu1 %1348 }
 0x209   : > { %v5158_v23 = vpop.f32.mrb[34].mxu1  ;;  %v1588_v27 = vadd.f32 %v5688_v24, %v1443_v21  ;;  %v1582_v29 = vpop.f32.mrb[35].mxu0  ;;  %v1468_v62 = vadd.f32 %v5157_v16, %v1324_v20 }
 0x20a   : > { %v5159_v28 = vpop.f32.mrb[35].mxu1  ;;  %v1583_v32 = vadd.f32 %v1582_v29, %v1438_v25  ;;  %5715 = vmatprep.mubr.msk.f32.mxu0 %vm1671_vm1, %v7240_v22  ;;  %5747 = vmatprep.mubr.msk.f32.mxu1 %vm1671_vm1, %v7240_v22 }
 0x20b   : > { %v5160_v31 = vadd.f32 %v5159_v28, %v5158_v23  ;;  %5716 = vmatmul.mubr.msk.f32.vlgmr.msra.gmra.mrb[48].mxu0 %vm1671_vm1, %v7242_v26  ;;  %5748 = vmatmul.mubr.msk.f32.vlgmr.msra.gmra.mrb[48].mxu1 %vm1671_vm1, %v7242_v26  ;;  %v7255_v39 = vmax.f32 %v1588_v27, 0.0 }
 0x20c   : > { %v7252_v35 = vmax.f32 %v1583_v32, 0.0  ;;  %v5691_v37 = vpop.f32.mrb[36].mxu0  ;;  %6130 = vmatpush3.bf16.msra.mxu0 %v7231_v40  ;;  %v1463_v40 = vadd.f32 %v5154_v7, %v1319_v8 }
 0x20d   : > { %v5161_v36 = vpop.f32.mrb[36].mxu1  ;;  %v1598_v41 = vadd.f32 %v5691_v37, %v1453_v34  ;;  %v1592_v43 = vpop.f32.mrb[37].mxu0  ;;  %6132 = vmatprep.subr.bf16.mxu0 %v6131_v30  ;;  %v1473_v58 = vadd.f32 %v5160_v31, %v1329_v33 }
 0x20e   : > { %v5162_v42 = vpop.f32.mrb[37].mxu1  ;;  %v1593_v45 = vadd.f32 %v1592_v43, %v1448_v38  ;;  %5718 = vmatprep.mubr.msk.f32.mxu0 %vm1671_vm1, %v7252_v35  ;;  %5750 = vmatprep.mubr.msk.f32.mxu1 %vm1671_vm1, %v7252_v35  ;;  %v1354_v31 = vpop.permute.xlu0 %1353 }
 0x20f   : > { %v5163_v44 = vadd.f32 %v5162_v42, %v5161_v36  ;;  %5719 = vmatmul.mubr.msk.f32.gmra.mrb[50].mxu0 %vm1671_vm1, %v7255_v39  ;;  %5751 = vmatmul.mubr.msk.f32.gmra.mrb[50].mxu1 %vm1671_vm1, %v7255_v39  ;;  %v7267_v51 = vmax.f32 %v1598_v41, 0.0 }
 0x210   : > { %v7265_v47 = vmax.f32 %v1593_v45, 0.0  ;;  %v5694_v49 = vpop.f32.mrb[38].mxu0  ;;  %6134 = vmatpush3.bf16.msra.mxu0 %v6131_v30 }
 0x211   : > { %v5164_v48 = vpop.f32.mrb[38].mxu1  ;;  %v1608_v52 = vadd.f32 %v5694_v49, %v1463_v40  ;;  %v1602_v54 = vpop.f32.mrb[39].mxu0  ;;  %v1478_v10 = vadd.f32 %v5163_v44, %v1334_v46 }
 0x212   : > { %v5165_v53 = vpop.f32.mrb[39].mxu1  ;;  %v1603_v56 = vadd.f32 %v1602_v54, %v1458_v50  ;;  %5721 = vmatprep.mubr.msk.f32.mxu0 %vm1671_vm1, %v7265_v47  ;;  %5753 = vmatprep.mubr.msk.f32.mxu1 %vm1671_vm1, %v7265_v47  ;;  %v1359_v44 = vpop.permute.xlu1 %1358 }
 0x213   : > { %v5166_v55 = vadd.f32 %v5165_v53, %v5164_v48  ;;  %5722 = vmatmul.mubr.msk.f32.gmra.mrb[52].mxu0 %vm1671_vm1, %v7267_v51  ;;  %5754 = vmatmul.mubr.msk.f32.gmra.mrb[52].mxu1 %vm1671_vm1, %v7267_v51  ;;  %v7279_v63 = vmax.f32 %v1608_v52, 0.0 }
 0x214   : > { %v7277_v59 = vmax.f32 %v1603_v56, 0.0  ;;  %v5697_v61 = vpop.f32.mrb[40].mxu0 }
 0x215   : > { %v5167_v60 = vpop.f32.mrb[40].mxu1  ;;  %v1618_v0 = vadd.f32 %v5697_v61, %v1473_v58  ;;  %v1612_v2 = vpop.f32.mrb[41].mxu0  ;;  %v1483_v6 = vadd.f32 %v5166_v55, %v1339_v57 }
 0x216   : > { %v5168_v1 = vpop.f32.mrb[41].mxu1  ;;  %v1613_v4 = vadd.f32 %v1612_v2, %v1468_v62  ;;  %5724 = vmatprep.mubr.msk.f32.mxu0 %vm1671_vm1, %v7277_v59  ;;  %5756 = vmatprep.mubr.msk.f32.mxu1 %vm1671_vm1, %v7277_v59 }
 0x217   : > { %v5169_v3 = vadd.f32 %v5168_v1, %v5167_v60  ;;  %5725 = vmatmul.mubr.msk.f32.gmra.mrb[54].mxu0 %vm1671_vm1, %v7279_v63  ;;  %5757 = vmatmul.mubr.msk.f32.gmra.mrb[54].mxu1 %vm1671_vm1, %v7279_v63  ;;  %v1660_v11 = vmax.f32 %v1618_v0, 0.0 }
 0x218   : > { %v1659_v7 = vmax.f32 %v1613_v4, 0.0  ;;  %v5700_v9 = vpop.f32.mrb[42].mxu0 }
 0x219   : > { %v5170_v8 = vpop.f32.mrb[42].mxu1  ;;  %v1628_v12 = vadd.f32 %v5700_v9, %v1483_v6  ;;  %v1622_v14 = vpop.f32.mrb[43].mxu0  ;;  %v1488_v23 = vadd.f32 %v5169_v3, %v1344_v5 }
 0x21a   : > { %v5171_v13 = vpop.f32.mrb[43].mxu1  ;;  %v1623_v16 = vadd.f32 %v1622_v14, %v1478_v10  ;;  %5727 = vmatprep.mubr.msk.f32.mxu0 %vm1671_vm1, %v1659_v7  ;;  %5759 = vmatprep.mubr.msk.f32.mxu1 %vm1671_vm1, %v1659_v7 }
 0x21b   : > { %v5172_v15 = vadd.f32 %v5171_v13, %v5170_v8  ;;  %5728 = vmatmul.mubr.msk.f32.gmra.mrb[56].mxu0 %vm1671_vm1, %v1660_v11  ;;  %5760 = vmatmul.mubr.msk.f32.gmra.mrb[56].mxu1 %vm1671_vm1, %v1660_v11  ;;  %v1662_v24 = vmax.f32 %v1628_v12, 0.0 }
 0x21c   : > { %v1661_v18 = vmax.f32 %v1623_v16, 0.0  ;;  %v5703_v21 = vpop.f32.mrb[44].mxu0 }
 0x21d   : > { %v5173_v19 = vpop.f32.mrb[44].mxu1  ;;  %v1493_v20 = vadd.f32 %v5172_v15, %v1349_v17  ;;  %v1632_v27 = vpop.f32.mrb[45].mxu0 }
 0x21e   : > { %v5174_v25 = vpop.f32.mrb[45].mxu1  ;;  %v1633_v30 = vadd.f32 %v1632_v27, %v1488_v23  ;;  %5730 = vmatprep.mubr.msk.f32.mxu0 %vm1671_vm1, %v1661_v18  ;;  %5762 = vmatprep.mubr.msk.f32.mxu1 %vm1671_vm1, %v1661_v18 }
 0x21f   : > { %v1638_v28 = vadd.f32 %v5703_v21, %v1493_v20  ;;  %v5175_v29 = vadd.f32 %v5174_v25, %v5173_v19  ;;  %5731 = vmatmul.mubr.msk.f32.gmra.mrb[58].mxu0 %vm1671_vm1, %v1662_v24  ;;  %5763 = vmatmul.mubr.msk.f32.gmra.mrb[58].mxu1 %vm1671_vm1, %v1662_v24 }
 0x220   : > { %v1663_v33 = vmax.f32 %v1633_v30, 0.0  ;;  %v5706_v36 = vpop.f32.mrb[46].mxu0 }
 0x221   : > { %v1664_v32 = vmax.f32 %v1638_v28, 0.0  ;;  %v5176_v34 = vpop.f32.mrb[46].mxu1  ;;  %v1498_v37 = vadd.f32 %v5175_v29, %v1354_v31  ;;  %v1642_v41 = vpop.f32.mrb[47].mxu0 }
 0x222   : > { %v5177_v38 = vpop.f32.mrb[47].mxu1  ;;  %5733 = vmatprep.mubr.msk.f32.mxu0 %vm1671_vm1, %v1663_v33  ;;  %5765 = vmatprep.mubr.msk.f32.mxu1 %vm1671_vm1, %v1663_v33 }
 0x223   : > { %v5178_v42 = vadd.f32 %v5177_v38, %v5176_v34  ;;  %v1643_v43 = vadd.f32 %v1642_v41, %v1498_v37  ;;  %5734 = vmatmul.mubr.msk.f32.gmra.mrb[60].mxu0 %vm1671_vm1, %v1664_v32  ;;  %5766 = vmatmul.mubr.msk.f32.gmra.mrb[60].mxu1 %vm1671_vm1, %v1664_v32  ;;  %v2163_v34 = vld [vmem:[%s8577_s6] sm:$0xff] }
 0x224   : > { %v2167_v37 = vld [vmem:[%s8577_s6 + $0x20] sm:$0xff] }
 0x225   : > { %v1503_v45 = vadd.f32 %v5178_v42, %v1359_v44  ;;  %v1665_v46 = vmax.f32 %v1643_v43, 0.0  ;;  %v2166_v42 = vld [vmem:[%s8577_s6 + $0x18] sm:$0xff] }
 0x226   : > { %v2170_v44 = vld [vmem:[%s8577_s6 + $0x38] sm:$0xff] }
 0x227   : > { %v1648_v40 = vadd.f32 %v5706_v36, %v1503_v45  ;;  %5736 = vmatprep.mubr.msk.f32.mxu0 %vm1671_vm1, %v1665_v46  ;;  %5768 = vmatprep.mubr.msk.f32.mxu1 %vm1671_vm1, %v1665_v46 }
 0x229   : > { %v1666_v48 = vmax.f32 %v1648_v40, 0.0  ;;  %v2169_v40 = vld [vmem:[%s8577_s6 + $0x30] sm:$0xff] }
 0x22b   : > { %5737 = vmatmul.mubr.msk.f32.gmra.mrb[62].mxu0 %vm1671_vm1, %v1666_v48  ;;  %5769 = vmatmul.mubr.msk.f32.gmra.mrb[62].mxu1 %vm1671_vm1, %v1666_v48 }
 0x22c   : > { %5779 = vmatprep.mubr.msk.f32.mxu0 %vm1671_vm1, %v7240_v22  ;;  %v2164_v22 = vld [vmem:[%s8577_s6 + $0x8] sm:$0xff] }
 0x22d   : > { %2371 = vmatprep.mubr.f32.mxu1 %v2164_v22  ;;  %v2173_v22 = vld [vmem:[%s8577_s6 + $0x50] sm:$0xff] }
 0x22f   : > { %5780 = vmatmul.mubr.msk.f32.vlgmr.msra.gmra.mrb[64].mxu0 %vm1671_vm1, %v7242_v26  ;;  %v2165_v26 = vld [vmem:[%s8577_s6 + $0x10] sm:$0xff] }
 0x230   : > { %5782 = vmatprep.mubr.msk.f32.mxu0 %vm1671_vm1, %v7252_v35 }
 0x233   : > { %5783 = vmatmul.mubr.msk.f32.gmra.mrb[66].mxu0 %vm1671_vm1, %v7255_v39 }
 0x234   : > { %5785 = vmatprep.mubr.msk.f32.mxu0 %vm1671_vm1, %v7265_v47 }
 0x237   : > { %5786 = vmatmul.mubr.msk.f32.gmra.mrb[68].mxu0 %vm1671_vm1, %v7267_v51 }
 0x238   : > { %5788 = vmatprep.mubr.msk.f32.mxu0 %vm1671_vm1, %v7277_v59 }
 0x23b   : > { %5789 = vmatmul.mubr.msk.f32.gmra.mrb[70].mxu0 %vm1671_vm1, %v7279_v63 }
 0x23c   : > { %5791 = vmatprep.mubr.msk.f32.mxu0 %vm1671_vm1, %v1659_v7 }
 0x23f   : > { %5792 = vmatmul.mubr.msk.f32.gmra.mrb[72].mxu0 %vm1671_vm1, %v1660_v11 }
 0x240   : > { %5794 = vmatprep.mubr.msk.f32.mxu0 %vm1671_vm1, %v1661_v18 }
 0x243   : > { %5795 = vmatmul.mubr.msk.f32.gmra.mrb[74].mxu0 %vm1671_vm1, %v1662_v24 }
 0x244   : > { %5797 = vmatprep.mubr.msk.f32.mxu0 %vm1671_vm1, %v1663_v33 }
 0x247   : > { %5798 = vmatmul.mubr.msk.f32.gmra.mrb[76].mxu0 %vm1671_vm1, %v1664_v32 }
 0x248   : > { %5800 = vmatprep.mubr.msk.f32.mxu0 %vm1671_vm1, %v1665_v46 }
 0x24b   : > { %5801 = vmatmul.mubr.msk.f32.gmra.mrb[78].mxu0 %vm1671_vm1, %v1666_v48 }
 0x24c   : > { %5835 = vmatprep.mubr.f32.mxu0 %v2165_v26 }
 0x2de   : > { %v5717_v35 = vpop.f32.mrb[48].mxu0  ;;  %v5749_v39 = vpop.f32.mrb[48].mxu1 }
 0x2df   : > { %v1786_v47 = vpop.f32.mrb[49].mxu0  ;;  %v1935_v49 = vpop.f32.mrb[49].mxu1 }
 0x2e0   : > { %v6137_v50 = vpack.c.bf16 %v5717_v35, %v1786_v47  ;;  %v6135_v51 = vpack.c.bf16 %v5749_v39, %v1935_v49  ;;  %v2172_v39 = vld [vmem:[%s8577_s6 + $0x48] sm:$0xff] }
 0x2e1   : > { %v2176_v49 = vld [vmem:[%s8577_s6 + $0x68] sm:$0xff] }
 0x2e2   : > { %v5720_v52 = vpop.f32.mrb[50].mxu0  ;;  %v5752_v53 = vpop.f32.mrb[50].mxu1  ;;  %6136 = vmatprep.subr.bf16.mxu1 %v6135_v51 }
 0x2e3   : > { %v1796_v54 = vpop.f32.mrb[51].mxu0  ;;  %v1945_v55 = vpop.f32.mrb[51].mxu1  ;;  %6138 = vmatpush3.bf16.msra.mxu1 %v6137_v50 }
 0x2e4   : > { %v6141_v56 = vpack.c.bf16 %v5720_v52, %v1796_v54  ;;  %v6139_v57 = vpack.c.bf16 %v5752_v53, %v1945_v55  ;;  %v2175_v52 = vld [vmem:[%s8577_s6 + $0x60] sm:$0xff] }
 0x2e5   : > { %v2179_v54 = vld [vmem:[%s8577_s6 + $0x80] sm:$0xff] }
 0x2e6   : > { %v5723_v58 = vpop.f32.mrb[52].mxu0  ;;  %v5755_v59 = vpop.f32.mrb[52].mxu1  ;;  %6140 = vmatprep.subr.bf16.mxu1 %v6139_v57  ;;  %v2178_v57 = vld [vmem:[%s8577_s6 + $0x78] sm:$0xff] }
 0x2e7   : > { %v1806_v60 = vpop.f32.mrb[53].mxu0  ;;  %v1955_v61 = vpop.f32.mrb[53].mxu1  ;;  %6142 = vmatpush3.bf16.msra.mxu1 %v6141_v56 }
 0x2e8   : > { %v6145_v62 = vpack.c.bf16 %v5723_v58, %v1806_v60  ;;  %v6143_v63 = vpack.c.bf16 %v5755_v59, %v1955_v61  ;;  %v2182_v59 = vld [vmem:[%s8577_s6 + $0x98] sm:$0xff] }
 0x2ea   : > { %v5726_v0 = vpop.f32.mrb[54].mxu0  ;;  %v5758_v1 = vpop.f32.mrb[54].mxu1  ;;  %6144 = vmatprep.subr.bf16.mxu1 %v6143_v63 }
 0x2eb   : > { %v1816_v2 = vpop.f32.mrb[55].mxu0  ;;  %v1965_v3 = vpop.f32.mrb[55].mxu1  ;;  %6146 = vmatpush3.bf16.msra.mxu1 %v6145_v62  ;;  %v2181_v62 = vld [vmem:[%s8577_s6 + $0x90] sm:$0xff] }
 0x2ec   : > { %v6149_v4 = vpack.c.bf16 %v5726_v0, %v1816_v2  ;;  %v6147_v5 = vpack.c.bf16 %v5758_v1, %v1965_v3  ;;  %v2185_v0 = vld [vmem:[%s8577_s6 + $0xb0] sm:$0xff]  ;;  %v2184_v3 = vld [vmem:[%s8577_s6 + $0xa8] sm:$0xff] }
 0x2ee   : > { %v5729_v6 = vpop.f32.mrb[56].mxu0  ;;  %v5761_v7 = vpop.f32.mrb[56].mxu1  ;;  %6148 = vmatprep.subr.bf16.mxu1 %v6147_v5  ;;  %v2188_v5 = vld [vmem:[%s8577_s6 + $0xc8] sm:$0xff] }
 0x2ef   : > { %v1826_v8 = vpop.f32.mrb[57].mxu0  ;;  %v1975_v9 = vpop.f32.mrb[57].mxu1  ;;  %6150 = vmatpush3.bf16.msra.mxu1 %v6149_v4 }
 0x2f0   : > { %v6153_v10 = vpack.c.bf16 %v5729_v6, %v1826_v8  ;;  %v6151_v11 = vpack.c.bf16 %v5761_v7, %v1975_v9  ;;  %v2187_v6 = vld [vmem:[%s8577_s6 + $0xc0] sm:$0xff]  ;;  %v2168_v7 = vld [vmem:[%s8577_s6 + $0x28] sm:$0xff] }
 0x2f1   : > { %v2191_v8 = vld [vmem:[%s8577_s6 + $0xe0] sm:$0xff] }
 0x2f2   : > { %v5732_v12 = vpop.f32.mrb[58].mxu0  ;;  %v5764_v13 = vpop.f32.mrb[58].mxu1  ;;  %6152 = vmatprep.subr.bf16.mxu1 %v6151_v11  ;;  %v2171_v9 = vld [vmem:[%s8577_s6 + $0x40] sm:$0xff]  ;;  %v2174_v11 = vld [vmem:[%s8577_s6 + $0x58] sm:$0xff] }
 0x2f3   : > { %v1836_v14 = vpop.f32.mrb[59].mxu0  ;;  %v1985_v15 = vpop.f32.mrb[59].mxu1  ;;  %6154 = vmatpush3.bf16.msra.mxu1 %v6153_v10  ;;  %v2190_v10 = vld [vmem:[%s8577_s6 + $0xd8] sm:$0xff] }
 0x2f4   : > { %v6157_v16 = vpack.c.bf16 %v5732_v12, %v1836_v14  ;;  %v6155_v17 = vpack.c.bf16 %v5764_v13, %v1985_v15  ;;  %v2194_v12 = vld [vmem:[%s8577_s6 + $0xf8] sm:$0xff]  ;;  %v2177_v13 = vld [vmem:[%s8577_s6 + $0x70] sm:$0xff]  ;;  %v2180_v15 = vld [vmem:[%s8577_s6 + $0x88] sm:$0xff] }
 0x2f5   : > { %v2193_v14 = vld [vmem:[%s8577_s6 + $0xf0] sm:$0xff] }
 0x2f6   : > { %v5735_v18 = vpop.f32.mrb[60].mxu0  ;;  %v5767_v19 = vpop.f32.mrb[60].mxu1  ;;  %6156 = vmatprep.subr.bf16.mxu1 %v6155_v17  ;;  %v2183_v17 = vld [vmem:[%s8577_s6 + $0xa0] sm:$0xff] }
 0x2f7   : > { %v1846_v20 = vpop.f32.mrb[61].mxu0  ;;  %v1995_v21 = vpop.f32.mrb[61].mxu1  ;;  %6158 = vmatpush3.bf16.msra.mxu1 %v6157_v16  ;;  %v2197_v16 = vld [vmem:[%s8577_s6 + $0x110] sm:$0xff] }
 0x2f8   : > { %v6161_v23 = vpack.c.bf16 %v5735_v18, %v1846_v20  ;;  %v6159_v24 = vpack.c.bf16 %v5767_v19, %v1995_v21  ;;  %v2196_v18 = vld [vmem:[%s8577_s6 + $0x108] sm:$0xff]  ;;  %v2186_v19 = vld [vmem:[%s8577_s6 + $0xb8] sm:$0xff]  ;;  %v2189_v21 = vld [vmem:[%s8577_s6 + $0xd0] sm:$0xff] }
 0x2f9   : > { %v2200_v20 = vld [vmem:[%s8577_s6 + $0x128] sm:$0xff] }
 0x2fa   : > { %6160 = vmatprep.subr.bf16.mxu1 %v6159_v24  ;;  %v2192_v24 = vld [vmem:[%s8577_s6 + $0xe8] sm:$0xff] }
 0x2fb   : > { %6162 = vmatpush3.bf16.msra.mxu1 %v6161_v23  ;;  %v2199_v23 = vld [vmem:[%s8577_s6 + $0x120] sm:$0xff] }
 0x2fe   : > { %v5738_v25 = vpop.f32.mrb[62].mxu0  ;;  %v5770_v27 = vpop.f32.mrb[62].mxu1 }
 0x2ff   : > { %v1856_v28 = vpop.f32.mrb[63].mxu0  ;;  %v2005_v29 = vpop.f32.mrb[63].mxu1 }
 0x300   : > { %v6165_v30 = vpack.c.bf16 %v5738_v25, %v1856_v28  ;;  %v6163_v31 = vpack.c.bf16 %v5770_v27, %v2005_v29  ;;  %v2203_v25 = vld [vmem:[%s8577_s6 + $0x140] sm:$0xff]  ;;  %v2202_v28 = vld [vmem:[%s8577_s6 + $0x138] sm:$0xff] }
 0x301   : > { %v2195_v27 = vld [vmem:[%s8577_s6 + $0x100] sm:$0xff]  ;;  %v2198_v29 = vld [vmem:[%s8577_s6 + $0x118] sm:$0xff] }
 0x302   : > { %v5781_v32 = vpop.f32.mrb[64].mxu0  ;;  %6164 = vmatprep.subr.bf16.mxu1 %v6163_v31  ;;  %v2201_v31 = vld [vmem:[%s8577_s6 + $0x130] sm:$0xff] }
 0x303   : > { %v2084_v33 = vpop.f32.mrb[65].mxu0  ;;  %6166 = vmatpush3.bf16.msra.mxu1 %v6165_v30  ;;  %v2206_v30 = vld [vmem:[%s8577_s6 + $0x158] sm:$0xff] }
 0x304   : > { %v6167_v36 = vpack.c.bf16 %v5781_v32, %v2084_v33  ;;  %v2205_v32 = vld [vmem:[%s8577_s6 + $0x150] sm:$0xff]  ;;  %v2204_v33 = vld [vmem:[%s8577_s6 + $0x148] sm:$0xff] }
 0x306   : > { %v5784_v38 = vpop.f32.mrb[66].mxu0  ;;  %2372 = vmatmul.mubr.f32.vlgmr.msra.gmra.mrb[64].mxu1 %v2163_v34  ;;  %6168 = vmatprep.subr.bf16.mxu0 %v6167_v36  ;;  %v2209_v34 = vld [vmem:[%s8577_s6 + $0x170] sm:$0xff] }
 0x307   : > { %v2094_v41 = vpop.f32.mrb[67].mxu0  ;;  %6170 = vmatpush3.bf16.msra.mxu0 %v6167_v36  ;;  %2376 = vmatprep.mubr.f32.mxu1 %v2167_v37  ;;  %v2207_v36 = vld [vmem:[%s8577_s6 + $0x160] sm:$0xff]  ;;  %v2208_v37 = vld [vmem:[%s8577_s6 + $0x168] sm:$0xff] }
 0x308   : > { %v6171_v43 = vpack.c.bf16 %v5784_v38, %v2094_v41  ;;  %v2210_v38 = vld [vmem:[%s8577_s6 + $0x178] sm:$0xff]  ;;  %v2815_v41 = vld [vmem:[%s8538_s13] sm:$0xff] }
 0x30a   : > { %v5787_v45 = vpop.f32.mrb[68].mxu0  ;;  %2377 = vmatmul.mubr.f32.gmra.mrb[66].mxu1 %v2166_v42  ;;  %6172 = vmatprep.subr.bf16.mxu0 %v6171_v43  ;;  %v2816_v42 = vld [vmem:[%s8538_s13 + $0x8] sm:$0xff] }
 0x30b   : > { %v2104_v46 = vpop.f32.mrb[69].mxu0  ;;  %6174 = vmatpush3.bf16.msra.mxu0 %v6171_v43  ;;  %2381 = vmatprep.mubr.f32.mxu1 %v2170_v44  ;;  %v6215_v43 = vpack.c.bf16 %v2816_v42, %v2815_v41  ;;  %v2613_v44 = vld [vmem:[%s8537_s12] sm:$0xff] }
 0x30c   : > { %v6175_v48 = vpack.c.bf16 %v5787_v45, %v2104_v46  ;;  %v2614_v45 = vld [vmem:[%s8537_s12 + $0x8] sm:$0xff] }
 0x30d   : > { %6216 = vmatprep.subr.bf16.mxu1 %v6215_v43  ;;  %v6199_v46 = vpack.c.bf16 %v2614_v45, %v2613_v44  ;;  %v2970_v45 = vld [vmem:[%s8539_s14 + $0x10] sm:$0xff] }
 0x30e   : > { %v5790_v26 = vpop.f32.mrb[70].mxu0  ;;  %2382 = vmatmul.mubr.f32.gmra.mrb[68].mxu1 %v2169_v40  ;;  %6176 = vmatprep.subr.bf16.mxu0 %v6175_v48  ;;  %v2615_v40 = vld [vmem:[%s8537_s12 + $0x10] sm:$0xff] }
 0x30f   : > { %v2114_v35 = vpop.f32.mrb[71].mxu0  ;;  %6178 = vmatpush3.bf16.msra.mxu0 %v6175_v48  ;;  %2386 = vmatprep.mubr.f32.mxu1 %v2173_v22  ;;  %v2616_v48 = vld [vmem:[%s8537_s12 + $0x18] sm:$0xff] }
 0x310   : > { %v6179_v47 = vpack.c.bf16 %v5790_v26, %v2114_v35  ;;  %6218 = vmatpush3.bf16.msra.mxu1 %v6215_v43  ;;  %v6203_v22 = vpack.c.bf16 %v2616_v48, %v2615_v40  ;;  %v2817_v26 = vld [vmem:[%s8538_s13 + $0x10] sm:$0xff]  ;;  %v2818_v35 = vld [vmem:[%s8538_s13 + $0x18] sm:$0xff] }
 0x312   : > { %v5793_v50 = vpop.f32.mrb[72].mxu0  ;;  %2387 = vmatmul.mubr.f32.gmra.mrb[70].mxu1 %v2172_v39  ;;  %6180 = vmatprep.subr.bf16.mxu0 %v6179_v47  ;;  %v6219_v39 = vpack.c.bf16 %v2818_v35, %v2817_v26 }
 0x313   : > { %v2124_v51 = vpop.f32.mrb[73].mxu0  ;;  %6182 = vmatpush3.bf16.msra.mxu0 %v6179_v47  ;;  %2391 = vmatprep.mubr.f32.mxu1 %v2176_v49  ;;  %v2617_v47 = vld [vmem:[%s8537_s12 + $0x20] sm:$0xff]  ;;  %v2618_v49 = vld [vmem:[%s8537_s12 + $0x28] sm:$0xff] }
 0x314   : > { %v6183_v53 = vpack.c.bf16 %v5793_v50, %v2124_v51  ;;  %6220 = vmatprep.subr.bf16.mxu1 %v6219_v39  ;;  %v2819_v50 = vld [vmem:[%s8538_s13 + $0x20] sm:$0xff]  ;;  %v6207_v51 = vpack.c.bf16 %v2618_v49, %v2617_v47 }
 0x315   : > { %6222 = vmatpush3.bf16.msra.mxu1 %v6219_v39 }
 0x316   : > { %v5796_v55 = vpop.f32.mrb[74].mxu0  ;;  %2392 = vmatmul.mubr.f32.gmra.mrb[72].mxu1 %v2175_v52  ;;  %6184 = vmatprep.subr.bf16.mxu0 %v6183_v53  ;;  %v2820_v52 = vld [vmem:[%s8538_s13 + $0x28] sm:$0xff] }
 0x317   : > { %v2134_v56 = vpop.f32.mrb[75].mxu0  ;;  %6186 = vmatpush3.bf16.msra.mxu0 %v6183_v53  ;;  %2396 = vmatprep.mubr.f32.mxu1 %v2179_v54  ;;  %v6223_v53 = vpack.c.bf16 %v2820_v52, %v2819_v50  ;;  %v2619_v54 = vld [vmem:[%s8537_s12 + $0x30] sm:$0xff] }
 0x318   : > { %v6187_v58 = vpack.c.bf16 %v5796_v55, %v2134_v56  ;;  %v2620_v55 = vld [vmem:[%s8537_s12 + $0x38] sm:$0xff]  ;;  %v2821_v56 = vld [vmem:[%s8538_s13 + $0x30] sm:$0xff] }
 0x319   : > { %6224 = vmatprep.subr.bf16.mxu1 %v6223_v53 }
 0x31a   : > { %v5799_v60 = vpop.f32.mrb[76].mxu0  ;;  %2397 = vmatmul.mubr.f32.gmra.mrb[74].mxu1 %v2178_v57  ;;  %6188 = vmatprep.subr.bf16.mxu0 %v6187_v58  ;;  %v6211_v57 = vpack.c.bf16 %v2620_v55, %v2619_v54  ;;  %v2972_v55 = vld [vmem:[%s8539_s14 + $0x20] sm:$0xff] }
 0x31b   : > { %v2144_v61 = vpop.f32.mrb[77].mxu0  ;;  %6190 = vmatpush3.bf16.msra.mxu0 %v6187_v58  ;;  %2401 = vmatprep.mubr.f32.mxu1 %v2182_v59  ;;  %v2822_v58 = vld [vmem:[%s8538_s13 + $0x38] sm:$0xff] }
 0x31c   : > { %v6191_v63 = vpack.c.bf16 %v5799_v60, %v2144_v61  ;;  %6226 = vmatpush3.bf16.msra.mxu1 %v6223_v53  ;;  %v6227_v59 = vpack.c.bf16 %v2822_v58, %v2821_v56  ;;  %v2968_v60 = vld [vmem:[%s8539_s14] sm:$0xff]  ;;  %v2969_v61 = vld [vmem:[%s8539_s14 + $0x8] sm:$0xff] }
 0x31d   : > { %v2973_v56 = vld [vmem:[%s8539_s14 + $0x28] sm:$0xff] }
 0x31e   : > { %v5802_v1 = vpop.f32.mrb[78].mxu0  ;;  %2402 = vmatmul.mubr.f32.gmra.mrb[76].mxu1 %v2181_v62  ;;  %6192 = vmatprep.subr.bf16.mxu0 %v6191_v63  ;;  %v7527_v62 = vpack.c.bf16 %v2969_v61, %v2968_v60 }
 0x31f   : > { %v2154_v2 = vpop.f32.mrb[79].mxu0  ;;  %6194 = vmatpush3.bf16.msra.mxu0 %v6191_v63  ;;  %2406 = vmatprep.mubr.f32.mxu1 %v2185_v0 }
 0x320   : > { %v6195_v4 = vpack.c.bf16 %v5802_v1, %v2154_v2  ;;  %6228 = vmatprep.subr.bf16.mxu1 %v6227_v59 }
 0x321   : > { %6230 = vmatpush3.bf16.msra.mxu1 %v6227_v59 }
 0x322   : > { %2407 = vmatmul.mubr.f32.gmra.mrb[78].mxu1 %v2184_v3  ;;  %6196 = vmatprep.subr.bf16.mxu0 %v6195_v4 }
 0x323   : > { %6198 = vmatpush3.bf16.msra.mxu0 %v6195_v4  ;;  %2411 = vmatprep.mubr.f32.mxu1 %v2188_v5 }
 0x324   : > { %6200 = vmatprep.subr.bf16.mxu0 %v6199_v46 }
 0x326   : > { %2412 = vmatmul.mubr.f32.gmra.mrb[80].mxu1 %v2187_v6  ;;  %5836 = vmatmul.mubr.f32.vlgmr.msra.gmra.mrb[80].mxu0 %v2168_v7 }
 0x327   : > { %2416 = vmatprep.mubr.f32.mxu1 %v2191_v8  ;;  %5838 = vmatprep.mubr.f32.mxu0 %v2171_v9  ;;  %v2230_v8 = vpop.permute.xlu0 %2229 }
 0x328   : > { %6202 = vmatpush3.bf16.msra.mxu0 %v6199_v46  ;;  %v2971_v46 = vld [vmem:[%s8539_s14 + $0x18] sm:$0xff] }
 0x329   : > { %6204 = vmatprep.subr.bf16.mxu0 %v6203_v22  ;;  %v6235_v52 = vpack.c.bf16 %v2971_v46, %v2970_v45 }
 0x32a   : > { %2417 = vmatmul.mubr.f32.gmra.mrb[82].mxu1 %v2190_v10  ;;  %5839 = vmatmul.mubr.f32.gmra.mrb[82].mxu0 %v2174_v11  ;;  %v2235_v10 = vpop.permute.xlu1 %2234 }
 0x32b   : > { %2421 = vmatprep.mubr.f32.mxu1 %v2194_v12  ;;  %5841 = vmatprep.mubr.f32.mxu0 %v2177_v13 }
 0x32c   : > { %6206 = vmatpush3.bf16.msra.mxu0 %v6203_v22 }
 0x32d   : > { %6208 = vmatprep.subr.bf16.mxu0 %v6207_v51 }
 0x32e   : > { %2422 = vmatmul.mubr.f32.gmra.mrb[84].mxu1 %v2193_v14  ;;  %5842 = vmatmul.mubr.f32.gmra.mrb[84].mxu0 %v2180_v15  ;;  %v2240_v14 = vpop.permute.xlu0 %2239 }
 0x32f   : > { %2426 = vmatprep.mubr.f32.mxu1 %v2197_v16  ;;  %5844 = vmatprep.mubr.f32.mxu0 %v2183_v17  ;;  %v2245_v17 = vpop.permute.xlu1 %2244 }
 0x330   : > { %6210 = vmatpush3.bf16.msra.mxu0 %v6207_v51 }
 0x331   : > { %6212 = vmatprep.subr.bf16.mxu0 %v6211_v57 }
 0x332   : > { %2427 = vmatmul.mubr.f32.gmra.mrb[86].mxu1 %v2196_v18  ;;  %5845 = vmatmul.mubr.f32.gmra.mrb[86].mxu0 %v2186_v19 }
 0x333   : > { %2431 = vmatprep.mubr.f32.mxu1 %v2200_v20  ;;  %5847 = vmatprep.mubr.f32.mxu0 %v2189_v21  ;;  %v2250_v21 = vpop.permute.xlu0 %2249 }
 0x334   : > { %6214 = vmatpush3.bf16.msra.mxu0 %v6211_v57 }
 0x335   : > { %6232 = vmatprep.subr.bf16.mxu0 %v7527_v62 }
 0x336   : > { %2432 = vmatmul.mubr.f32.gmra.mrb[88].mxu1 %v2199_v23  ;;  %5848 = vmatmul.mubr.f32.gmra.mrb[88].mxu0 %v2192_v24  ;;  %v2255_v24 = vpop.permute.xlu1 %2254 }
 0x337   : > { %2436 = vmatprep.mubr.f32.mxu1 %v2203_v25  ;;  %5850 = vmatprep.mubr.f32.mxu0 %v2195_v27 }
 0x33a   : > { %2437 = vmatmul.mubr.f32.gmra.mrb[90].mxu1 %v2202_v28  ;;  %5851 = vmatmul.mubr.f32.gmra.mrb[90].mxu0 %v2198_v29  ;;  %v2260_v29 = vpop.permute.xlu0 %2259 }
 0x33b   : > { %2441 = vmatprep.mubr.f32.mxu1 %v2206_v30  ;;  %5853 = vmatprep.mubr.f32.mxu0 %v2201_v31 }
 0x33e   : > { %2442 = vmatmul.mubr.f32.gmra.mrb[92].mxu1 %v2205_v32  ;;  %5854 = vmatmul.mubr.f32.gmra.mrb[92].mxu0 %v2204_v33  ;;  %v2265_v32 = vpop.permute.xlu1 %2264  ;;  %v7540_v40 = vpop.permute.xlu0 %2269 }
 0x33f   : > { %2446 = vmatprep.mubr.f32.mxu1 %v2209_v34  ;;  %5856 = vmatprep.mubr.f32.mxu0 %v2207_v36 }
 0x342   : > { %2447 = vmatmul.mubr.f32.gmra.mrb[94].mxu1 %v2208_v37  ;;  %5857 = vmatmul.mubr.f32.gmra.mrb[94].mxu0 %v2210_v38  ;;  %v2275_v57 = vpop.permute.xlu1 %2274 }
 0x3d9   : > { %v5303_v63 = vpop.f32.mrb[64].mxu1 }
 0x3da   : > { %v5304_v0 = vpop.f32.mrb[65].mxu1 }
 0x3db   : > { %v5305_v1 = vadd.f32 %v5304_v0, %v5303_v63 }
 0x3dd   : > { %v5306_v2 = vpop.f32.mrb[66].mxu1  ;;  %v2374_v37 = vadd.f32 %v5305_v1, %v2230_v8  ;;  %v2280_v8 = vpop.permute.xlu0 %2279 }
 0x3de   : > { %v5307_v3 = vpop.f32.mrb[67].mxu1 }
 0x3df   : > { %v5308_v4 = vadd.f32 %v5307_v3, %v5306_v2 }
 0x3e1   : > { %v5309_v5 = vpop.f32.mrb[68].mxu1  ;;  %v2379_v33 = vadd.f32 %v5308_v4, %v2235_v10  ;;  %v6239_v4 = vpack.c.bf16 %v2973_v56, %v2972_v55 }
 0x3e2   : > { %v5310_v6 = vpop.f32.mrb[69].mxu1 }
 0x3e3   : > { %v5311_v7 = vadd.f32 %v5310_v6, %v5309_v5 }
 0x3e5   : > { %v5312_v9 = vpop.f32.mrb[70].mxu1  ;;  %v2384_v39 = vadd.f32 %v5311_v7, %v2240_v14  ;;  %v2974_v7 = vld [vmem:[%s8539_s14 + $0x30] sm:$0xff] }
 0x3e6   : > { %v5313_v11 = vpop.f32.mrb[71].mxu1 }
 0x3e7   : > { %v5314_v12 = vadd.f32 %v5313_v11, %v5312_v9 }
 0x3e9   : > { %v5315_v13 = vpop.f32.mrb[72].mxu1  ;;  %v2389_v48 = vadd.f32 %v5314_v12, %v2245_v17 }
 0x3ea   : > { %v5316_v15 = vpop.f32.mrb[73].mxu1 }
 0x3eb   : > { %v5317_v16 = vadd.f32 %v5316_v15, %v5315_v13 }
 0x3ed   : > { %v5318_v18 = vpop.f32.mrb[74].mxu1  ;;  %v2394_v63 = vadd.f32 %v5317_v16, %v2250_v21  ;;  %v2285_v21 = vpop.permute.xlu1 %2284 }
 0x3ee   : > { %v5319_v19 = vpop.f32.mrb[75].mxu1 }
 0x3ef   : > { %v5320_v20 = vadd.f32 %v5319_v19, %v5318_v18 }
 0x3f1   : > { %v5321_v23 = vpop.f32.mrb[76].mxu1  ;;  %v2399_v58 = vadd.f32 %v5320_v20, %v2255_v24 }
 0x3f2   : > { %v5322_v25 = vpop.f32.mrb[77].mxu1 }
 0x3f3   : > { %v7530_v27 = vadd.f32 %v5322_v25, %v5321_v23 }
 0x3f5   : > { %v5324_v28 = vpop.f32.mrb[78].mxu1  ;;  %v2404_v13 = vadd.f32 %v7530_v27, %v2260_v29 }
 0x3f6   : > { %v5325_v30 = vpop.f32.mrb[79].mxu1 }
 0x3f7   : > { %v5326_v31 = vadd.f32 %v5325_v30, %v5324_v28 }
 0x3f9   : > { %v5327_v34 = vpop.f32.mrb[80].mxu1  ;;  %v5837_v36 = vpop.f32.mrb[80].mxu0  ;;  %v2409_v9 = vadd.f32 %v5326_v31, %v2265_v32 }
 0x3fa   : > { %v2524_v38 = vadd.f32 %v5837_v36, %v2379_v33  ;;  %v5328_v41 = vpop.f32.mrb[81].mxu1  ;;  %v2518_v42 = vpop.f32.mrb[81].mxu0 }
 0x3fb   : > { %v7532_v43 = vadd.f32 %v5328_v41, %v5327_v34  ;;  %v2519_v44 = vadd.f32 %v2518_v42, %v2374_v37  ;;  %v2290_v36 = vpop.permute.xlu0 %2289 }
 0x3fc   : > { %v7544_v47 = vmax.f32 %v2524_v38, 0.0 }
 0x3fd   : > { %v7542_v22 = vmax.f32 %v2519_v44, 0.0  ;;  %v5330_v26 = vpop.f32.mrb[82].mxu1  ;;  %v5840_v35 = vpop.f32.mrb[82].mxu0  ;;  %v2414_v28 = vadd.f32 %v7532_v43, %v7540_v40 }
 0x3fe   : > { %v2534_v49 = vadd.f32 %v5840_v35, %v2389_v48  ;;  %v5331_v50 = vpop.f32.mrb[83].mxu1  ;;  %v2528_v51 = vpop.f32.mrb[83].mxu0 }
 0x3ff   : > { %v5332_v53 = vadd.f32 %v5331_v50, %v5330_v26  ;;  %v2529_v54 = vadd.f32 %v2528_v51, %v2384_v39  ;;  %5875 = vmatprep.mubr.msk.f32.mxu0 %vm2621_vm2, %v7542_v22  ;;  %5915 = vmatprep.mubr.msk.f32.mxu1 %vm2621_vm2, %v7542_v22  ;;  %v2295_v35 = vpop.permute.xlu1 %2294 }
 0x400   : > { %5876 = vmatmul.mubr.msk.f32.vlgmr.msra.gmra.mrb[96].mxu0 %vm2621_vm2, %v7544_v47  ;;  %5916 = vmatmul.mubr.msk.f32.vlgmr.msra.gmra.mrb[96].mxu1 %vm2621_vm2, %v7544_v47  ;;  %v7563_v0 = vmax.f32 %v2534_v49, 0.0 }
 0x401   : > { %v7560_v59 = vmax.f32 %v2529_v54, 0.0  ;;  %v5333_v60 = vpop.f32.mrb[84].mxu1  ;;  %v5843_v61 = vpop.f32.mrb[84].mxu0  ;;  %6234 = vmatpush3.bf16.msra.mxu0 %v7527_v62  ;;  %v2975_v62 = vld [vmem:[%s8539_s14 + $0x38] sm:$0xff]  ;;  %v2419_v23 = vadd.f32 %v5332_v53, %v2275_v57 }
 0x402   : > { %v2544_v1 = vadd.f32 %v5843_v61, %v2399_v58  ;;  %v5334_v2 = vpop.f32.mrb[85].mxu1  ;;  %v2538_v3 = vpop.f32.mrb[85].mxu0  ;;  %6236 = vmatprep.subr.bf16.mxu0 %v6235_v52  ;;  %v6243_v18 = vpack.c.bf16 %v2975_v62, %v2974_v7 }
 0x403   : > { %v5335_v5 = vadd.f32 %v5334_v2, %v5333_v60  ;;  %v2539_v6 = vadd.f32 %v2538_v3, %v2394_v63  ;;  %5878 = vmatprep.mubr.msk.f32.mxu0 %vm2621_vm2, %v7560_v59  ;;  %5918 = vmatprep.mubr.msk.f32.mxu1 %vm2621_vm2, %v7560_v59  ;;  %v2300_v60 = vpop.permute.xlu0 %2299  ;;  %v2305_v62 = vpop.permute.xlu1 %2304 }
 0x404   : > { %5879 = vmatmul.mubr.msk.f32.gmra.mrb[98].mxu0 %vm2621_vm2, %v7563_v0  ;;  %5919 = vmatmul.mubr.msk.f32.gmra.mrb[98].mxu1 %vm2621_vm2, %v7563_v0  ;;  %v7582_v14 = vmax.f32 %v2544_v1, 0.0 }
 0x405   : > { %v7579_v10 = vmax.f32 %v2539_v6, 0.0  ;;  %v5336_v11 = vpop.f32.mrb[86].mxu1  ;;  %v5846_v12 = vpop.f32.mrb[86].mxu0  ;;  %6238 = vmatpush3.bf16.msra.mxu0 %v6235_v52  ;;  %v2424_v43 = vadd.f32 %v5335_v5, %v2280_v8 }
 0x406   : > { %v2554_v15 = vadd.f32 %v5846_v12, %v2409_v9  ;;  %v5337_v16 = vpop.f32.mrb[87].mxu1  ;;  %v2548_v17 = vpop.f32.mrb[87].mxu0  ;;  %6240 = vmatprep.subr.bf16.mxu0 %v6239_v4 }
 0x407   : > { %v5338_v19 = vadd.f32 %v5337_v16, %v5336_v11  ;;  %v2549_v20 = vadd.f32 %v2548_v17, %v2404_v13  ;;  %5881 = vmatprep.mubr.msk.f32.mxu0 %vm2621_vm2, %v7579_v10  ;;  %5921 = vmatprep.mubr.msk.f32.mxu1 %vm2621_vm2, %v7579_v10 }
 0x408   : > { %5882 = vmatmul.mubr.msk.f32.gmra.mrb[100].mxu0 %vm2621_vm2, %v7582_v14  ;;  %5922 = vmatmul.mubr.msk.f32.gmra.mrb[100].mxu1 %vm2621_vm2, %v7582_v14  ;;  %v7596_v29 = vmax.f32 %v2554_v15, 0.0 }
 0x409   : > { %v7592_v24 = vmax.f32 %v2549_v20, 0.0  ;;  %v5339_v25 = vpop.f32.mrb[88].mxu1  ;;  %v5849_v27 = vpop.f32.mrb[88].mxu0  ;;  %6242 = vmatpush3.bf16.msra.mxu0 %v6239_v4  ;;  %v2429_v37 = vadd.f32 %v5338_v19, %v2285_v21 }
 0x40a   : > { %v2564_v30 = vadd.f32 %v5849_v27, %v2419_v23  ;;  %v5340_v31 = vpop.f32.mrb[89].mxu1  ;;  %v2558_v32 = vpop.f32.mrb[89].mxu0  ;;  %6244 = vmatprep.subr.bf16.mxu0 %v6243_v18 }
 0x40b   : > { %v5341_v33 = vadd.f32 %v5340_v31, %v5339_v25  ;;  %v2559_v34 = vadd.f32 %v2558_v32, %v2414_v28  ;;  %5884 = vmatprep.mubr.msk.f32.mxu0 %vm2621_vm2, %v7592_v24  ;;  %5924 = vmatprep.mubr.msk.f32.mxu1 %vm2621_vm2, %v7592_v24 }
 0x40c   : > { %5885 = vmatmul.mubr.msk.f32.gmra.mrb[102].mxu0 %vm2621_vm2, %v7596_v29  ;;  %5925 = vmatmul.mubr.msk.f32.gmra.mrb[102].mxu1 %vm2621_vm2, %v7596_v29  ;;  %v2606_v44 = vmax.f32 %v2564_v30, 0.0 }
 0x40d   : > { %v2605_v38 = vmax.f32 %v2559_v34, 0.0  ;;  %v5342_v41 = vpop.f32.mrb[90].mxu1  ;;  %v5852_v42 = vpop.f32.mrb[90].mxu0  ;;  %6246 = vmatpush3.bf16.msra.mxu0 %v6243_v18  ;;  %v2434_v52 = vadd.f32 %v5341_v33, %v2290_v36 }
 0x40e   : > { %v2574_v45 = vadd.f32 %v5852_v42, %v2429_v37  ;;  %v5343_v46 = vpop.f32.mrb[91].mxu1  ;;  %v2568_v40 = vpop.f32.mrb[91].mxu0 }
 0x40f   : > { %v5344_v48 = vadd.f32 %v5343_v46, %v5342_v41  ;;  %v2569_v26 = vadd.f32 %v2568_v40, %v2424_v43  ;;  %5887 = vmatprep.mubr.msk.f32.mxu0 %vm2621_vm2, %v2605_v38  ;;  %5927 = vmatprep.mubr.msk.f32.mxu1 %vm2621_vm2, %v2605_v38 }
 0x410   : > { %5888 = vmatmul.mubr.msk.f32.gmra.mrb[104].mxu0 %vm2621_vm2, %v2606_v44  ;;  %5928 = vmatmul.mubr.msk.f32.gmra.mrb[104].mxu1 %vm2621_vm2, %v2606_v44  ;;  %v2608_v53 = vmax.f32 %v2574_v45, 0.0 }
 0x411   : > { %v2607_v39 = vmax.f32 %v2569_v26, 0.0  ;;  %v5345_v49 = vpop.f32.mrb[92].mxu1  ;;  %v2439_v50 = vadd.f32 %v5344_v48, %v2295_v35  ;;  %v5855_v51 = vpop.f32.mrb[92].mxu0 }
 0x412   : > { %v5346_v54 = vpop.f32.mrb[93].mxu1  ;;  %v2578_v55 = vpop.f32.mrb[93].mxu0 }
 0x413   : > { %v2584_v56 = vadd.f32 %v5855_v51, %v2439_v50  ;;  %v5347_v57 = vadd.f32 %v5346_v54, %v5345_v49  ;;  %v2579_v58 = vadd.f32 %v2578_v55, %v2434_v52  ;;  %5890 = vmatprep.mubr.msk.f32.mxu0 %vm2621_vm2, %v2607_v39  ;;  %5930 = vmatprep.mubr.msk.f32.mxu1 %vm2621_vm2, %v2607_v39 }
 0x414   : > { %5891 = vmatmul.mubr.msk.f32.gmra.mrb[106].mxu0 %vm2621_vm2, %v2608_v53  ;;  %5931 = vmatmul.mubr.msk.f32.gmra.mrb[106].mxu1 %vm2621_vm2, %v2608_v53 }
 0x415   : > { %v2610_v61 = vmax.f32 %v2584_v56, 0.0  ;;  %v2609_v63 = vmax.f32 %v2579_v58, 0.0  ;;  %v5348_v1 = vpop.f32.mrb[94].mxu1  ;;  %v5858_v2 = vpop.f32.mrb[94].mxu0  ;;  %v2444_v3 = vadd.f32 %v5347_v57, %v2300_v60 }
 0x416   : > { %v5349_v4 = vpop.f32.mrb[95].mxu1  ;;  %v2588_v5 = vpop.f32.mrb[95].mxu0 }
 0x417   : > { %v5350_v6 = vadd.f32 %v5349_v4, %v5348_v1  ;;  %v2589_v7 = vadd.f32 %v2588_v5, %v2444_v3  ;;  %5893 = vmatprep.mubr.msk.f32.mxu0 %vm2621_vm2, %v2609_v63  ;;  %5933 = vmatprep.mubr.msk.f32.mxu1 %vm2621_vm2, %v2609_v63  ;;  %v3121_v1 = vld [vmem:[%s8536_s11] sm:$0xff] }
 0x418   : > { %5894 = vmatmul.mubr.msk.f32.gmra.mrb[108].mxu0 %vm2621_vm2, %v2610_v61  ;;  %5934 = vmatmul.mubr.msk.f32.gmra.mrb[108].mxu1 %vm2621_vm2, %v2610_v61  ;;  %v3125_v3 = vld [vmem:[%s8536_s11 + $0x20] sm:$0xff] }
 0x419   : > { %v2449_v8 = vadd.f32 %v5350_v6, %v2305_v62  ;;  %v2611_v9 = vmax.f32 %v2589_v7, 0.0  ;;  %v3124_v6 = vld [vmem:[%s8536_s11 + $0x18] sm:$0xff] }
 0x41a   : > { %v3128_v62 = vld [vmem:[%s8536_s11 + $0x38] sm:$0xff] }
 0x41b   : > { %v2594_v11 = vadd.f32 %v5858_v2, %v2449_v8  ;;  %5896 = vmatprep.mubr.msk.f32.mxu0 %vm2621_vm2, %v2611_v9  ;;  %5936 = vmatprep.mubr.msk.f32.mxu1 %vm2621_vm2, %v2611_v9 }
 0x41d   : > { %v2612_v12 = vmax.f32 %v2594_v11, 0.0  ;;  %v3127_v11 = vld [vmem:[%s8536_s11 + $0x30] sm:$0xff] }
 0x41f   : > { %5897 = vmatmul.mubr.msk.f32.gmra.mrb[110].mxu0 %vm2621_vm2, %v2612_v12  ;;  %5937 = vmatmul.mubr.msk.f32.gmra.mrb[110].mxu1 %vm2621_vm2, %v2612_v12 }
 0x420   : > { %5955 = vmatprep.mubr.msk.f32.mxu0 %vm2621_vm2, %v7542_v22  ;;  %v3122_v22 = vld [vmem:[%s8536_s11 + $0x8] sm:$0xff] }
 0x421   : > { %3329 = vmatprep.mubr.f32.mxu1 %v3122_v22  ;;  %v3131_v22 = vld [vmem:[%s8536_s11 + $0x50] sm:$0xff] }
 0x423   : > { %5956 = vmatmul.mubr.msk.f32.vlgmr.msra.gmra.mrb[112].mxu0 %vm2621_vm2, %v7544_v47  ;;  %v3123_v47 = vld [vmem:[%s8536_s11 + $0x10] sm:$0xff] }
 0x424   : > { %5958 = vmatprep.mubr.msk.f32.mxu0 %vm2621_vm2, %v7560_v59 }
 0x427   : > { %5959 = vmatmul.mubr.msk.f32.gmra.mrb[114].mxu0 %vm2621_vm2, %v7563_v0 }
 0x428   : > { %5961 = vmatprep.mubr.msk.f32.mxu0 %vm2621_vm2, %v7579_v10 }
 0x42b   : > { %5962 = vmatmul.mubr.msk.f32.gmra.mrb[116].mxu0 %vm2621_vm2, %v7582_v14 }
 0x42c   : > { %5964 = vmatprep.mubr.msk.f32.mxu0 %vm2621_vm2, %v7592_v24 }
 0x42f   : > { %5965 = vmatmul.mubr.msk.f32.gmra.mrb[118].mxu0 %vm2621_vm2, %v7596_v29 }
 0x430   : > { %5967 = vmatprep.mubr.msk.f32.mxu0 %vm2621_vm2, %v2605_v38 }
 0x433   : > { %5968 = vmatmul.mubr.msk.f32.gmra.mrb[120].mxu0 %vm2621_vm2, %v2606_v44 }
 0x434   : > { %5970 = vmatprep.mubr.msk.f32.mxu0 %vm2621_vm2, %v2607_v39 }
 0x437   : > { %5971 = vmatmul.mubr.msk.f32.gmra.mrb[122].mxu0 %vm2621_vm2, %v2608_v53 }
 0x438   : > { %5973 = vmatprep.mubr.msk.f32.mxu0 %vm2621_vm2, %v2609_v63 }
 0x43b   : > { %5974 = vmatmul.mubr.msk.f32.gmra.mrb[124].mxu0 %vm2621_vm2, %v2610_v61 }
 0x43c   : > { %5976 = vmatprep.mubr.msk.f32.mxu0 %vm2621_vm2, %v2611_v9 }
 0x43f   : > { %5977 = vmatmul.mubr.msk.f32.gmra.mrb[126].mxu0 %vm2621_vm2, %v2612_v12 }
 0x440   : > { %6011 = vmatprep.mubr.f32.mxu0 %v3123_v47 }
 0x4d3   : > { %v5877_v59 = vpop.f32.mrb[96].mxu0  ;;  %v5917_v0 = vpop.f32.mrb[96].mxu1 }
 0x4d4   : > { %v2736_v10 = vpop.f32.mrb[97].mxu0  ;;  %v2889_v13 = vpop.f32.mrb[97].mxu1 }
 0x4d5   : > { %v6249_v14 = vpack.c.bf16 %v5877_v59, %v2736_v10  ;;  %v6247_v15 = vpack.c.bf16 %v5917_v0, %v2889_v13  ;;  %v3130_v0 = vld [vmem:[%s8536_s11 + $0x48] sm:$0xff] }
 0x4d6   : > { %v3134_v13 = vld [vmem:[%s8536_s11 + $0x68] sm:$0xff] }
 0x4d7   : > { %v5880_v16 = vpop.f32.mrb[98].mxu0  ;;  %v5920_v17 = vpop.f32.mrb[98].mxu1  ;;  %6248 = vmatprep.subr.bf16.mxu1 %v6247_v15 }
 0x4d8   : > { %v2746_v18 = vpop.f32.mrb[99].mxu0  ;;  %v2899_v19 = vpop.f32.mrb[99].mxu1  ;;  %6250 = vmatpush3.bf16.msra.mxu1 %v6249_v14 }
 0x4d9   : > { %v6253_v20 = vpack.c.bf16 %v5880_v16, %v2746_v18  ;;  %v6251_v21 = vpack.c.bf16 %v5920_v17, %v2899_v19  ;;  %v3133_v16 = vld [vmem:[%s8536_s11 + $0x60] sm:$0xff] }
 0x4da   : > { %v3137_v18 = vld [vmem:[%s8536_s11 + $0x80] sm:$0xff] }
 0x4db   : > { %v5883_v23 = vpop.f32.mrb[100].mxu0  ;;  %v5923_v24 = vpop.f32.mrb[100].mxu1  ;;  %6252 = vmatprep.subr.bf16.mxu1 %v6251_v21  ;;  %v3136_v21 = vld [vmem:[%s8536_s11 + $0x78] sm:$0xff] }
 0x4dc   : > { %v2756_v25 = vpop.f32.mrb[101].mxu0  ;;  %v2909_v27 = vpop.f32.mrb[101].mxu1  ;;  %6254 = vmatpush3.bf16.msra.mxu1 %v6253_v20 }
 0x4dd   : > { %v6257_v28 = vpack.c.bf16 %v5883_v23, %v2756_v25  ;;  %v6255_v29 = vpack.c.bf16 %v5923_v24, %v2909_v27  ;;  %v3140_v24 = vld [vmem:[%s8536_s11 + $0x98] sm:$0xff] }
 0x4df   : > { %v5886_v30 = vpop.f32.mrb[102].mxu0  ;;  %v5926_v31 = vpop.f32.mrb[102].mxu1  ;;  %6256 = vmatprep.subr.bf16.mxu1 %v6255_v29 }
 0x4e0   : > { %v2766_v32 = vpop.f32.mrb[103].mxu0  ;;  %v2919_v33 = vpop.f32.mrb[103].mxu1  ;;  %6258 = vmatpush3.bf16.msra.mxu1 %v6257_v28  ;;  %v3139_v28 = vld [vmem:[%s8536_s11 + $0x90] sm:$0xff] }
 0x4e1   : > { %v6261_v34 = vpack.c.bf16 %v5886_v30, %v2766_v32  ;;  %v6259_v36 = vpack.c.bf16 %v5926_v31, %v2919_v33  ;;  %v3143_v30 = vld [vmem:[%s8536_s11 + $0xb0] sm:$0xff]  ;;  %v3142_v33 = vld [vmem:[%s8536_s11 + $0xa8] sm:$0xff] }
 0x4e3   : > { %v5889_v37 = vpop.f32.mrb[104].mxu0  ;;  %v5929_v38 = vpop.f32.mrb[104].mxu1  ;;  %6260 = vmatprep.subr.bf16.mxu1 %v6259_v36  ;;  %v3146_v36 = vld [vmem:[%s8536_s11 + $0xc8] sm:$0xff] }
 0x4e4   : > { %v2776_v41 = vpop.f32.mrb[105].mxu0  ;;  %v2929_v42 = vpop.f32.mrb[105].mxu1  ;;  %6262 = vmatpush3.bf16.msra.mxu1 %v6261_v34 }
 0x4e5   : > { %v6265_v43 = vpack.c.bf16 %v5889_v37, %v2776_v41  ;;  %v6263_v44 = vpack.c.bf16 %v5929_v38, %v2929_v42  ;;  %v3145_v37 = vld [vmem:[%s8536_s11 + $0xc0] sm:$0xff]  ;;  %v3126_v38 = vld [vmem:[%s8536_s11 + $0x28] sm:$0xff] }
 0x4e6   : > { %v3149_v41 = vld [vmem:[%s8536_s11 + $0xe0] sm:$0xff] }
 0x4e7   : > { %v5892_v45 = vpop.f32.mrb[106].mxu0  ;;  %v5932_v46 = vpop.f32.mrb[106].mxu1  ;;  %6264 = vmatprep.subr.bf16.mxu1 %v6263_v44  ;;  %v3129_v42 = vld [vmem:[%s8536_s11 + $0x40] sm:$0xff]  ;;  %v3132_v44 = vld [vmem:[%s8536_s11 + $0x58] sm:$0xff] }
 0x4e8   : > { %v2786_v40 = vpop.f32.mrb[107].mxu0  ;;  %v2939_v48 = vpop.f32.mrb[107].mxu1  ;;  %6266 = vmatpush3.bf16.msra.mxu1 %v6265_v43  ;;  %v3148_v43 = vld [vmem:[%s8536_s11 + $0xd8] sm:$0xff] }
 0x4e9   : > { %v6269_v26 = vpack.c.bf16 %v5892_v45, %v2786_v40  ;;  %v6267_v35 = vpack.c.bf16 %v5932_v46, %v2939_v48  ;;  %v3152_v45 = vld [vmem:[%s8536_s11 + $0xf8] sm:$0xff]  ;;  %v3135_v46 = vld [vmem:[%s8536_s11 + $0x70] sm:$0xff]  ;;  %v3138_v48 = vld [vmem:[%s8536_s11 + $0x88] sm:$0xff] }
 0x4ea   : > { %v3151_v40 = vld [vmem:[%s8536_s11 + $0xf0] sm:$0xff] }
 0x4eb   : > { %v5895_v39 = vpop.f32.mrb[108].mxu0  ;;  %v5935_v49 = vpop.f32.mrb[108].mxu1  ;;  %6268 = vmatprep.subr.bf16.mxu1 %v6267_v35  ;;  %v3141_v35 = vld [vmem:[%s8536_s11 + $0xa0] sm:$0xff] }
 0x4ec   : > { %v2796_v50 = vpop.f32.mrb[109].mxu0  ;;  %v2949_v51 = vpop.f32.mrb[109].mxu1  ;;  %6270 = vmatpush3.bf16.msra.mxu1 %v6269_v26  ;;  %v3155_v26 = vld [vmem:[%s8536_s11 + $0x110] sm:$0xff] }
 0x4ed   : > { %v6273_v52 = vpack.c.bf16 %v5895_v39, %v2796_v50  ;;  %v6271_v53 = vpack.c.bf16 %v5935_v49, %v2949_v51  ;;  %v3154_v39 = vld [vmem:[%s8536_s11 + $0x108] sm:$0xff]  ;;  %v3144_v49 = vld [vmem:[%s8536_s11 + $0xb8] sm:$0xff]  ;;  %v3147_v51 = vld [vmem:[%s8536_s11 + $0xd0] sm:$0xff] }
 0x4ee   : > { %v3158_v50 = vld [vmem:[%s8536_s11 + $0x128] sm:$0xff] }
 0x4ef   : > { %6272 = vmatprep.subr.bf16.mxu1 %v6271_v53  ;;  %v3150_v53 = vld [vmem:[%s8536_s11 + $0xe8] sm:$0xff] }
 0x4f0   : > { %6274 = vmatpush3.bf16.msra.mxu1 %v6273_v52  ;;  %v3157_v52 = vld [vmem:[%s8536_s11 + $0x120] sm:$0xff] }
 0x4f2   : > { %v5898_v54 = vpop.f32.mrb[110].mxu0  ;;  %v5938_v55 = vpop.f32.mrb[110].mxu1 }
 0x4f3   : > { %v2806_v56 = vpop.f32.mrb[111].mxu0  ;;  %v2959_v57 = vpop.f32.mrb[111].mxu1 }
 0x4f4   : > { %v6277_v58 = vpack.c.bf16 %v5898_v54, %v2806_v56  ;;  %v6275_v60 = vpack.c.bf16 %v5938_v55, %v2959_v57  ;;  %v3161_v54 = vld [vmem:[%s8536_s11 + $0x140] sm:$0xff]  ;;  %v3160_v56 = vld [vmem:[%s8536_s11 + $0x138] sm:$0xff] }
 0x4f5   : > { %v3153_v55 = vld [vmem:[%s8536_s11 + $0x100] sm:$0xff]  ;;  %v3156_v57 = vld [vmem:[%s8536_s11 + $0x118] sm:$0xff] }
 0x4f6   : > { %v5957_v61 = vpop.f32.mrb[112].mxu0  ;;  %6276 = vmatprep.subr.bf16.mxu1 %v6275_v60  ;;  %v3159_v60 = vld [vmem:[%s8536_s11 + $0x130] sm:$0xff] }
 0x4f7   : > { %v3042_v63 = vpop.f32.mrb[113].mxu0  ;;  %6278 = vmatpush3.bf16.msra.mxu1 %v6277_v58  ;;  %v3164_v58 = vld [vmem:[%s8536_s11 + $0x158] sm:$0xff] }
 0x4f8   : > { %v6279_v2 = vpack.c.bf16 %v5957_v61, %v3042_v63  ;;  %v3163_v61 = vld [vmem:[%s8536_s11 + $0x150] sm:$0xff]  ;;  %v3162_v63 = vld [vmem:[%s8536_s11 + $0x148] sm:$0xff] }
 0x4fa   : > { %v5960_v4 = vpop.f32.mrb[114].mxu0  ;;  %3330 = vmatmul.mubr.f32.vlgmr.msra.gmra.mrb[112].mxu1 %v3121_v1  ;;  %6280 = vmatprep.subr.bf16.mxu0 %v6279_v2  ;;  %v3167_v1 = vld [vmem:[%s8536_s11 + $0x170] sm:$0xff] }
 0x4fb   : > { %v3052_v5 = vpop.f32.mrb[115].mxu0  ;;  %6282 = vmatpush3.bf16.msra.mxu0 %v6279_v2  ;;  %3334 = vmatprep.mubr.f32.mxu1 %v3125_v3  ;;  %v3165_v2 = vld [vmem:[%s8536_s11 + $0x160] sm:$0xff]  ;;  %v3166_v3 = vld [vmem:[%s8536_s11 + $0x168] sm:$0xff] }
 0x4fc   : > { %v6283_v7 = vpack.c.bf16 %v5960_v4, %v3052_v5  ;;  %v3168_v4 = vld [vmem:[%s8536_s11 + $0x178] sm:$0xff]  ;;  %v3572_v5 = vld [vmem:[%s8542_s17 + $0x8] sm:$0xff] }
 0x4fe   : > { %v5963_v8 = vpop.f32.mrb[116].mxu0  ;;  %3335 = vmatmul.mubr.f32.gmra.mrb[114].mxu1 %v3124_v6  ;;  %6284 = vmatprep.subr.bf16.mxu0 %v6283_v7  ;;  %v3574_v6 = vld [vmem:[%s8542_s17 + $0x18] sm:$0xff] }
 0x4ff   : > { %v3062_v9 = vpop.f32.mrb[117].mxu0  ;;  %6286 = vmatpush3.bf16.msra.mxu0 %v6283_v7  ;;  %3339 = vmatprep.mubr.f32.mxu1 %v3128_v62  ;;  %v3765_v7 = vld [vmem:[%s8543_s18 + $0x8] sm:$0xff]  ;;  %v6311_v62 = vpack.c.bf16 %v3574_v6, %v3572_v5  ;;  %v3787_v5 = vld [vmem:[%s8543_s18 + $0xb8] sm:$0xff]  ;;  %v3591_v6 = vld [vmem:[%s8542_s17 + $0xa0] sm:$0xff] }
 0x500   : > { %v6287_v12 = vpack.c.bf16 %v5963_v8, %v3062_v9  ;;  %v3767_v8 = vld [vmem:[%s8543_s18 + $0x18] sm:$0xff]  ;;  %v3571_v9 = vld [vmem:[%s8542_s17] sm:$0xff] }
 0x502   : > { %v5966_v47 = vpop.f32.mrb[118].mxu0  ;;  %3340 = vmatmul.mubr.f32.gmra.mrb[116].mxu1 %v3127_v11  ;;  %6288 = vmatprep.subr.bf16.mxu0 %v6287_v12  ;;  %v3573_v11 = vld [vmem:[%s8542_s17 + $0x10] sm:$0xff] }
 0x503   : > { %v3072_v59 = vpop.f32.mrb[119].mxu0  ;;  %6290 = vmatpush3.bf16.msra.mxu0 %v6287_v12  ;;  %3344 = vmatprep.mubr.f32.mxu1 %v3131_v22  ;;  %v6343_v12 = vpack.c.bf16 %v3767_v8, %v3765_v7  ;;  %v6313_v22 = vpack.c.bf16 %v3573_v11, %v3571_v9  ;;  %v3593_v7 = vld [vmem:[%s8542_s17 + $0xb0] sm:$0xff]  ;;  %v3784_v9 = vld [vmem:[%s8543_s18 + $0xa0] sm:$0xff] }
 0x504   : > { %v6291_v10 = vpack.c.bf16 %v5966_v47, %v3072_v59  ;;  %v3764_v47 = vld [vmem:[%s8543_s18] sm:$0xff]  ;;  %v3766_v59 = vld [vmem:[%s8543_s18 + $0x10] sm:$0xff]  ;;  %v6333_v8 = vpack.c.bf16 %v3593_v7, %v3591_v6 }
 0x505   : > { %6344 = vmatprep.subr.bf16.mxu1 %v6343_v12  ;;  %v3786_v11 = vld [vmem:[%s8543_s18 + $0xb0] sm:$0xff] }
 0x506   : > { %v5969_v14 = vpop.f32.mrb[120].mxu0  ;;  %3345 = vmatmul.mubr.f32.gmra.mrb[118].mxu1 %v3130_v0  ;;  %6292 = vmatprep.subr.bf16.mxu0 %v6291_v10  ;;  %v6345_v0 = vpack.c.bf16 %v3766_v59, %v3764_v47  ;;  %v6365_v12 = vpack.c.bf16 %v3786_v11, %v3784_v9  ;;  %v3598_v47 = vld [vmem:[%s8542_s17 + $0xd8] sm:$0xff]  ;;  %v3789_v59 = vld [vmem:[%s8543_s18 + $0xc8] sm:$0xff] }
 0x507   : > { %v3082_v15 = vpop.f32.mrb[121].mxu0  ;;  %6294 = vmatpush3.bf16.msra.mxu0 %v6291_v10  ;;  %3349 = vmatprep.mubr.f32.mxu1 %v3134_v13  ;;  %v3576_v10 = vld [vmem:[%s8542_s17 + $0x28] sm:$0xff]  ;;  %v3578_v13 = vld [vmem:[%s8542_s17 + $0x38] sm:$0xff] }
 0x508   : > { %v6295_v17 = vpack.c.bf16 %v5969_v14, %v3082_v15  ;;  %v3769_v14 = vld [vmem:[%s8543_s18 + $0x28] sm:$0xff]  ;;  %6346 = vmatpush1.bf16.msra.mxu1 %v6345_v0  ;;  %v6315_v15 = vpack.c.bf16 %v3578_v13, %v3576_v10  ;;  %v3791_v10 = vld [vmem:[%s8543_s18 + $0xd8] sm:$0xff]  ;;  %v3595_v13 = vld [vmem:[%s8542_s17 + $0xc0] sm:$0xff] }
 0x50a   : > { %v5972_v19 = vpop.f32.mrb[122].mxu0  ;;  %3350 = vmatmul.mubr.f32.gmra.mrb[120].mxu1 %v3133_v16  ;;  %6296 = vmatprep.subr.bf16.mxu0 %v6295_v17  ;;  %v3771_v16 = vld [vmem:[%s8543_s18 + $0x38] sm:$0xff] }
 0x50b   : > { %v3092_v20 = vpop.f32.mrb[123].mxu0  ;;  %6298 = vmatpush3.bf16.msra.mxu0 %v6295_v17  ;;  %3354 = vmatprep.mubr.f32.mxu1 %v3137_v18  ;;  %v3575_v17 = vld [vmem:[%s8542_s17 + $0x20] sm:$0xff]  ;;  %v3577_v18 = vld [vmem:[%s8542_s17 + $0x30] sm:$0xff] }
 0x50c   : > { %v6299_v23 = vpack.c.bf16 %v5972_v19, %v3092_v20  ;;  %v6347_v19 = vpack.c.bf16 %v3771_v16, %v3769_v14  ;;  %v6317_v20 = vpack.c.bf16 %v3577_v18, %v3575_v17  ;;  %v3597_v14 = vld [vmem:[%s8542_s17 + $0xd0] sm:$0xff]  ;;  %v3788_v17 = vld [vmem:[%s8543_s18 + $0xc0] sm:$0xff] }
 0x50d   : > { %v6337_v16 = vpack.c.bf16 %v3597_v14, %v3595_v13  ;;  %v3790_v18 = vld [vmem:[%s8543_s18 + $0xd0] sm:$0xff] }
 0x50e   : > { %v5975_v25 = vpop.f32.mrb[124].mxu0  ;;  %3355 = vmatmul.mubr.f32.gmra.mrb[122].mxu1 %v3136_v21  ;;  %6300 = vmatprep.subr.bf16.mxu0 %v6299_v23  ;;  %v3768_v21 = vld [vmem:[%s8543_s18 + $0x20] sm:$0xff] }
 0x50f   : > { %v3102_v27 = vpop.f32.mrb[125].mxu0  ;;  %6302 = vmatpush3.bf16.msra.mxu0 %v6299_v23  ;;  %3359 = vmatprep.mubr.f32.mxu1 %v3140_v24  ;;  %v3770_v23 = vld [vmem:[%s8543_s18 + $0x30] sm:$0xff] }
 0x510   : > { %v6303_v29 = vpack.c.bf16 %v5975_v25, %v3102_v27  ;;  %v6349_v24 = vpack.c.bf16 %v3770_v23, %v3768_v21  ;;  %6348 = vmatprep.subr.bf16.mxu1 %v6347_v19  ;;  %v3580_v25 = vld [vmem:[%s8542_s17 + $0x48] sm:$0xff]  ;;  %v3582_v27 = vld [vmem:[%s8542_s17 + $0x58] sm:$0xff]  ;;  %v6369_v19 = vpack.c.bf16 %v3790_v18, %v3788_v17 }
 0x511   : > { %v3602_v21 = vld [vmem:[%s8542_s17 + $0xf8] sm:$0xff]  ;;  %v3793_v23 = vld [vmem:[%s8543_s18 + $0xe8] sm:$0xff] }
 0x512   : > { %v5978_v31 = vpop.f32.mrb[126].mxu0  ;;  %3360 = vmatmul.mubr.f32.gmra.mrb[124].mxu1 %v3139_v28  ;;  %6304 = vmatprep.subr.bf16.mxu0 %v6303_v29  ;;  %v3773_v28 = vld [vmem:[%s8543_s18 + $0x48] sm:$0xff] }
 0x513   : > { %v3112_v32 = vpop.f32.mrb[127].mxu0  ;;  %6306 = vmatpush3.bf16.msra.mxu0 %v6303_v29  ;;  %3364 = vmatprep.mubr.f32.mxu1 %v3143_v30  ;;  %v6319_v29 = vpack.c.bf16 %v3582_v27, %v3580_v25  ;;  %v3775_v30 = vld [vmem:[%s8543_s18 + $0x58] sm:$0xff]  ;;  %v3599_v27 = vld [vmem:[%s8542_s17 + $0xe0] sm:$0xff] }
 0x514   : > { %v6307_v34 = vpack.c.bf16 %v5978_v31, %v3112_v32  ;;  %6350 = vmatpush1.bf16.msra.mxu1 %v6349_v24  ;;  %v3579_v31 = vld [vmem:[%s8542_s17 + $0x40] sm:$0xff]  ;;  %v3581_v32 = vld [vmem:[%s8542_s17 + $0x50] sm:$0xff]  ;;  %v3795_v25 = vld [vmem:[%s8543_s18 + $0xf8] sm:$0xff] }
 0x516   : > { %3365 = vmatmul.mubr.f32.gmra.mrb[126].mxu1 %v3142_v33  ;;  %6308 = vmatprep.subr.bf16.mxu0 %v6307_v34  ;;  %v6351_v33 = vpack.c.bf16 %v3775_v30, %v3773_v28  ;;  %v3601_v28 = vld [vmem:[%s8542_s17 + $0xf0] sm:$0xff] }
 0x517   : > { %6310 = vmatpush3.bf16.msra.mxu0 %v6307_v34  ;;  %3369 = vmatprep.mubr.f32.mxu1 %v3146_v36  ;;  %v6321_v34 = vpack.c.bf16 %v3581_v32, %v3579_v31  ;;  %v3772_v36 = vld [vmem:[%s8543_s18 + $0x40] sm:$0xff]  ;;  %v6341_v30 = vpack.c.bf16 %v3601_v28, %v3599_v27  ;;  %v3794_v32 = vld [vmem:[%s8543_s18 + $0xf0] sm:$0xff] }
 0x518   : > { %6312 = vmatprep.subr.bf16.mxu0 %v6311_v62  ;;  %6352 = vmatprep.subr.bf16.mxu1 %v6351_v33  ;;  %v3792_v31 = vld [vmem:[%s8543_s18 + $0xe0] sm:$0xff] }
 0x519   : > { %v6373_v33 = vpack.c.bf16 %v3794_v32, %v3792_v31  ;;  %v3963_v31 = vld [vmem:[%s8544_s19 + $0x30] sm:$0xff] }
 0x51a   : > { %3370 = vmatmul.mubr.f32.gmra.mrb[128].mxu1 %v3145_v37  ;;  %6012 = vmatmul.mubr.f32.vlgmr.msra.gmra.mrb[128].mxu0 %v3126_v38  ;;  %v3774_v37 = vld [vmem:[%s8543_s18 + $0x50] sm:$0xff] }
 0x51b   : > { %3374 = vmatprep.mubr.f32.mxu1 %v3149_v41  ;;  %6014 = vmatprep.mubr.f32.mxu0 %v3129_v42  ;;  %v6353_v38 = vpack.c.bf16 %v3774_v37, %v3772_v36  ;;  %v3584_v41 = vld [vmem:[%s8542_s17 + $0x68] sm:$0xff]  ;;  %v3586_v42 = vld [vmem:[%s8542_s17 + $0x78] sm:$0xff] }
 0x51c   : > { %6314 = vmatpush1.bf16.msra.mxu0 %v6313_v22  ;;  %v3596_v22 = vld [vmem:[%s8542_s17 + $0xc8] sm:$0xff]  ;;  %v3960_v37 = vld [vmem:[%s8544_s19 + $0x18] sm:$0xff] }
 0x51d   : > { %6316 = vmatprep.subr.bf16.mxu0 %v6315_v15  ;;  %6354 = vmatpush1.bf16.msra.mxu1 %v6353_v38  ;;  %v6335_v0 = vpack.c.bf16 %v3598_v47, %v3596_v22  ;;  %v6367_v15 = vpack.c.bf16 %v3791_v10, %v3789_v59  ;;  %v3958_v36 = vld [vmem:[%s8544_s19 + $0x8] sm:$0xff]  ;;  %v3959_v10 = vld [vmem:[%s8544_s19 + $0x10] sm:$0xff] }
 0x51e   : > { %3375 = vmatmul.mubr.f32.gmra.mrb[130].mxu1 %v3148_v43  ;;  %6015 = vmatmul.mubr.f32.gmra.mrb[130].mxu0 %v3132_v44  ;;  %v3777_v43 = vld [vmem:[%s8543_s18 + $0x68] sm:$0xff]  ;;  %v6323_v44 = vpack.c.bf16 %v3586_v42, %v3584_v41  ;;  %v6375_v38 = vpack.c.bf16 %v3960_v37, %v3958_v36  ;;  %v3968_v37 = vld [vmem:[%s8544_s19 + $0x58] sm:$0xff] }
 0x51f   : > { %3379 = vmatprep.mubr.f32.mxu1 %v3152_v45  ;;  %6017 = vmatprep.mubr.f32.mxu0 %v3135_v46  ;;  %v3779_v45 = vld [vmem:[%s8543_s18 + $0x78] sm:$0xff]  ;;  %v3583_v46 = vld [vmem:[%s8542_s17 + $0x60] sm:$0xff]  ;;  %v3966_v36 = vld [vmem:[%s8544_s19 + $0x48] sm:$0xff] }
 0x520   : > { %6318 = vmatpush1.bf16.msra.mxu0 %v6317_v20  ;;  %v3600_v20 = vld [vmem:[%s8542_s17 + $0xe8] sm:$0xff] }
 0x521   : > { %6320 = vmatprep.subr.bf16.mxu0 %v6319_v29  ;;  %v6339_v24 = vpack.c.bf16 %v3602_v21, %v3600_v20  ;;  %v6371_v29 = vpack.c.bf16 %v3795_v25, %v3793_v23 }
 0x522   : > { %3380 = vmatmul.mubr.f32.gmra.mrb[132].mxu1 %v3151_v40  ;;  %6018 = vmatmul.mubr.f32.gmra.mrb[132].mxu0 %v3138_v48  ;;  %v3585_v40 = vld [vmem:[%s8542_s17 + $0x70] sm:$0xff]  ;;  %v6355_v48 = vpack.c.bf16 %v3779_v45, %v3777_v43 }
 0x523   : > { %3384 = vmatprep.mubr.f32.mxu1 %v3155_v26  ;;  %6020 = vmatprep.mubr.f32.mxu0 %v3141_v35  ;;  %v6325_v26 = vpack.c.bf16 %v3585_v40, %v3583_v46  ;;  %v3776_v35 = vld [vmem:[%s8543_s18 + $0x60] sm:$0xff] }
 0x524   : > { %6322 = vmatpush1.bf16.msra.mxu0 %v6321_v34  ;;  %6356 = vmatprep.subr.bf16.mxu1 %v6355_v48  ;;  %v6620_v34 = vmov 0.0  }
 0x525   : > { %6324 = vmatprep.subr.bf16.mxu0 %v6323_v44 }
 0x526   : > { %3385 = vmatmul.mubr.f32.gmra.mrb[134].mxu1 %v3154_v39  ;;  %6021 = vmatmul.mubr.f32.gmra.mrb[134].mxu0 %v3144_v49  ;;  %v3778_v39 = vld [vmem:[%s8543_s18 + $0x70] sm:$0xff] }
 0x527   : > { %3389 = vmatprep.mubr.f32.mxu1 %v3158_v50  ;;  %6023 = vmatprep.mubr.f32.mxu0 %v3147_v51  ;;  %v6357_v49 = vpack.c.bf16 %v3778_v39, %v3776_v35  ;;  %v3588_v50 = vld [vmem:[%s8542_s17 + $0x88] sm:$0xff]  ;;  %v3590_v51 = vld [vmem:[%s8542_s17 + $0x98] sm:$0xff]  ;;  %v3188_v35 = vpop.permute.xlu0 %3187 }
 0x528   : > { %6326 = vmatpush1.bf16.msra.mxu0 %v6325_v26 }
 0x529   : > { %6358 = vmatpush1.bf16.msra.mxu1 %v6357_v49  ;;  %v3193_v49 = vpop.permute.xlu1 %3192 }
 0x52a   : > { %3390 = vmatmul.mubr.f32.gmra.mrb[136].mxu1 %v3157_v52  ;;  %6024 = vmatmul.mubr.f32.gmra.mrb[136].mxu0 %v3150_v53  ;;  %v3781_v52 = vld [vmem:[%s8543_s18 + $0x88] sm:$0xff]  ;;  %v6327_v53 = vpack.c.bf16 %v3590_v51, %v3588_v50 }
 0x52b   : > { %3394 = vmatprep.mubr.f32.mxu1 %v3161_v54  ;;  %6026 = vmatprep.mubr.f32.mxu0 %v3153_v55  ;;  %v3783_v54 = vld [vmem:[%s8543_s18 + $0x98] sm:$0xff]  ;;  %v3587_v55 = vld [vmem:[%s8542_s17 + $0x80] sm:$0xff] }
 0x52c   : > { %6328 = vmatprep.subr.bf16.mxu0 %v6327_v53  ;;  %v3198_v53 = vpop.permute.xlu0 %3197 }
 0x52e   : > { %3395 = vmatmul.mubr.f32.gmra.mrb[138].mxu1 %v3160_v56  ;;  %6027 = vmatmul.mubr.f32.gmra.mrb[138].mxu0 %v3156_v57  ;;  %v3589_v56 = vld [vmem:[%s8542_s17 + $0x90] sm:$0xff]  ;;  %v6359_v57 = vpack.c.bf16 %v3783_v54, %v3781_v52 }
 0x52f   : > { %3399 = vmatprep.mubr.f32.mxu1 %v3164_v58  ;;  %6029 = vmatprep.mubr.f32.mxu0 %v3159_v60  ;;  %v6329_v58 = vpack.c.bf16 %v3589_v56, %v3587_v55  ;;  %v3780_v60 = vld [vmem:[%s8543_s18 + $0x80] sm:$0xff]  ;;  %v3203_v56 = vpop.permute.xlu1 %3202 }
 0x530   : > { %6360 = vmatprep.subr.bf16.mxu1 %v6359_v57 }
 0x531   : > { %6330 = vmatpush1.bf16.msra.mxu0 %v6329_v58 }
 0x532   : > { %3400 = vmatmul.mubr.f32.gmra.mrb[140].mxu1 %v3163_v61  ;;  %6030 = vmatmul.mubr.f32.gmra.mrb[140].mxu0 %v3162_v63  ;;  %v3782_v61 = vld [vmem:[%s8543_s18 + $0x90] sm:$0xff] }
 0x533   : > { %3404 = vmatprep.mubr.f32.mxu1 %v3167_v1  ;;  %6032 = vmatprep.mubr.f32.mxu0 %v3165_v2  ;;  %v6361_v63 = vpack.c.bf16 %v3782_v61, %v3780_v60  ;;  %v3592_v1 = vld [vmem:[%s8542_s17 + $0xa8] sm:$0xff]  ;;  %v3594_v2 = vld [vmem:[%s8542_s17 + $0xb8] sm:$0xff]  ;;  %v3208_v61 = vpop.permute.xlu0 %3207 }
 0x535   : > { %6362 = vmatpush1.bf16.msra.mxu1 %v6361_v63 }
 0x536   : > { %3405 = vmatmul.mubr.f32.gmra.mrb[142].mxu1 %v3166_v3  ;;  %6033 = vmatmul.mubr.f32.gmra.mrb[142].mxu0 %v3168_v4  ;;  %v3785_v3 = vld [vmem:[%s8543_s18 + $0xa8] sm:$0xff]  ;;  %v6331_v4 = vpack.c.bf16 %v3594_v2, %v3592_v1  ;;  %v3213_v1 = vpop.permute.xlu1 %3212 }
 0x537   : > { %v6363_v62 = vpack.c.bf16 %v3787_v5, %v3785_v3  ;;  %3667 = vmatprep.mubr.f32.mxu0 %v6620_v34  ;;  %3860 = vmatprep.mubr.f32.mxu1 %v6620_v34  ;;  %v7992_v5 = vpop.permute.xlu0 %3217 }
 0x538   : > { %6332 = vmatprep.subr.bf16.mxu0 %v6331_v4 }
 0x539   : > { %6364 = vmatprep.subr.bf16.mxu1 %v6363_v62  ;;  %6334 = vmatpush1.bf16.msra.mxu0 %v6333_v8 }
 0x53a   : > { %6366 = vmatpush1.bf16.msra.mxu1 %v6365_v12  ;;  %6336 = vmatprep.subr.bf16.mxu0 %v6335_v0  ;;  %v3223_v62 = vpop.permute.xlu1 %3222  ;;  %v3957_v0 = vld [vmem:[%s8544_s19] sm:$0xff] }
 0x53b   : > { %6368 = vmatprep.subr.bf16.mxu1 %v6367_v15  ;;  %v3962_v15 = vld [vmem:[%s8544_s19 + $0x28] sm:$0xff]  ;;  %v8008_v17 = vpop.permute.xlu0 %3227 }
 0x53d   : > { %6338 = vmatpush1.bf16.msra.mxu0 %v6337_v16  ;;  %v3964_v16 = vld [vmem:[%s8544_s19 + $0x38] sm:$0xff] }
 0x53e   : > { %6370 = vmatpush1.bf16.msra.mxu1 %v6369_v19  ;;  %6340 = vmatprep.subr.bf16.mxu0 %v6339_v24  ;;  %v6377_v24 = vpack.c.bf16 %v3959_v10, %v3957_v0 }
 0x53f   : > { %6372 = vmatprep.subr.bf16.mxu1 %v6371_v29  ;;  %v6379_v29 = vpack.c.bf16 %v3964_v16, %v3962_v15 }
 0x541   : > { %6342 = vmatpush1.bf16.msra.mxu0 %v6341_v30  ;;  %v3961_v30 = vld [vmem:[%s8544_s19 + $0x20] sm:$0xff] }
 0x542   : > { %6374 = vmatpush1.bf16.msra.mxu1 %v6373_v33  ;;  %6376 = vmatprep.subr.bf16.mxu0 %v6375_v38  ;;  %v3233_v38 = vpop.permute.xlu1 %3232 }
 0x5cd   : > { %v5487_v41 = vpop.f32.mrb[112].mxu1 }
 0x5ce   : > { %v5488_v42 = vpop.f32.mrb[113].mxu1 }
 0x5cf   : > { %v5489_v43 = vadd.f32 %v5488_v42, %v5487_v41 }
 0x5d1   : > { %v5490_v44 = vpop.f32.mrb[114].mxu1  ;;  %v3332_v12 = vadd.f32 %v5489_v43, %v3188_v35  ;;  %v6383_v35 = vpack.c.bf16 %v3968_v37, %v3966_v36 }
 0x5d2   : > { %v5491_v45 = vpop.f32.mrb[115].mxu1 }
 0x5d3   : > { %v5492_v46 = vadd.f32 %v5491_v45, %v5490_v44 }
 0x5d5   : > { %v5493_v40 = vpop.f32.mrb[116].mxu1  ;;  %v3337_v8 = vadd.f32 %v5492_v46, %v3193_v49  ;;  %v6381_v46 = vpack.c.bf16 %v3963_v31, %v3961_v30  ;;  %v3967_v49 = vld [vmem:[%s8544_s19 + $0x50] sm:$0xff] }
 0x5d6   : > { %v5494_v48 = vpop.f32.mrb[117].mxu1 }
 0x5d7   : > { %v5495_v26 = vadd.f32 %v5494_v48, %v5493_v40 }
 0x5d9   : > { %v5496_v39 = vpop.f32.mrb[118].mxu1  ;;  %v3342_v23 = vadd.f32 %v5495_v26, %v3198_v53  ;;  %v3972_v53 = vld [vmem:[%s8544_s19 + $0x78] sm:$0xff] }
 0x5da   : > { %v5497_v50 = vpop.f32.mrb[119].mxu1 }
 0x5db   : > { %v5498_v51 = vadd.f32 %v5497_v50, %v5496_v39  ;;  %v3965_v39 = vld [vmem:[%s8544_s19 + $0x40] sm:$0xff] }
 0x5dd   : > { %v5499_v52 = vpop.f32.mrb[120].mxu1  ;;  %v3347_v18 = vadd.f32 %v5498_v51, %v3203_v56 }
 0x5de   : > { %v5500_v54 = vpop.f32.mrb[121].mxu1 }
 0x5df   : > { %v5501_v55 = vadd.f32 %v5500_v54, %v5499_v52  ;;  %v3970_v52 = vld [vmem:[%s8544_s19 + $0x68] sm:$0xff]  ;;  %v3238_v54 = vpop.permute.xlu0 %3237 }
 0x5e1   : > { %v5502_v57 = vpop.f32.mrb[122].mxu1  ;;  %v3352_v45 = vadd.f32 %v5501_v55, %v3208_v61  ;;  %v6385_v61 = vpack.c.bf16 %v3967_v49, %v3965_v39 }
 0x5e2   : > { %v5503_v58 = vpop.f32.mrb[123].mxu1 }
 0x5e3   : > { %v5504_v60 = vadd.f32 %v5503_v58, %v5502_v57 }
 0x5e5   : > { %v5505_v63 = vpop.f32.mrb[124].mxu1  ;;  %v3357_v41 = vadd.f32 %v5504_v60, %v3213_v1 }
 0x5e6   : > { %v5506_v2 = vpop.f32.mrb[125].mxu1 }
 0x5e7   : > { %v7990_v3 = vadd.f32 %v5506_v2, %v5505_v63 }
 0x5e9   : > { %v5508_v4 = vpop.f32.mrb[126].mxu1  ;;  %v3362_v60 = vadd.f32 %v7990_v3, %v7992_v5  ;;  %v3974_v3 = vld [vmem:[%s8544_s19 + $0x88] sm:$0xff]  ;;  %v3976_v5 = vld [vmem:[%s8544_s19 + $0x98] sm:$0xff] }
 0x5ea   : > { %v5509_v6 = vpop.f32.mrb[127].mxu1  ;;  %v6391_v16 = vpack.c.bf16 %v3976_v5, %v3974_v3 }
 0x5eb   : > { %v5510_v7 = vadd.f32 %v5509_v6, %v5508_v4  ;;  %v6387_v4 = vpack.c.bf16 %v3972_v53, %v3970_v52  ;;  %v3969_v6 = vld [vmem:[%s8544_s19 + $0x60] sm:$0xff] }
 0x5ed   : > { %v5511_v9 = vpop.f32.mrb[128].mxu1  ;;  %v6013_v11 = vpop.f32.mrb[128].mxu0  ;;  %v3367_v55 = vadd.f32 %v5510_v7, %v3223_v62  ;;  %v3971_v7 = vld [vmem:[%s8544_s19 + $0x70] sm:$0xff] }
 0x5ee   : > { %v3482_v22 = vadd.f32 %v6013_v11, %v3337_v8  ;;  %v5512_v47 = vpop.f32.mrb[129].mxu1  ;;  %v3476_v59 = vpop.f32.mrb[129].mxu0  ;;  %v6389_v0 = vpack.c.bf16 %v3971_v7, %v3969_v6 }
 0x5ef   : > { %v8000_v13 = vadd.f32 %v5512_v47, %v5511_v9  ;;  %v3477_v14 = vadd.f32 %v3476_v59, %v3332_v12  ;;  %v3243_v9 = vpop.permute.xlu1 %3242 }
 0x5f0   : > { %v8028_v42 = vmax.f32 %v3482_v22, 0.0 }
 0x5f1   : > { %v8010_v19 = vmax.f32 %v3477_v14, 0.0  ;;  %v5514_v20 = vpop.f32.mrb[130].mxu1  ;;  %v6016_v21 = vpop.f32.mrb[130].mxu0  ;;  %v3372_v59 = vadd.f32 %v8000_v13, %v8008_v17  ;;  %v3978_v13 = vld [vmem:[%s8544_s19 + $0xa8] sm:$0xff]  ;;  %v3980_v17 = vld [vmem:[%s8544_s19 + $0xb8] sm:$0xff] }
 0x5f2   : > { %v3492_v25 = vadd.f32 %v6016_v21, %v3347_v18  ;;  %v5515_v27 = vpop.f32.mrb[131].mxu1  ;;  %v3486_v28 = vpop.f32.mrb[131].mxu0  ;;  %v3973_v18 = vld [vmem:[%s8544_s19 + $0x80] sm:$0xff]  ;;  %v6395_v37 = vpack.c.bf16 %v3980_v17, %v3978_v13 }
 0x5f3   : > { %v5516_v32 = vadd.f32 %v5515_v27, %v5514_v20  ;;  %v3487_v33 = vadd.f32 %v3486_v28, %v3342_v23  ;;  %3668 = vmatmul.mubr.f32.vlgmr.msra.gmra.mrb[144].mxu0 %v8010_v19  ;;  %3861 = vmatmul.mubr.f32.vlgmr.msra.gmra.mrb[144].mxu1 %v8010_v19  ;;  %v3975_v20 = vld [vmem:[%s8544_s19 + $0x90] sm:$0xff] }
 0x5f4   : > { %3673 = vmatprep.mubr.f32.mxu0 %v6620_v34  ;;  %3866 = vmatprep.mubr.f32.mxu1 %v6620_v34  ;;  %v8072_v12 = vmax.f32 %v3492_v25, 0.0  ;;  %v6393_v31 = vpack.c.bf16 %v3975_v20, %v3973_v18 }
 0x5f5   : > { %v5517_v43 = vpop.f32.mrb[132].mxu1  ;;  %v6019_v44 = vpop.f32.mrb[132].mxu0  ;;  %6378 = vmatpush1.bf16.msra.mxu0 %v6377_v24  ;;  %v8048_v56 = vmax.f32 %v3487_v33, 0.0  ;;  %v3377_v11 = vadd.f32 %v5516_v32, %v3233_v38  ;;  %v3977_v38 = vld [vmem:[%s8544_s19 + $0xa0] sm:$0xff] }
 0x5f6   : > { %v8030_v40 = vadd.f32 %v6019_v44, %v3357_v41  ;;  %v5518_v48 = vpop.f32.mrb[133].mxu1  ;;  %v3496_v26 = vpop.f32.mrb[133].mxu0  ;;  %6380 = vmatprep.subr.bf16.mxu0 %v6379_v29  ;;  %v3979_v41 = vld [vmem:[%s8544_s19 + $0xb0] sm:$0xff] }
 0x5f7   : > { %v5519_v50 = vadd.f32 %v5518_v48, %v5517_v43  ;;  %v3497_v51 = vadd.f32 %v3496_v26, %v3352_v45  ;;  %3674 = vmatmul.mubr.f32.gmra.mrb[146].mxu0 %v8028_v42  ;;  %3867 = vmatmul.mubr.f32.gmra.mrb[146].mxu1 %v8028_v42  ;;  %v3248_v24 = vpop.permute.xlu0 %3247  ;;  %v3982_v45 = vld [vmem:[%s8544_s19 + $0xc8] sm:$0xff]  ;;  %v3253_v48 = vpop.permute.xlu1 %3252 }
 0x5f8   : > { %3679 = vmatprep.mubr.f32.mxu0 %v6620_v34  ;;  %3872 = vmatprep.mubr.f32.mxu1 %v6620_v34  ;;  %v8119_v26 = vmax.f32 %v8030_v40, 0.0 }
 0x5f9   : > { %v5520_v57 = vpop.f32.mrb[134].mxu1  ;;  %v6022_v58 = vpop.f32.mrb[134].mxu0  ;;  %6382 = vmatpush1.bf16.msra.mxu0 %v6381_v46  ;;  %v8096_v27 = vmax.f32 %v3497_v51, 0.0  ;;  %v3382_v30 = vadd.f32 %v5519_v50, %v3238_v54  ;;  %v3984_v46 = vld [vmem:[%s8544_s19 + $0xd8] sm:$0xff]  ;;  %v6397_v51 = vpack.c.bf16 %v3979_v41, %v3977_v38 }
 0x5fa   : > { %v8052_v63 = vadd.f32 %v6022_v58, %v3367_v55  ;;  %v5521_v1 = vpop.f32.mrb[135].mxu1  ;;  %v3506_v2 = vpop.f32.mrb[135].mxu0  ;;  %6384 = vmatprep.subr.bf16.mxu0 %v6383_v35  ;;  %v6399_v54 = vpack.c.bf16 %v3984_v46, %v3982_v45  ;;  %v3981_v55 = vld [vmem:[%s8544_s19 + $0xc0] sm:$0xff] }
 0x5fb   : > { %v5522_v62 = vadd.f32 %v5521_v1, %v5520_v57  ;;  %v8060_v8 = vadd.f32 %v3506_v2, %v3362_v60  ;;  %3680 = vmatmul.mubr.f32.gmra.mrb[148].mxu0 %v8048_v56  ;;  %3873 = vmatmul.mubr.f32.gmra.mrb[148].mxu1 %v8048_v56  ;;  %v3983_v57 = vld [vmem:[%s8544_s19 + $0xd0] sm:$0xff]  ;;  %v3988_v1 = vld [vmem:[%s8544_s19 + $0xf8] sm:$0xff]  ;;  %v3258_v2 = vpop.permute.xlu0 %3257 }
 0x5fc   : > { %3685 = vmatprep.mubr.f32.mxu0 %v6620_v34  ;;  %3878 = vmatprep.mubr.f32.mxu1 %v6620_v34  ;;  %v6401_v3 = vpack.c.bf16 %v3983_v57, %v3981_v55 }
 0x5fd   : > { %v5523_v22 = vpop.f32.mrb[136].mxu1  ;;  %v6025_v47 = vpop.f32.mrb[136].mxu0  ;;  %6386 = vmatpush1.bf16.msra.mxu0 %v6385_v61  ;;  %v3387_v25 = vadd.f32 %v5522_v62, %v3243_v9  ;;  %v3986_v61 = vld [vmem:[%s8544_s19 + $0xe8] sm:$0xff] }
 0x5fe   : > { %v8076_v10 = vadd.f32 %v6025_v47, %v3377_v11  ;;  %v5524_v14 = vpop.f32.mrb[137].mxu1  ;;  %v3516_v15 = vpop.f32.mrb[137].mxu0  ;;  %6388 = vmatprep.subr.bf16.mxu0 %v6387_v4  ;;  %v8140_v4 = vmax.f32 %v8060_v8, 0.0  ;;  %v6403_v11 = vpack.c.bf16 %v3988_v1, %v3986_v61  ;;  %v3987_v47 = vld [vmem:[%s8544_s19 + $0xf0] sm:$0xff] }
 0x5ff   : > { %v5525_v21 = vadd.f32 %v5524_v14, %v5523_v22  ;;  %v8084_v23 = vadd.f32 %v3516_v15, %v3372_v59  ;;  %3686 = vmatmul.mubr.f32.gmra.mrb[150].mxu0 %v8072_v12  ;;  %3879 = vmatmul.mubr.f32.gmra.mrb[150].mxu1 %v8072_v12  ;;  %v3985_v22 = vld [vmem:[%s8544_s19 + $0xe0] sm:$0xff]  ;;  %v8153_v14 = vmax.f32 %v8052_v63, 0.0 }
 0x600   : > { %3691 = vmatprep.mubr.f32.mxu0 %v6620_v34  ;;  %3884 = vmatprep.mubr.f32.mxu1 %v6620_v34  ;;  %v3564_v63 = vmax.f32 %v8076_v10, 0.0 }
 0x601   : > { %v5526_v28 = vpop.f32.mrb[138].mxu1  ;;  %v6028_v29 = vpop.f32.mrb[138].mxu0  ;;  %6390 = vmatpush1.bf16.msra.mxu0 %v6389_v0  ;;  %v3392_v50 = vadd.f32 %v5525_v21, %v3248_v24  ;;  %v3563_v20 = vmax.f32 %v8084_v23, 0.0 }
 0x602   : > { %v8098_v32 = vadd.f32 %v6028_v29, %v3387_v25  ;;  %v5527_v33 = vpop.f32.mrb[139].mxu1  ;;  %v3526_v36 = vpop.f32.mrb[139].mxu0  ;;  %6392 = vmatprep.subr.bf16.mxu0 %v6391_v16  ;;  %v6405_v16 = vpack.c.bf16 %v3987_v47, %v3985_v22 }
 0x603   : > { %v5528_v43 = vadd.f32 %v5527_v33, %v5526_v28  ;;  %v8106_v44 = vadd.f32 %v3526_v36, %v3382_v30  ;;  %3692 = vmatmul.mubr.f32.gmra.mrb[152].mxu0 %v8096_v27  ;;  %3885 = vmatmul.mubr.f32.gmra.mrb[152].mxu1 %v8096_v27  ;;  %v3263_v0 = vpop.permute.xlu1 %3262 }
 0x604   : > { %3697 = vmatprep.mubr.f32.mxu0 %v6620_v34  ;;  %3890 = vmatprep.mubr.f32.mxu1 %v6620_v34  ;;  %v3566_v23 = vmax.f32 %v8098_v32, 0.0 }
 0x605   : > { %v5529_v35 = vpop.f32.mrb[140].mxu1  ;;  %v3397_v39 = vadd.f32 %v5528_v43, %v3253_v48  ;;  %v6031_v49 = vpop.f32.mrb[140].mxu0  ;;  %6394 = vmatpush1.bf16.msra.mxu0 %v6393_v31  ;;  %v3565_v21 = vmax.f32 %v8106_v44, 0.0 }
 0x606   : > { %v5530_v52 = vpop.f32.mrb[141].mxu1  ;;  %v3536_v53 = vpop.f32.mrb[141].mxu0  ;;  %6396 = vmatprep.subr.bf16.mxu0 %v6395_v37 }
 0x607   : > { %v8127_v40 = vadd.f32 %v6031_v49, %v3397_v39  ;;  %v5531_v58 = vadd.f32 %v5530_v52, %v5529_v35  ;;  %v3537_v60 = vadd.f32 %v3536_v53, %v3392_v50  ;;  %3698 = vmatmul.mubr.f32.gmra.mrb[154].mxu0 %v8119_v26  ;;  %3891 = vmatmul.mubr.f32.gmra.mrb[154].mxu1 %v8119_v26 }
 0x608   : > { %3703 = vmatprep.mubr.f32.mxu0 %v6620_v34  ;;  %3896 = vmatprep.mubr.f32.mxu1 %v6620_v34 }
 0x609   : > { %v5532_v6 = vpop.f32.mrb[142].mxu1  ;;  %v6034_v7 = vpop.f32.mrb[142].mxu0  ;;  %v3402_v62 = vadd.f32 %v5531_v58, %v3258_v2  ;;  %6398 = vmatpush1.bf16.msra.mxu0 %v6397_v51  ;;  %v3567_v10 = vmax.f32 %v3537_v60, 0.0  ;;  %v3568_v13 = vmax.f32 %v8127_v40, 0.0 }
 0x60a   : > { %v5533_v5 = vpop.f32.mrb[143].mxu1  ;;  %v3546_v9 = vpop.f32.mrb[143].mxu0  ;;  %6400 = vmatprep.subr.bf16.mxu0 %v6399_v54 }
 0x60b   : > { %v5534_v59 = vadd.f32 %v5533_v5, %v5532_v6  ;;  %v3547_v8 = vadd.f32 %v3546_v9, %v3402_v62  ;;  %3704 = vmatmul.mubr.f32.gmra.mrb[156].mxu0 %v8140_v4  ;;  %3897 = vmatmul.mubr.f32.gmra.mrb[156].mxu1 %v8140_v4 }
 0x60c   : > { %3709 = vmatprep.mubr.f32.mxu0 %v6620_v34  ;;  %3902 = vmatprep.mubr.f32.mxu1 %v6620_v34 }
 0x60d   : > { %v3407_v15 = vadd.f32 %v5534_v59, %v3263_v0  ;;  %6402 = vmatpush1.bf16.msra.mxu0 %v6401_v3  ;;  %v3569_v17 = vmax.f32 %v3547_v8, 0.0 }
 0x60e   : > { %6404 = vmatprep.subr.bf16.mxu0 %v6403_v11 }
 0x60f   : > { %3710 = vmatmul.mubr.f32.gmra.mrb[158].mxu0 %v8153_v14  ;;  %3903 = vmatmul.mubr.f32.gmra.mrb[158].mxu1 %v8153_v14  ;;  %v3552_v18 = vadd.f32 %v6034_v7, %v3407_v15 }
 0x610   : > { %3715 = vmatprep.mubr.f32.mxu0 %v6620_v34  ;;  %3908 = vmatprep.mubr.f32.mxu1 %v6620_v34 }
 0x611   : > { %6406 = vmatpush1.bf16.msra.mxu0 %v6405_v16  ;;  %v3570_v24 = vmax.f32 %v3552_v18, 0.0 }
 0x613   : > { %3716 = vmatmul.mubr.f32.gmra.mrb[160].mxu0 %v3563_v20  ;;  %3909 = vmatmul.mubr.f32.gmra.mrb[160].mxu1 %v3563_v20 }
 0x614   : > { %3721 = vmatprep.mubr.f32.mxu0 %v6620_v34  ;;  %3914 = vmatprep.mubr.f32.mxu1 %v6620_v34 }
 0x617   : > { %3722 = vmatmul.mubr.f32.gmra.mrb[162].mxu0 %v3564_v63  ;;  %3915 = vmatmul.mubr.f32.gmra.mrb[162].mxu1 %v3564_v63 }
 0x618   : > { %3727 = vmatprep.mubr.f32.mxu0 %v6620_v34  ;;  %3920 = vmatprep.mubr.f32.mxu1 %v6620_v34 }
 0x61b   : > { %3728 = vmatmul.mubr.f32.gmra.mrb[164].mxu0 %v3565_v21  ;;  %3921 = vmatmul.mubr.f32.gmra.mrb[164].mxu1 %v3565_v21 }
 0x61c   : > { %3733 = vmatprep.mubr.f32.mxu0 %v6620_v34  ;;  %3926 = vmatprep.mubr.f32.mxu1 %v6620_v34 }
 0x61f   : > { %3734 = vmatmul.mubr.f32.gmra.mrb[166].mxu0 %v3566_v23  ;;  %3927 = vmatmul.mubr.f32.gmra.mrb[166].mxu1 %v3566_v23 }
 0x620   : > { %3739 = vmatprep.mubr.f32.mxu0 %v6620_v34  ;;  %3932 = vmatprep.mubr.f32.mxu1 %v6620_v34 }
 0x623   : > { %3740 = vmatmul.mubr.f32.gmra.mrb[168].mxu0 %v3567_v10  ;;  %3933 = vmatmul.mubr.f32.gmra.mrb[168].mxu1 %v3567_v10 }
 0x624   : > { %3745 = vmatprep.mubr.f32.mxu0 %v6620_v34  ;;  %3938 = vmatprep.mubr.f32.mxu1 %v6620_v34 }
 0x627   : > { %3746 = vmatmul.mubr.f32.gmra.mrb[170].mxu0 %v3568_v13  ;;  %3939 = vmatmul.mubr.f32.gmra.mrb[170].mxu1 %v3568_v13 }
 0x628   : > { %3751 = vmatprep.mubr.f32.mxu0 %v6620_v34  ;;  %3944 = vmatprep.mubr.f32.mxu1 %v6620_v34 }
 0x62b   : > { %3752 = vmatmul.mubr.f32.gmra.mrb[172].mxu0 %v3569_v17  ;;  %3945 = vmatmul.mubr.f32.gmra.mrb[172].mxu1 %v3569_v17 }
 0x62c   : > { %3757 = vmatprep.mubr.f32.mxu0 %v6620_v34  ;;  %3950 = vmatprep.mubr.f32.mxu1 %v6620_v34 }
 0x62f   : > { %3758 = vmatmul.mubr.f32.gmra.mrb[174].mxu0 %v3570_v24  ;;  %3951 = vmatmul.mubr.f32.gmra.mrb[174].mxu1 %v3570_v24 }
 0x630   : > { %4053 = vmatprep.mubr.f32.mxu0 %v6620_v34 }
 0x633   : > { %4054 = vmatmul.mubr.f32.vlgmr.msra.gmra.mrb[176].mxu0 %v8010_v19  ;;  %v4151_v19 = vld [vmem:[%s8541_s16 + $0x8] sm:$0xff] }
 0x634   : > { %4059 = vmatprep.mubr.f32.mxu0 %v6620_v34  ;;  %4358 = vmatprep.mubr.f32.mxu1 %v4151_v19 }
 0x637   : > { %4060 = vmatmul.mubr.f32.gmra.mrb[178].mxu0 %v8028_v42 }
 0x638   : > { %4065 = vmatprep.mubr.f32.mxu0 %v6620_v34 }
 0x63b   : > { %4066 = vmatmul.mubr.f32.gmra.mrb[180].mxu0 %v8048_v56 }
 0x63c   : > { %4071 = vmatprep.mubr.f32.mxu0 %v6620_v34 }
 0x63f   : > { %4072 = vmatmul.mubr.f32.gmra.mrb[182].mxu0 %v8072_v12 }
 0x640   : > { %4077 = vmatprep.mubr.f32.mxu0 %v6620_v34 }
 0x643   : > { %4078 = vmatmul.mubr.f32.gmra.mrb[184].mxu0 %v8096_v27 }
 0x644   : > { %4083 = vmatprep.mubr.f32.mxu0 %v6620_v34 }
 0x647   : > { %4084 = vmatmul.mubr.f32.gmra.mrb[186].mxu0 %v8119_v26 }
 0x648   : > { %4089 = vmatprep.mubr.f32.mxu0 %v6620_v34 }
 0x64b   : > { %4090 = vmatmul.mubr.f32.gmra.mrb[188].mxu0 %v8140_v4 }
 0x64c   : > { %4095 = vmatprep.mubr.f32.mxu0 %v6620_v34 }
 0x64f   : > { %4096 = vmatmul.mubr.f32.gmra.mrb[190].mxu0 %v8153_v14 }
 0x650   : > { %4101 = vmatprep.mubr.f32.mxu0 %v6620_v34 }
 0x653   : > { %4102 = vmatmul.mubr.f32.gmra.mrb[192].mxu0 %v3563_v20 }
 0x654   : > { %4107 = vmatprep.mubr.f32.mxu0 %v6620_v34 }
 0x657   : > { %4108 = vmatmul.mubr.f32.gmra.mrb[194].mxu0 %v3564_v63 }
 0x658   : > { %4113 = vmatprep.mubr.f32.mxu0 %v6620_v34 }
 0x65b   : > { %4114 = vmatmul.mubr.f32.gmra.mrb[196].mxu0 %v3565_v21 }
 0x65c   : > { %4119 = vmatprep.mubr.f32.mxu0 %v6620_v34 }
 0x65f   : > { %4120 = vmatmul.mubr.f32.gmra.mrb[198].mxu0 %v3566_v23 }
 0x660   : > { %4125 = vmatprep.mubr.f32.mxu0 %v6620_v34 }
 0x663   : > { %4126 = vmatmul.mubr.f32.gmra.mrb[200].mxu0 %v3567_v10 }
 0x664   : > { %4131 = vmatprep.mubr.f32.mxu0 %v6620_v34 }
 0x667   : > { %4132 = vmatmul.mubr.f32.gmra.mrb[202].mxu0 %v3568_v13 }
 0x668   : > { %4137 = vmatprep.mubr.f32.mxu0 %v6620_v34 }
 0x66b   : > { %4138 = vmatmul.mubr.f32.gmra.mrb[204].mxu0 %v3569_v17 }
 0x66c   : > { %4143 = vmatprep.mubr.f32.mxu0 %v6620_v34 }
 0x66f   : > { %4144 = vmatmul.mubr.f32.gmra.mrb[206].mxu0 %v3570_v24 }
 0x670   : > { %4768 = vmatprep.mubr.f32.mxu0 %v6620_v34 }
 0x6c6   : > { %v3669_v42 = vpop.f32.mrb[144].mxu0  ;;  %v8206_v56 = vpop.f32.mrb[144].mxu1 }
 0x6c7   : > { %v3671_v12 = vpop.f32.mrb[145].mxu0  ;;  %v8208_v25 = vpop.f32.mrb[145].mxu1 }
 0x6ca   : > { %v3675_v27 = vpop.f32.mrb[146].mxu0  ;;  %v8210_v28 = vpop.f32.mrb[146].mxu1 }
 0x6cb   : > { %v6409_v29 = vpack.c.bf16 %v3675_v27, %v3669_v42  ;;  %v6441_v30 = vpack.c.bf16 %v8210_v28, %v8206_v56  ;;  %v3677_v31 = vpop.f32.mrb[147].mxu0  ;;  %v8214_v32 = vpop.f32.mrb[147].mxu1 }
 0x6cc   : > { %v6407_v33 = vpack.c.bf16 %v3677_v31, %v3671_v12  ;;  %v6439_v36 = vpack.c.bf16 %v8214_v32, %v8208_v25 }
 0x6ce   : > { %v3681_v37 = vpop.f32.mrb[148].mxu0  ;;  %v8218_v38 = vpop.f32.mrb[148].mxu1  ;;  %6408 = vmatprep.subr.bf16.mxu1 %v6407_v33 }
 0x6cf   : > { %v3683_v41 = vpop.f32.mrb[149].mxu0  ;;  %v8220_v43 = vpop.f32.mrb[149].mxu1  ;;  %6410 = vmatpush1.bf16.msra.mxu1 %v6409_v29 }
 0x6d2   : > { %v3687_v44 = vpop.f32.mrb[150].mxu0  ;;  %v8222_v45 = vpop.f32.mrb[150].mxu1 }
 0x6d3   : > { %v6413_v46 = vpack.c.bf16 %v3687_v44, %v3681_v37  ;;  %v6445_v48 = vpack.c.bf16 %v8222_v45, %v8218_v38  ;;  %v3689_v26 = vpop.f32.mrb[151].mxu0  ;;  %v8226_v35 = vpop.f32.mrb[151].mxu1 }
 0x6d4   : > { %v6411_v39 = vpack.c.bf16 %v3689_v26, %v3683_v41  ;;  %v6443_v49 = vpack.c.bf16 %v8226_v35, %v8220_v43 }
 0x6d6   : > { %v3693_v50 = vpop.f32.mrb[152].mxu0  ;;  %v8230_v51 = vpop.f32.mrb[152].mxu1  ;;  %6412 = vmatprep.subr.bf16.mxu1 %v6411_v39 }
 0x6d7   : > { %v3695_v52 = vpop.f32.mrb[153].mxu0  ;;  %v8232_v53 = vpop.f32.mrb[153].mxu1  ;;  %6414 = vmatpush1.bf16.msra.mxu1 %v6413_v46 }
 0x6da   : > { %v3699_v54 = vpop.f32.mrb[154].mxu0  ;;  %v8234_v55 = vpop.f32.mrb[154].mxu1 }
 0x6db   : > { %v6417_v57 = vpack.c.bf16 %v3699_v54, %v3693_v50  ;;  %v6449_v40 = vpack.c.bf16 %v8234_v55, %v8230_v51  ;;  %v3701_v58 = vpop.f32.mrb[155].mxu0  ;;  %v8238_v60 = vpop.f32.mrb[155].mxu1 }
 0x6dc   : > { %v6415_v61 = vpack.c.bf16 %v3701_v58, %v3695_v52  ;;  %v6447_v1 = vpack.c.bf16 %v8238_v60, %v8232_v53 }
 0x6de   : > { %v3705_v2 = vpop.f32.mrb[156].mxu0  ;;  %v8242_v4 = vpop.f32.mrb[156].mxu1  ;;  %6416 = vmatprep.subr.bf16.mxu1 %v6415_v61 }
 0x6df   : > { %v3707_v6 = vpop.f32.mrb[157].mxu0  ;;  %v8244_v7 = vpop.f32.mrb[157].mxu1  ;;  %6418 = vmatpush1.bf16.msra.mxu1 %v6417_v57 }
 0x6e2   : > { %v3711_v62 = vpop.f32.mrb[158].mxu0  ;;  %v8246_v3 = vpop.f32.mrb[158].mxu1 }
 0x6e3   : > { %v6421_v5 = vpack.c.bf16 %v3711_v62, %v3705_v2  ;;  %v6453_v9 = vpack.c.bf16 %v8246_v3, %v8242_v4  ;;  %v3713_v11 = vpop.f32.mrb[159].mxu0  ;;  %v8250_v22 = vpop.f32.mrb[159].mxu1  ;;  %v4150_v4 = vld [vmem:[%s8541_s16] sm:$0xff] }
 0x6e4   : > { %v6419_v47 = vpack.c.bf16 %v3713_v11, %v3707_v6  ;;  %v6451_v59 = vpack.c.bf16 %v8250_v22, %v8244_v7  ;;  %v4154_v7 = vld [vmem:[%s8541_s16 + $0x20] sm:$0xff] }
 0x6e6   : > { %v3717_v8 = vpop.f32.mrb[160].mxu0  ;;  %v8254_v0 = vpop.f32.mrb[160].mxu1  ;;  %6420 = vmatprep.subr.bf16.mxu1 %v6419_v47 }
 0x6e7   : > { %v3719_v14 = vpop.f32.mrb[161].mxu0  ;;  %v8256_v15 = vpop.f32.mrb[161].mxu1  ;;  %6422 = vmatpush1.bf16.msra.mxu1 %v6421_v5 }
 0x6ea   : > { %v3723_v16 = vpop.f32.mrb[162].mxu0  ;;  %v8258_v18 = vpop.f32.mrb[162].mxu1 }
 0x6eb   : > { %v6425_v20 = vpack.c.bf16 %v3723_v16, %v3717_v8  ;;  %v6457_v63 = vpack.c.bf16 %v8258_v18, %v8254_v0  ;;  %v3725_v21 = vpop.f32.mrb[163].mxu0  ;;  %v8262_v23 = vpop.f32.mrb[163].mxu1 }
 0x6ec   : > { %v6423_v10 = vpack.c.bf16 %v3725_v21, %v3719_v14  ;;  %v6455_v13 = vpack.c.bf16 %v8262_v23, %v8256_v15  ;;  %v4157_v15 = vld [vmem:[%s8541_s16 + $0x38] sm:$0xff]  ;;  %v4156_v23 = vld [vmem:[%s8541_s16 + $0x30] sm:$0xff] }
 0x6ee   : > { %v3729_v17 = vpop.f32.mrb[164].mxu0  ;;  %v8266_v24 = vpop.f32.mrb[164].mxu1  ;;  %6424 = vmatprep.subr.bf16.mxu1 %v6423_v10 }
 0x6ef   : > { %v3731_v19 = vpop.f32.mrb[165].mxu0  ;;  %v8268_v42 = vpop.f32.mrb[165].mxu1  ;;  %6426 = vmatpush1.bf16.msra.mxu1 %v6425_v20 }
 0x6f2   : > { %v3735_v12 = vpop.f32.mrb[166].mxu0  ;;  %v8270_v27 = vpop.f32.mrb[166].mxu1 }
 0x6f3   : > { %v6429_v29 = vpack.c.bf16 %v3735_v12, %v3729_v17  ;;  %v6461_v31 = vpack.c.bf16 %v8270_v27, %v8266_v24  ;;  %v3737_v33 = vpop.f32.mrb[167].mxu0  ;;  %v3930_v37 = vpop.f32.mrb[167].mxu1 }
 0x6f4   : > { %v6427_v41 = vpack.c.bf16 %v3737_v33, %v3731_v19  ;;  %v6459_v44 = vpack.c.bf16 %v3930_v37, %v8268_v42 }
 0x6f6   : > { %v3741_v46 = vpop.f32.mrb[168].mxu0  ;;  %v8275_v26 = vpop.f32.mrb[168].mxu1  ;;  %6428 = vmatprep.subr.bf16.mxu1 %v6427_v41 }
 0x6f7   : > { %v3743_v39 = vpop.f32.mrb[169].mxu0  ;;  %v3936_v50 = vpop.f32.mrb[169].mxu1  ;;  %6430 = vmatpush1.bf16.msra.mxu1 %v6429_v29 }
 0x6fa   : > { %v3747_v52 = vpop.f32.mrb[170].mxu0  ;;  %v3940_v54 = vpop.f32.mrb[170].mxu1 }
 0x6fb   : > { %v6433_v57 = vpack.c.bf16 %v3747_v52, %v3741_v46  ;;  %v6465_v58 = vpack.c.bf16 %v3940_v54, %v8275_v26  ;;  %v3749_v61 = vpop.f32.mrb[171].mxu0  ;;  %v3942_v2 = vpop.f32.mrb[171].mxu1  ;;  %v4163_v52 = vld [vmem:[%s8541_s16 + $0x68] sm:$0xff] }
 0x6fc   : > { %v6431_v6 = vpack.c.bf16 %v3749_v61, %v3743_v39  ;;  %v6463_v62 = vpack.c.bf16 %v3942_v2, %v3936_v50  ;;  %v4166_v61 = vld [vmem:[%s8541_s16 + $0x80] sm:$0xff] }
 0x6fe   : > { %v3753_v5 = vpop.f32.mrb[172].mxu0  ;;  %v3946_v11 = vpop.f32.mrb[172].mxu1  ;;  %6432 = vmatprep.subr.bf16.mxu1 %v6431_v6 }
 0x6ff   : > { %v3755_v47 = vpop.f32.mrb[173].mxu0  ;;  %v3948_v8 = vpop.f32.mrb[173].mxu1  ;;  %6434 = vmatpush1.bf16.msra.mxu1 %v6433_v57 }
 0x702   : > { %v3759_v14 = vpop.f32.mrb[174].mxu0  ;;  %v3952_v16 = vpop.f32.mrb[174].mxu1 }
 0x703   : > { %v6437_v20 = vpack.c.bf16 %v3759_v14, %v3753_v5  ;;  %v6469_v21 = vpack.c.bf16 %v3952_v16, %v3946_v11  ;;  %v3761_v10 = vpop.f32.mrb[175].mxu0  ;;  %v3954_v17 = vpop.f32.mrb[175].mxu1  ;;  %v4165_v5 = vld [vmem:[%s8541_s16 + $0x78] sm:$0xff]  ;;  %v4168_v16 = vld [vmem:[%s8541_s16 + $0x90] sm:$0xff] }
 0x704   : > { %v6435_v19 = vpack.c.bf16 %v3761_v10, %v3755_v47  ;;  %v6467_v42 = vpack.c.bf16 %v3954_v17, %v3948_v8  ;;  %v4169_v47 = vld [vmem:[%s8541_s16 + $0x98] sm:$0xff] }
 0x706   : > { %v4055_v12 = vpop.f32.mrb[176].mxu0  ;;  %6436 = vmatprep.subr.bf16.mxu1 %v6435_v19  ;;  %v4171_v19 = vld [vmem:[%s8541_s16 + $0xa8] sm:$0xff] }
 0x707   : > { %v4057_v29 = vpop.f32.mrb[177].mxu0  ;;  %6438 = vmatpush1.bf16.msra.mxu1 %v6437_v20  ;;  %v4172_v20 = vld [vmem:[%s8541_s16 + $0xb0] sm:$0xff] }
 0x708   : > { %6440 = vmatprep.subr.bf16.mxu1 %v6439_v36 }
 0x70a   : > { %v4061_v33 = vpop.f32.mrb[178].mxu0 }
 0x70b   : > { %v6473_v37 = vpack.c.bf16 %v4061_v33, %v4055_v12  ;;  %v4063_v41 = vpop.f32.mrb[179].mxu0  ;;  %6442 = vmatpush1.bf16.msra.mxu1 %v6441_v30  ;;  %v4175_v12 = vld [vmem:[%s8541_s16 + $0xc8] sm:$0xff]  ;;  %v4178_v33 = vld [vmem:[%s8541_s16 + $0xe0] sm:$0xff] }
 0x70c   : > { %v6471_v46 = vpack.c.bf16 %v4063_v41, %v4057_v29  ;;  %6444 = vmatprep.subr.bf16.mxu1 %v6443_v49  ;;  %v4174_v29 = vld [vmem:[%s8541_s16 + $0xc0] sm:$0xff]  ;;  %v4181_v41 = vld [vmem:[%s8541_s16 + $0xf8] sm:$0xff] }
 0x70e   : > { %v4067_v26 = vpop.f32.mrb[180].mxu0 }
 0x70f   : > { %v4069_v39 = vpop.f32.mrb[181].mxu0  ;;  %6446 = vmatpush1.bf16.msra.mxu1 %v6445_v48 }
 0x710   : > { %6448 = vmatprep.subr.bf16.mxu1 %v6447_v1 }
 0x712   : > { %v4073_v25 = vpop.f32.mrb[182].mxu0 }
 0x713   : > { %v6477_v32 = vpack.c.bf16 %v4073_v25, %v4067_v26  ;;  %v4075_v36 = vpop.f32.mrb[183].mxu0  ;;  %6450 = vmatpush1.bf16.msra.mxu1 %v6449_v40  ;;  %v4184_v26 = vld [vmem:[%s8541_s16 + $0x110] sm:$0xff]  ;;  %v4187_v25 = vld [vmem:[%s8541_s16 + $0x128] sm:$0xff] }
 0x714   : > { %v6475_v56 = vpack.c.bf16 %v4075_v36, %v4069_v39  ;;  %6452 = vmatprep.subr.bf16.mxu1 %v6451_v59  ;;  %v4153_v59 = vld [vmem:[%s8541_s16 + $0x18] sm:$0xff]  ;;  %v4183_v39 = vld [vmem:[%s8541_s16 + $0x108] sm:$0xff]  ;;  %v4190_v36 = vld [vmem:[%s8541_s16 + $0x140] sm:$0xff] }
 0x716   : > { %v4079_v28 = vpop.f32.mrb[184].mxu0 }
 0x717   : > { %v4081_v30 = vpop.f32.mrb[185].mxu0  ;;  %6454 = vmatpush1.bf16.msra.mxu1 %v6453_v9 }
 0x718   : > { %6456 = vmatprep.subr.bf16.mxu1 %v6455_v13  ;;  %v4160_v13 = vld [vmem:[%s8541_s16 + $0x50] sm:$0xff] }
 0x71a   : > { %v4085_v38 = vpop.f32.mrb[186].mxu0 }
 0x71b   : > { %v6481_v43 = vpack.c.bf16 %v4085_v38, %v4079_v28  ;;  %v4087_v45 = vpop.f32.mrb[187].mxu0  ;;  %6458 = vmatpush1.bf16.msra.mxu1 %v6457_v63  ;;  %v4193_v28 = vld [vmem:[%s8541_s16 + $0x158] sm:$0xff]  ;;  %v4196_v38 = vld [vmem:[%s8541_s16 + $0x170] sm:$0xff] }
 0x71c   : > { %v6479_v48 = vpack.c.bf16 %v4087_v45, %v4081_v30  ;;  %6460 = vmatprep.subr.bf16.mxu1 %v6459_v44  ;;  %v4159_v44 = vld [vmem:[%s8541_s16 + $0x48] sm:$0xff]  ;;  %v4192_v30 = vld [vmem:[%s8541_s16 + $0x150] sm:$0xff] }
 0x71d   : > { %v4152_v45 = vld [vmem:[%s8541_s16 + $0x10] sm:$0xff] }
 0x71e   : > { %v4091_v35 = vpop.f32.mrb[188].mxu0 }
 0x71f   : > { %v4093_v49 = vpop.f32.mrb[189].mxu0  ;;  %6462 = vmatpush1.bf16.msra.mxu1 %v6461_v31 }
 0x720   : > { %6464 = vmatprep.subr.bf16.mxu1 %v6463_v62 }
 0x722   : > { %v4097_v51 = vpop.f32.mrb[190].mxu0 }
 0x723   : > { %v6485_v53 = vpack.c.bf16 %v4097_v51, %v4091_v35  ;;  %v4099_v55 = vpop.f32.mrb[191].mxu0  ;;  %6466 = vmatpush1.bf16.msra.mxu1 %v6465_v58  ;;  %v4162_v58 = vld [vmem:[%s8541_s16 + $0x60] sm:$0xff]  ;;  %v4164_v51 = vld [vmem:[%s8541_s16 + $0x70] sm:$0xff] }
 0x724   : > { %v6483_v40 = vpack.c.bf16 %v4099_v55, %v4093_v49  ;;  %6468 = vmatprep.subr.bf16.mxu1 %v6467_v42  ;;  %v4158_v35 = vld [vmem:[%s8541_s16 + $0x40] sm:$0xff]  ;;  %v4161_v49 = vld [vmem:[%s8541_s16 + $0x58] sm:$0xff] }
 0x725   : > { %v4170_v55 = vld [vmem:[%s8541_s16 + $0xa0] sm:$0xff] }
 0x726   : > { %v4103_v60 = vpop.f32.mrb[192].mxu0 }
 0x727   : > { %v4105_v1 = vpop.f32.mrb[193].mxu0  ;;  %6470 = vmatpush1.bf16.msra.mxu1 %v6469_v21 }
 0x728   : > { %6472 = vmatprep.subr.bf16.mxu1 %v6471_v46  ;;  %v4180_v46 = vld [vmem:[%s8541_s16 + $0xf0] sm:$0xff] }
 0x72a   : > { %v4109_v3 = vpop.f32.mrb[194].mxu0  ;;  %4359 = vmatmul.mubr.f32.vlgmr.msra.gmra.mrb[176].mxu1 %v4150_v4  ;;  %v4182_v4 = vld [vmem:[%s8541_s16 + $0x100] sm:$0xff] }
 0x72b   : > { %v6489_v9 = vpack.c.bf16 %v4109_v3, %v4103_v60  ;;  %v4111_v22 = vpop.f32.mrb[195].mxu0  ;;  %6474 = vmatpush1.bf16.msra.mxu1 %v6473_v37  ;;  %4364 = vmatprep.mubr.f32.mxu1 %v4154_v7  ;;  %v4177_v37 = vld [vmem:[%s8541_s16 + $0xd8] sm:$0xff]  ;;  %v4176_v60 = vld [vmem:[%s8541_s16 + $0xd0] sm:$0xff] }
 0x72c   : > { %v6487_v0 = vpack.c.bf16 %v4111_v22, %v4105_v1  ;;  %6476 = vmatprep.subr.bf16.mxu1 %v6475_v56  ;;  %v4189_v56 = vld [vmem:[%s8541_s16 + $0x138] sm:$0xff]  ;;  %v4179_v1 = vld [vmem:[%s8541_s16 + $0xe8] sm:$0xff]  ;;  %v4188_v3 = vld [vmem:[%s8541_s16 + $0x130] sm:$0xff] }
 0x72d   : > { %v4185_v7 = vld [vmem:[%s8541_s16 + $0x118] sm:$0xff]  ;;  %v4194_v22 = vld [vmem:[%s8541_s16 + $0x160] sm:$0xff] }
 0x72e   : > { %v4115_v18 = vpop.f32.mrb[196].mxu0  ;;  %4365 = vmatmul.mubr.f32.gmra.mrb[178].mxu1 %v4153_v59  ;;  %v4197_v59 = vld [vmem:[%s8541_s16 + $0x178] sm:$0xff] }
 0x72f   : > { %v4117_v63 = vpop.f32.mrb[197].mxu0  ;;  %6478 = vmatpush1.bf16.msra.mxu1 %v6477_v32  ;;  %4370 = vmatprep.mubr.f32.mxu1 %v4157_v15  ;;  %v4186_v32 = vld [vmem:[%s8541_s16 + $0x120] sm:$0xff] }
 0x730   : > { %6480 = vmatprep.subr.bf16.mxu1 %v6479_v48  ;;  %v4155_v48 = vld [vmem:[%s8541_s16 + $0x28] sm:$0xff] }
 0x732   : > { %v4121_v24 = vpop.f32.mrb[198].mxu0  ;;  %4371 = vmatmul.mubr.f32.gmra.mrb[180].mxu1 %v4156_v23  ;;  %v4222_v23 = vpop.permute.xlu1 %4221 }
 0x733   : > { %v6493_v27 = vpack.c.bf16 %v4121_v24, %v4115_v18  ;;  %v4123_v31 = vpop.f32.mrb[199].mxu0  ;;  %6482 = vmatpush1.bf16.msra.mxu1 %v6481_v43  ;;  %4376 = vmatprep.mubr.f32.mxu1 %v4160_v13  ;;  %v4195_v43 = vld [vmem:[%s8541_s16 + $0x168] sm:$0xff]  ;;  %v4217_v18 = vpop.permute.xlu0 %4216 }
 0x734   : > { %v6491_v50 = vpack.c.bf16 %v4123_v31, %v4117_v63  ;;  %6484 = vmatprep.subr.bf16.mxu1 %v6483_v40  ;;  %v4173_v40 = vld [vmem:[%s8541_s16 + $0xb8] sm:$0xff] }
 0x736   : > { %v4127_v54 = vpop.f32.mrb[200].mxu0  ;;  %4377 = vmatmul.mubr.f32.gmra.mrb[182].mxu1 %v4159_v44 }
 0x737   : > { %v4129_v57 = vpop.f32.mrb[201].mxu0  ;;  %6486 = vmatpush1.bf16.msra.mxu1 %v6485_v53  ;;  %4382 = vmatprep.mubr.f32.mxu1 %v4163_v52  ;;  %v4167_v53 = vld [vmem:[%s8541_s16 + $0x88] sm:$0xff] }
 0x738   : > { %6488 = vmatprep.subr.bf16.mxu1 %v6487_v0 }
 0x73a   : > { %v4133_v2 = vpop.f32.mrb[202].mxu0  ;;  %4383 = vmatmul.mubr.f32.gmra.mrb[184].mxu1 %v4162_v58 }
 0x73b   : > { %v6497_v6 = vpack.c.bf16 %v4133_v2, %v4127_v54  ;;  %v4135_v62 = vpop.f32.mrb[203].mxu0  ;;  %6490 = vmatpush1.bf16.msra.mxu1 %v6489_v9  ;;  %4388 = vmatprep.mubr.f32.mxu1 %v4166_v61  ;;  %v4191_v9 = vld [vmem:[%s8541_s16 + $0x148] sm:$0xff] }
 0x73c   : > { %v6495_v11 = vpack.c.bf16 %v4135_v62, %v4129_v57  ;;  %6492 = vmatprep.subr.bf16.mxu1 %v6491_v50 }
 0x73e   : > { %v4139_v8 = vpop.f32.mrb[204].mxu0  ;;  %4389 = vmatmul.mubr.f32.gmra.mrb[186].mxu1 %v4165_v5 }
 0x73f   : > { %v4141_v14 = vpop.f32.mrb[205].mxu0  ;;  %6494 = vmatpush1.bf16.msra.mxu1 %v6493_v27  ;;  %4394 = vmatprep.mubr.f32.mxu1 %v4169_v47 }
 0x740   : > { %6496 = vmatprep.subr.bf16.mxu1 %v6495_v11  ;;  %v4232_v11 = vpop.permute.xlu1 %4231 }
 0x742   : > { %v4145_v21 = vpop.f32.mrb[206].mxu0  ;;  %4395 = vmatmul.mubr.f32.gmra.mrb[188].mxu1 %v4168_v16 }
 0x743   : > { %v6501_v10 = vpack.c.bf16 %v4145_v21, %v4139_v8  ;;  %v4147_v17 = vpop.f32.mrb[207].mxu0  ;;  %6498 = vmatpush1.bf16.msra.mxu1 %v6497_v6  ;;  %4400 = vmatprep.mubr.f32.mxu1 %v4172_v20  ;;  %v4227_v6 = vpop.permute.xlu0 %4226 }
 0x744   : > { %v6499_v42 = vpack.c.bf16 %v4147_v17, %v4141_v14 }
 0x746   : > { %4401 = vmatmul.mubr.f32.gmra.mrb[190].mxu1 %v4171_v19  ;;  %6500 = vmatprep.subr.bf16.mxu1 %v6499_v42 }
 0x747   : > { %6502 = vmatpush1.bf16.msra.mxu1 %v6501_v10  ;;  %4406 = vmatprep.mubr.f32.mxu1 %v4175_v12 }
 0x74a   : > { %4407 = vmatmul.mubr.f32.gmra.mrb[192].mxu1 %v4174_v29 }
 0x74b   : > { %4412 = vmatprep.mubr.f32.mxu1 %v4178_v33  ;;  %v4237_v33 = vpop.permute.xlu0 %4236 }
 0x74e   : > { %4413 = vmatmul.mubr.f32.gmra.mrb[194].mxu1 %v4177_v37 }
 0x74f   : > { %4418 = vmatprep.mubr.f32.mxu1 %v4181_v41 }
 0x752   : > { %4419 = vmatmul.mubr.f32.gmra.mrb[196].mxu1 %v4180_v46  ;;  %v4242_v46 = vpop.permute.xlu1 %4241 }
 0x753   : > { %4424 = vmatprep.mubr.f32.mxu1 %v4184_v26 }
 0x756   : > { %4425 = vmatmul.mubr.f32.gmra.mrb[198].mxu1 %v4183_v39 }
 0x757   : > { %4430 = vmatprep.mubr.f32.mxu1 %v4187_v25 }
 0x75a   : > { %4431 = vmatmul.mubr.f32.gmra.mrb[200].mxu1 %v4186_v32 }
 0x75b   : > { %4436 = vmatprep.mubr.f32.mxu1 %v4190_v36 }
 0x75e   : > { %4437 = vmatmul.mubr.f32.gmra.mrb[202].mxu1 %v4189_v56 }
 0x75f   : > { %4442 = vmatprep.mubr.f32.mxu1 %v4193_v28 }
 0x762   : > { %4443 = vmatmul.mubr.f32.gmra.mrb[204].mxu1 %v4192_v30 }
 0x763   : > { %4448 = vmatprep.mubr.f32.mxu1 %v4196_v38 }
 0x766   : > { %4449 = vmatmul.mubr.f32.gmra.mrb[206].mxu1 %v4195_v43 }
 0x767   : > { %4519 = vmatprep.mubr.f32.mxu1 %v6620_v34 }
 0x76a   : > { %4520 = vmatmul.mubr.f32.vlgmr.msra.gmra.mrb[176].mxu1 %v4152_v45 }
 0x76b   : > { %4525 = vmatprep.mubr.f32.mxu1 %v6620_v34 }
 0x76e   : > { %4526 = vmatmul.mubr.f32.gmra.mrb[178].mxu1 %v4155_v48 }
 0x76f   : > { %4531 = vmatprep.mubr.f32.mxu1 %v6620_v34 }
 0x772   : > { %4532 = vmatmul.mubr.f32.gmra.mrb[180].mxu1 %v4158_v35  ;;  %v4247_v35 = vpop.permute.xlu0 %4246 }
 0x773   : > { %4537 = vmatprep.mubr.f32.mxu1 %v6620_v34 }
 0x776   : > { %4538 = vmatmul.mubr.f32.gmra.mrb[182].mxu1 %v4161_v49 }
 0x777   : > { %4543 = vmatprep.mubr.f32.mxu1 %v6620_v34 }
 0x77a   : > { %4544 = vmatmul.mubr.f32.gmra.mrb[184].mxu1 %v4164_v51 }
 0x77b   : > { %4549 = vmatprep.mubr.f32.mxu1 %v6620_v34 }
 0x77e   : > { %4550 = vmatmul.mubr.f32.gmra.mrb[186].mxu1 %v4167_v53  ;;  %v4252_v53 = vpop.permute.xlu1 %4251 }
 0x77f   : > { %4555 = vmatprep.mubr.f32.mxu1 %v6620_v34 }
 0x782   : > { %4556 = vmatmul.mubr.f32.gmra.mrb[188].mxu1 %v4170_v55 }
 0x783   : > { %4561 = vmatprep.mubr.f32.mxu1 %v6620_v34 }
 0x786   : > { %4562 = vmatmul.mubr.f32.gmra.mrb[190].mxu1 %v4173_v40 }
 0x787   : > { %4567 = vmatprep.mubr.f32.mxu1 %v6620_v34 }
 0x78a   : > { %4568 = vmatmul.mubr.f32.gmra.mrb[192].mxu1 %v4176_v60 }
 0x78b   : > { %4573 = vmatprep.mubr.f32.mxu1 %v6620_v34 }
 0x78e   : > { %4574 = vmatmul.mubr.f32.gmra.mrb[194].mxu1 %v4179_v1 }
 0x78f   : > { %4579 = vmatprep.mubr.f32.mxu1 %v6620_v34 }
 0x792   : > { %4580 = vmatmul.mubr.f32.gmra.mrb[196].mxu1 %v4182_v4 }
 0x793   : > { %4585 = vmatprep.mubr.f32.mxu1 %v6620_v34 }
 0x796   : > { %4586 = vmatmul.mubr.f32.gmra.mrb[198].mxu1 %v4185_v7 }
 0x797   : > { %4591 = vmatprep.mubr.f32.mxu1 %v6620_v34 }
 0x79a   : > { %4592 = vmatmul.mubr.f32.gmra.mrb[200].mxu1 %v4188_v3 }
 0x79b   : > { %4597 = vmatprep.mubr.f32.mxu1 %v6620_v34 }
 0x79e   : > { %4598 = vmatmul.mubr.f32.gmra.mrb[202].mxu1 %v4191_v9 }
 0x79f   : > { %4603 = vmatprep.mubr.f32.mxu1 %v6620_v34 }
 0x7a2   : > { %4604 = vmatmul.mubr.f32.gmra.mrb[204].mxu1 %v4194_v22 }
 0x7a3   : > { %4609 = vmatprep.mubr.f32.mxu1 %v6620_v34 }
 0x7a6   : > { %4610 = vmatmul.mubr.f32.gmra.mrb[206].mxu1 %v4197_v59 }
 0x83d   : > { %v4521_v0 = vpop.f32.mrb[176].mxu1 }
 0x83e   : > { %v4523_v15 = vpop.f32.mrb[177].mxu1  ;;  %v6535_v63 = vadd.f32 %v4521_v0, %v4217_v18 }
 0x83f   : > { %v6536_v13 = vadd.f32 %v4523_v15, %v4217_v18  ;;  %v4257_v18 = vpop.permute.xlu0 %4256 }
 0x840   : > { %v4616_v50 = vmax.f32 %v6535_v63, 0.0 }
 0x841   : > { %v4527_v24 = vpop.f32.mrb[178].mxu1  ;;  %v4617_v54 = vmax.f32 %v6536_v13, 0.0  ;;  %v4262_v13 = vpop.permute.xlu1 %4261 }
 0x842   : > { %v6537_v27 = vadd.f32 %v4527_v24, %v4222_v23  ;;  %v4529_v31 = vpop.f32.mrb[179].mxu1 }
 0x843   : > { %v6538_v44 = vadd.f32 %v4529_v31, %v4222_v23 }
 0x844   : > { %v4618_v52 = vmax.f32 %v6537_v27, 0.0 }
 0x845   : > { %v4619_v57 = vmax.f32 %v6538_v44, 0.0  ;;  %v4533_v58 = vpop.f32.mrb[180].mxu1 }
 0x846   : > { %v6505_v61 = vpack.c.bf16 %v4618_v52, %v4616_v50  ;;  %v4535_v2 = vpop.f32.mrb[181].mxu1  ;;  %v6539_v5 = vadd.f32 %v4533_v58, %v4227_v6 }
 0x847   : > { %v6503_v62 = vpack.c.bf16 %v4619_v57, %v4617_v54  ;;  %v6540_v47 = vadd.f32 %v4535_v2, %v4227_v6 }
 0x848   : > { %v4620_v21 = vmax.f32 %v6539_v5, 0.0 }
 0x849   : > { %v4539_v8 = vpop.f32.mrb[182].mxu1  ;;  %6504 = vmatprep.subr.bf16.mxu0 %v6503_v62  ;;  %v4621_v17 = vmax.f32 %v6540_v47, 0.0  ;;  %v4267_v62 = vpop.permute.xlu0 %4266 }
 0x84a   : > { %v6541_v14 = vadd.f32 %v4539_v8, %v4232_v11  ;;  %v4541_v16 = vpop.f32.mrb[183].mxu1  ;;  %6506 = vmatpush1.bf16.msra.mxu0 %v6505_v61  ;;  %v4272_v47 = vpop.permute.xlu1 %4271 }
 0x84b   : > { %v6542_v20 = vadd.f32 %v4541_v16, %v4232_v11 }
 0x84c   : > { %v4622_v10 = vmax.f32 %v6541_v14, 0.0 }
 0x84d   : > { %v4623_v19 = vmax.f32 %v6542_v20, 0.0  ;;  %v4545_v42 = vpop.f32.mrb[184].mxu1 }
 0x84e   : > { %v6509_v12 = vpack.c.bf16 %v4622_v10, %v4620_v21  ;;  %v4547_v29 = vpop.f32.mrb[185].mxu1  ;;  %v6543_v41 = vadd.f32 %v4545_v42, %v4237_v33 }
 0x84f   : > { %v6507_v37 = vpack.c.bf16 %v4623_v19, %v4621_v17  ;;  %v6544_v26 = vadd.f32 %v4547_v29, %v4237_v33 }
 0x850   : > { %v4624_v56 = vmax.f32 %v6543_v41, 0.0 }
 0x851   : > { %v4551_v39 = vpop.f32.mrb[186].mxu1  ;;  %6508 = vmatprep.subr.bf16.mxu0 %v6507_v37  ;;  %v4625_v30 = vmax.f32 %v6544_v26, 0.0  ;;  %v4277_v37 = vpop.permute.xlu0 %4276 }
 0x852   : > { %v6545_v25 = vadd.f32 %v4551_v39, %v4242_v46  ;;  %v4553_v32 = vpop.f32.mrb[187].mxu1  ;;  %6510 = vmatpush1.bf16.msra.mxu0 %v6509_v12  ;;  %v4282_v26 = vpop.permute.xlu1 %4281 }
 0x853   : > { %v6546_v36 = vadd.f32 %v4553_v32, %v4242_v46 }
 0x854   : > { %v4626_v28 = vmax.f32 %v6545_v25, 0.0 }
 0x855   : > { %v4627_v38 = vmax.f32 %v6546_v36, 0.0  ;;  %v4557_v43 = vpop.f32.mrb[188].mxu1 }
 0x856   : > { %v6513_v45 = vpack.c.bf16 %v4626_v28, %v4624_v56  ;;  %v4559_v48 = vpop.f32.mrb[189].mxu1  ;;  %v6547_v51 = vadd.f32 %v4557_v43, %v4247_v35 }
 0x857   : > { %v6511_v49 = vpack.c.bf16 %v4627_v38, %v4625_v30  ;;  %v6548_v55 = vadd.f32 %v4559_v48, %v4247_v35 }
 0x858   : > { %v4628_v7 = vmax.f32 %v6547_v51, 0.0 }
 0x859   : > { %v4563_v40 = vpop.f32.mrb[190].mxu1  ;;  %6512 = vmatprep.subr.bf16.mxu0 %v6511_v49  ;;  %v4629_v9 = vmax.f32 %v6548_v55, 0.0  ;;  %v4287_v49 = vpop.permute.xlu0 %4286 }
 0x85a   : > { %v6549_v60 = vadd.f32 %v4563_v40, %v4252_v53  ;;  %v4565_v1 = vpop.f32.mrb[191].mxu1  ;;  %6514 = vmatpush1.bf16.msra.mxu0 %v6513_v45  ;;  %v4292_v55 = vpop.permute.xlu1 %4291 }
 0x85b   : > { %v6550_v4 = vadd.f32 %v4565_v1, %v4252_v53 }
 0x85c   : > { %v4630_v3 = vmax.f32 %v6549_v60, 0.0 }
 0x85d   : > { %v4631_v22 = vmax.f32 %v6550_v4, 0.0  ;;  %v4569_v59 = vpop.f32.mrb[192].mxu1 }
 0x85e   : > { %v6517_v0 = vpack.c.bf16 %v4630_v3, %v4628_v7  ;;  %v4571_v15 = vpop.f32.mrb[193].mxu1  ;;  %v6551_v23 = vadd.f32 %v4569_v59, %v4257_v18 }
 0x85f   : > { %v6515_v63 = vpack.c.bf16 %v4631_v22, %v4629_v9  ;;  %v6552_v24 = vadd.f32 %v4571_v15, %v4257_v18  ;;  %v4648_v18 = vld [vmem:[%s8546_s21] sm:$0xff] }
 0x860   : > { %v4632_v52 = vmax.f32 %v6551_v23, 0.0  ;;  %v4650_v23 = vld [vmem:[%s8546_s21 + $0x10] sm:$0xff] }
 0x861   : > { %v4575_v27 = vpop.f32.mrb[194].mxu1  ;;  %6516 = vmatprep.subr.bf16.mxu0 %v6515_v63  ;;  %v4633_v57 = vmax.f32 %v6552_v24, 0.0  ;;  %v4649_v63 = vld [vmem:[%s8546_s21 + $0x8] sm:$0xff]  ;;  %v4652_v24 = vld [vmem:[%s8546_s21 + $0x20] sm:$0xff] }
 0x862   : > { %v6553_v31 = vadd.f32 %v4575_v27, %v4262_v13  ;;  %v4577_v44 = vpop.f32.mrb[195].mxu1  ;;  %6518 = vmatpush1.bf16.msra.mxu0 %v6517_v0  ;;  %v4653_v27 = vld [vmem:[%s8546_s21 + $0x28] sm:$0xff] }
 0x863   : > { %v6554_v50 = vadd.f32 %v4577_v44, %v4262_v13  ;;  %v4651_v13 = vld [vmem:[%s8546_s21 + $0x18] sm:$0xff] }
 0x864   : > { %v4634_v54 = vmax.f32 %v6553_v31, 0.0  ;;  %v4654_v31 = vld [vmem:[%s8546_s21 + $0x30] sm:$0xff]  ;;  %v4655_v44 = vld [vmem:[%s8546_s21 + $0x38] sm:$0xff] }
 0x865   : > { %v4635_v58 = vmax.f32 %v6554_v50, 0.0  ;;  %v4581_v61 = vpop.f32.mrb[196].mxu1  ;;  %v4667_v50 = vpop.permute.xlu0 %4666 }
 0x866   : > { %v6521_v2 = vpack.c.bf16 %v4634_v54, %v4632_v52  ;;  %v4583_v6 = vpop.f32.mrb[197].mxu1  ;;  %v6555_v11 = vadd.f32 %v4581_v61, %v4267_v62 }
 0x867   : > { %v6519_v5 = vpack.c.bf16 %v4635_v58, %v4633_v57  ;;  %v6556_v8 = vadd.f32 %v4583_v6, %v4267_v62  ;;  %v4672_v58 = vpop.permute.xlu1 %4671 }
 0x868   : > { %v4636_v10 = vmax.f32 %v6555_v11, 0.0 }
 0x869   : > { %v4587_v14 = vpop.f32.mrb[198].mxu1  ;;  %6520 = vmatprep.subr.bf16.mxu0 %v6519_v5  ;;  %v4637_v19 = vmax.f32 %v6556_v8, 0.0  ;;  %v4677_v5 = vpop.permute.xlu0 %4676 }
 0x86a   : > { %v6557_v16 = vadd.f32 %v4587_v14, %v4272_v47  ;;  %v4589_v20 = vpop.f32.mrb[199].mxu1  ;;  %6522 = vmatpush1.bf16.msra.mxu0 %v6521_v2 }
 0x86b   : > { %v6558_v21 = vadd.f32 %v4589_v20, %v4272_v47 }
 0x86c   : > { %v4638_v17 = vmax.f32 %v6557_v16, 0.0  ;;  %v4682_v16 = vpop.permute.xlu1 %4681 }
 0x86d   : > { %v4639_v42 = vmax.f32 %v6558_v21, 0.0  ;;  %v4593_v12 = vpop.f32.mrb[200].mxu1 }
 0x86e   : > { %v6525_v29 = vpack.c.bf16 %v4638_v17, %v4636_v10  ;;  %v4595_v33 = vpop.f32.mrb[201].mxu1  ;;  %v6559_v46 = vadd.f32 %v4593_v12, %v4277_v37 }
 0x86f   : > { %v6523_v41 = vpack.c.bf16 %v4639_v42, %v4637_v19  ;;  %v6560_v39 = vadd.f32 %v4595_v33, %v4277_v37  ;;  %v4687_v19 = vpop.permute.xlu0 %4686 }
 0x870   : > { %v4640_v28 = vmax.f32 %v6559_v46, 0.0  ;;  %v4692_v37 = vpop.permute.xlu1 %4691 }
 0x871   : > { %v4599_v25 = vpop.f32.mrb[202].mxu1  ;;  %6524 = vmatprep.subr.bf16.mxu0 %v6523_v41  ;;  %v4641_v38 = vmax.f32 %v6560_v39, 0.0 }
 0x872   : > { %v6561_v32 = vadd.f32 %v4599_v25, %v4282_v26  ;;  %v4601_v36 = vpop.f32.mrb[203].mxu1  ;;  %6526 = vmatpush1.bf16.msra.mxu0 %v6525_v29 }
 0x873   : > { %v6562_v56 = vadd.f32 %v4601_v36, %v4282_v26  ;;  %v4697_v25 = vpop.permute.xlu0 %4696 }
 0x874   : > { %v4642_v30 = vmax.f32 %v6561_v32, 0.0 }
 0x875   : > { %v4643_v43 = vmax.f32 %v6562_v56, 0.0  ;;  %v4605_v45 = vpop.f32.mrb[204].mxu1 }
 0x876   : > { %v6529_v48 = vpack.c.bf16 %v4642_v30, %v4640_v28  ;;  %v4607_v35 = vpop.f32.mrb[205].mxu1  ;;  %v6563_v53 = vadd.f32 %v4605_v45, %v4287_v49  ;;  %v4702_v30 = vpop.permute.xlu1 %4701 }
 0x877   : > { %v6527_v51 = vpack.c.bf16 %v4643_v43, %v4641_v38  ;;  %v6564_v40 = vadd.f32 %v4607_v35, %v4287_v49 }
 0x878   : > { %v4644_v3 = vmax.f32 %v6563_v53, 0.0 }
 0x879   : > { %v4611_v60 = vpop.f32.mrb[206].mxu1  ;;  %6528 = vmatprep.subr.bf16.mxu0 %v6527_v51  ;;  %v4645_v22 = vmax.f32 %v6564_v40, 0.0 }
 0x87a   : > { %v6565_v1 = vadd.f32 %v4611_v60, %v4292_v55  ;;  %v4613_v4 = vpop.f32.mrb[207].mxu1  ;;  %6530 = vmatpush1.bf16.msra.mxu0 %v6529_v48 }
 0x87b   : > { %v6566_v7 = vadd.f32 %v4613_v4, %v4292_v55 }
 0x87c   : > { %v4646_v9 = vmax.f32 %v6565_v1, 0.0 }
 0x87d   : > { %v4647_v59 = vmax.f32 %v6566_v7, 0.0 }
 0x87e   : > { %v6533_v0 = vpack.c.bf16 %v4646_v9, %v4644_v3 }
 0x87f   : > { %v6531_v15 = vpack.c.bf16 %v4647_v59, %v4645_v22 }
 0x881   : > { %6532 = vmatprep.subr.bf16.mxu0 %v6531_v15 }
 0x882   : > { %6534 = vmatpush1.bf16.msra.mxu0 %v6533_v0 }
 0x885   : > { %4769 = vmatmul.mubr.f32.vlgmr.msra.gmra.mrb[208].mxu0 %v4648_v18 }
 0x886   : > { %4774 = vmatprep.mubr.f32.mxu0 %v6620_v34 }
 0x889   : > { %4775 = vmatmul.mubr.f32.gmra.mrb[210].mxu0 %v4649_v63 }
 0x88a   : > { %4780 = vmatprep.mubr.f32.mxu0 %v6620_v34 }
 0x88d   : > { %4781 = vmatmul.mubr.f32.gmra.mrb[212].mxu0 %v4650_v23 }
 0x88e   : > { %4786 = vmatprep.mubr.f32.mxu0 %v6620_v34 }
 0x891   : > { %4787 = vmatmul.mubr.f32.gmra.mrb[214].mxu0 %v4651_v13 }
 0x892   : > { %4792 = vmatprep.mubr.f32.mxu0 %v6620_v34 }
 0x895   : > { %4793 = vmatmul.mubr.f32.gmra.mrb[216].mxu0 %v4652_v24 }
 0x896   : > { %4798 = vmatprep.mubr.f32.mxu0 %v6620_v34 }
 0x899   : > { %4799 = vmatmul.mubr.f32.gmra.mrb[218].mxu0 %v4653_v27 }
 0x89a   : > { %4804 = vmatprep.mubr.f32.mxu0 %v6620_v34 }
 0x89d   : > { %4805 = vmatmul.mubr.f32.gmra.mrb[220].mxu0 %v4654_v31 }
 0x89e   : > { %4810 = vmatprep.mubr.f32.mxu0 %v6620_v34 }
 0x8a1   : > { %4811 = vmatmul.mubr.f32.gmra.mrb[222].mxu0 %v4655_v44 }
 0x958   : > { %v4770_v52 = vpop.f32.mrb[208].mxu0 }
 0x959   : > { %v4771_v54 = vadd.f32 %v4770_v52, %v4667_v50  ;;  %v4772_v57 = vpop.f32.mrb[209].mxu0 }
 0x95a   : > { %v4773_v34 = vadd.f32 %v4772_v57, %v4667_v50 }
 0x95b   : > { %4817 = vst [vmem:[%s8504_s0] sm:$0xff] %v4771_v54 }
 0x95c   : > { %4818 = vst [vmem:[%s8504_s0 + $0x8] sm:$0xff] %v4773_v34  ;;  %v4776_v61 = vpop.f32.mrb[210].mxu0 }
 0x95d   : > { %v4777_v2 = vadd.f32 %v4776_v61, %v4672_v58  ;;  %v4778_v6 = vpop.f32.mrb[211].mxu0 }
 0x95e   : > { %v4779_v62 = vadd.f32 %v4778_v6, %v4672_v58 }
 0x95f   : > { %4819 = vst [vmem:[%s8504_s0 + $0x10] sm:$0xff] %v4777_v2 }
 0x960   : > { %4820 = vst [vmem:[%s8504_s0 + $0x18] sm:$0xff] %v4779_v62  ;;  %v4782_v11 = vpop.f32.mrb[212].mxu0 }
 0x961   : > { %v4783_v47 = vadd.f32 %v4782_v11, %v4677_v5  ;;  %v4784_v8 = vpop.f32.mrb[213].mxu0 }
 0x962   : > { %v4785_v14 = vadd.f32 %v4784_v8, %v4677_v5 }
 0x963   : > { %4821 = vst [vmem:[%s8504_s0 + $0x20] sm:$0xff] %v4783_v47 }
 0x964   : > { %4822 = vst [vmem:[%s8504_s0 + $0x28] sm:$0xff] %v4785_v14  ;;  %v4788_v20 = vpop.f32.mrb[214].mxu0 }
 0x965   : > { %v4789_v21 = vadd.f32 %v4788_v20, %v4682_v16  ;;  %v4790_v10 = vpop.f32.mrb[215].mxu0 }
 0x966   : > { %v4791_v17 = vadd.f32 %v4790_v10, %v4682_v16 }
 0x967   : > { %4823 = vst [vmem:[%s8504_s0 + $0x30] sm:$0xff] %v4789_v21 }
 0x968   : > { %4824 = vst [vmem:[%s8504_s0 + $0x38] sm:$0xff] %v4791_v17  ;;  %v4794_v42 = vpop.f32.mrb[216].mxu0 }
 0x969   : > { %v4795_v12 = vadd.f32 %v4794_v42, %v4687_v19  ;;  %v4796_v29 = vpop.f32.mrb[217].mxu0 }
 0x96a   : > { %v4797_v33 = vadd.f32 %v4796_v29, %v4687_v19 }
 0x96b   : > { %4825 = vst [vmem:[%s8504_s0 + $0x40] sm:$0xff] %v4795_v12 }
 0x96c   : > { %4826 = vst [vmem:[%s8504_s0 + $0x48] sm:$0xff] %v4797_v33  ;;  %v4800_v41 = vpop.f32.mrb[218].mxu0 }
 0x96d   : > { %v4801_v46 = vadd.f32 %v4800_v41, %v4692_v37  ;;  %v4802_v26 = vpop.f32.mrb[219].mxu0 }
 0x96e   : > { %v4803_v39 = vadd.f32 %v4802_v26, %v4692_v37 }
 0x96f   : > { %4827 = vst [vmem:[%s8504_s0 + $0x50] sm:$0xff] %v4801_v46 }
 0x970   : > { %4828 = vst [vmem:[%s8504_s0 + $0x58] sm:$0xff] %v4803_v39  ;;  %v4806_v32 = vpop.f32.mrb[220].mxu0 }
 0x971   : > { %v4807_v36 = vadd.f32 %v4806_v32, %v4697_v25  ;;  %v4808_v56 = vpop.f32.mrb[221].mxu0 }
 0x972   : > { %v4809_v28 = vadd.f32 %v4808_v56, %v4697_v25 }
 0x973   : > { %4829 = vst [vmem:[%s8504_s0 + $0x60] sm:$0xff] %v4807_v36 }
 0x974   : > { %4830 = vst [vmem:[%s8504_s0 + $0x68] sm:$0xff] %v4809_v28  ;;  %v4812_v38 = vpop.f32.mrb[222].mxu0 }
 0x975   : > { %v4813_v43 = vadd.f32 %v4812_v38, %v4702_v30  ;;  %v4814_v45 = vpop.f32.mrb[223].mxu0 }
 0x976   : > { %v4815_v48 = vadd.f32 %v4814_v45, %v4702_v30 }
 0x977   : > { %4831 = vst [vmem:[%s8504_s0 + $0x70] sm:$0xff] %v4813_v43 }
 0x978   : > { %4832 = vst [vmem:[%s8504_s0 + $0x78] sm:$0xff] %v4815_v48 }
 0x979 PF: > { %s33_s4 = sadd.s32 1, %s6617_s4  }
 0x97a   : > { %p30_p4 = scmp.ge.s32.totalorder %s33_s4, 4  }
 0x97c   :  { %32 = sbr.rel (!%p30_p4) target bundleno = 9 (0x9), region = 142 }

</bundles_post_ra>
